<compile_context>
chip_gen: v6e
topology: v6e:2x2x1
jax: 0.10.0
libtpu: 0.0.40
codegen_flags: <defaults>
</compile_context>

<pallas_src>
import functools
import math

import jax
import jax.numpy as jnp
from jax.experimental import pallas as pl
from jax.experimental.pallas import tpu as pltpu

NEG = jnp.float32(-1e9)        # stand-in for -inf when building additive masks
LN_EPS = 1e-5
VMEM_LIMIT = 32 * 1024 * 1024  # conservative: fits the v7x scoped default too


# --------------------------------------------------------------------------
# In-kernel helpers (value-level, used inside fused kernels)
# --------------------------------------------------------------------------
def _ln(x, g, b):
    mean = jnp.mean(x, axis=-1, keepdims=True)
    c = x - mean
    var = jnp.mean(c * c, axis=-1, keepdims=True)
    return c * jax.lax.rsqrt(var + LN_EPS) * g + b


def _mha_core(q, k, v, bias, nhead, scale):
    """q:(Lq,D) k,v:(Lk,D) bias:(Lq,Lk) or (1,Lk) additive. Returns (Lq,D)."""
    D = q.shape[-1]
    Dh = D // nhead
    outs = []
    for h in range(nhead):                      # static unrolled head loop
        qh = q[:, h * Dh:(h + 1) * Dh]
        kh = k[:, h * Dh:(h + 1) * Dh]
        vh = v[:, h * Dh:(h + 1) * Dh]
        s = jnp.dot(qh, kh.T, preferred_element_type=jnp.float32) * scale + bias
        m = jnp.max(s, axis=-1, keepdims=True)
        p = jnp.exp(s - m)
        denom = jnp.sum(p, axis=-1, keepdims=True)
        outs.append(jnp.dot(p, vh, preferred_element_type=jnp.float32)
                    * pl.reciprocal(denom, approx=True))
    return jnp.concatenate(outs, axis=-1)


# --------------------------------------------------------------------------
# Fused embedder MLP kernel (Linear [ReLU Linear]*n), M-tiled
# --------------------------------------------------------------------------
def _mlp_kernel(*refs, n_layers):
    x = refs[0][...]
    o_ref = refs[-1]
    for i in range(n_layers):
        w = refs[1 + 2 * i][...]
        b = refs[2 + 2 * i][...]
        x = jnp.dot(x, w, preferred_element_type=jnp.float32) + b
        if i < n_layers - 1:
            x = jnp.maximum(x, 0.0)
    o_ref[...] = x.astype(o_ref.dtype)


def fused_mlp(x2d, layers):
    """x2d:(M,K0); layers: list of (w:(Ki,Ki+1), b:(Ki+1,)). ReLU between layers."""
    M, K0 = x2d.shape
    n_layers = len(layers)
    d_out = layers[-1][0].shape[1]
    tm = M if M <= 512 else 512                       # scalable M tiling
    in_specs = [pl.BlockSpec((tm, K0), lambda i: (i, 0))]
    args = [x2d]
    for (w, b) in layers:
        in_specs.append(pl.BlockSpec(w.shape, lambda i: (0, 0)))
        in_specs.append(pl.BlockSpec((1, b.shape[0]), lambda i: (0, 0)))
        args.append(w)
        args.append(b.reshape(1, -1))
    flops = 2 * M * sum(w.shape[0] * w.shape[1] for w, _ in layers)
    bytes_acc = 4 * (x2d.size + M * d_out
                     + sum(w.size + b.size for w, b in layers))
    return pl.pallas_call(
        functools.partial(_mlp_kernel, n_layers=n_layers),
        out_shape=jax.ShapeDtypeStruct((M, d_out), x2d.dtype),
        grid=(pl.cdiv(M, tm),),
        in_specs=in_specs,
        out_specs=pl.BlockSpec((tm, d_out), lambda i: (i, 0)),
        compiler_params=pltpu.CompilerParams(
            dimension_semantics=("parallel",), vmem_limit_bytes=VMEM_LIMIT),
        cost_estimate=pl.CostEstimate(flops=flops, transcendentals=0,
                                      bytes_accessed=bytes_acc),
    )(*args)


# --------------------------------------------------------------------------
# Plain LayerNorm kernel (final encoder norm)
# --------------------------------------------------------------------------
def _ln_kernel(x_ref, g_ref, b_ref, o_ref):
    o_ref[...] = _ln(x_ref[...], g_ref[...], b_ref[...]).astype(o_ref.dtype)


def layernorm(x2d, gamma, beta):
    M, D = x2d.shape
    tm = M if M <= 1024 else 512
    return pl.pallas_call(
        _ln_kernel,
        out_shape=jax.ShapeDtypeStruct((M, D), x2d.dtype),
        grid=(pl.cdiv(M, tm),),
        in_specs=[pl.BlockSpec((tm, D), lambda i: (i, 0)),
                  pl.BlockSpec((1, D), lambda i: (0, 0)),
                  pl.BlockSpec((1, D), lambda i: (0, 0))],
        out_specs=pl.BlockSpec((tm, D), lambda i: (i, 0)),
        compiler_params=pltpu.CompilerParams(
            dimension_semantics=("parallel",), vmem_limit_bytes=VMEM_LIMIT),
        cost_estimate=pl.CostEstimate(flops=6 * M * D, transcendentals=M,
                                      bytes_accessed=4 * (2 * M * D + 2 * D)),
    )(x2d, gamma.reshape(1, -1), beta.reshape(1, -1))


# --------------------------------------------------------------------------
# Fused final-decoder-LayerNorm + concatenated output heads
# --------------------------------------------------------------------------
def _norm_heads_kernel(x_ref, g_ref, b_ref, w_ref, bh_ref, o_ref):
    x = _ln(x_ref[...], g_ref[...], b_ref[...])
    o_ref[...] = (jnp.dot(x, w_ref[...], preferred_element_type=jnp.float32)
                  + bh_ref[...]).astype(o_ref.dtype)


def norm_heads(x2d, gamma, beta, w, b):
    M, D = x2d.shape
    Dout = w.shape[1]
    tm = M if M <= 1024 else 512
    return pl.pallas_call(
        _norm_heads_kernel,
        out_shape=jax.ShapeDtypeStruct((M, Dout), x2d.dtype),
        grid=(pl.cdiv(M, tm),),
        in_specs=[pl.BlockSpec((tm, D), lambda i: (i, 0)),
                  pl.BlockSpec((1, D), lambda i: (0, 0)),
                  pl.BlockSpec((1, D), lambda i: (0, 0)),
                  pl.BlockSpec((D, Dout), lambda i: (0, 0)),
                  pl.BlockSpec((1, Dout), lambda i: (0, 0))],
        out_specs=pl.BlockSpec((tm, Dout), lambda i: (i, 0)),
        compiler_params=pltpu.CompilerParams(
            dimension_semantics=("parallel",), vmem_limit_bytes=VMEM_LIMIT),
        cost_estimate=pl.CostEstimate(
            flops=2 * M * D * Dout + 6 * M * D, transcendentals=M,
            bytes_accessed=4 * (M * D + M * Dout + D * Dout + 3 * D + Dout)),
    )(x2d, gamma.reshape(1, -1), beta.reshape(1, -1), w, b.reshape(1, -1))


# --------------------------------------------------------------------------
# Fused transformer encoder layer (one pallas_call per layer, grid over batch)
# --------------------------------------------------------------------------
def _enc_layer_kernel(x_ref, bias_ref, wqkv_ref, bqkv_ref, wo_ref, bo_ref,
                      g1_ref, b1_ref, w1_ref, c1_ref, w2_ref, c2_ref,
                      g2_ref, b2_ref, o_ref, *, nhead, scale):
    x = x_ref[...]
    D = x.shape[-1]
    qkv = jnp.dot(x, wqkv_ref[...],
                  preferred_element_type=jnp.float32) + bqkv_ref[...]
    attn = _mha_core(qkv[:, :D], qkv[:, D:2 * D], qkv[:, 2 * D:],
                     bias_ref[...], nhead, scale)
    attn = jnp.dot(attn, wo_ref[...],
                   preferred_element_type=jnp.float32) + bo_ref[...]
    x1 = _ln(x + attn, g1_ref[...], b1_ref[...])
    ff = jnp.maximum(
        jnp.dot(x1, w1_ref[...], preferred_element_type=jnp.float32) + c1_ref[...],
        0.0)
    ff = jnp.dot(ff, w2_ref[...], preferred_element_type=jnp.float32) + c2_ref[...]
    o_ref[...] = _ln(x1 + ff, g2_ref[...], b2_ref[...]).astype(o_ref.dtype)


def encoder_layer(x, p, src_bias, nhead):
    N, S, D = x.shape
    F = p["lin1_w"].shape[1]
    scale = 1.0 / math.sqrt(D // nhead)
    full = lambda shape: pl.BlockSpec(shape, lambda n: (0, 0))
    in_specs = [
        pl.BlockSpec((None, S, D), lambda n: (n, 0, 0)),   # x
        pl.BlockSpec((None, 1, S), lambda n: (n, 0, 0)),   # key-padding bias
        full((D, 3 * D)), full((1, 3 * D)),
        full((D, D)), full((1, D)),
        full((1, D)), full((1, D)),
        full((D, F)), full((1, F)),
        full((F, D)), full((1, D)),
        full((1, D)), full((1, D)),
    ]
    args = (x, src_bias,
            p["self_attn"]["wqkv"], p["self_attn"]["bqkv"].reshape(1, -1),
            p["self_attn"]["wo"], p["self_attn"]["bo"].reshape(1, -1),
            p["norm1_g"].reshape(1, -1), p["norm1_b"].reshape(1, -1),
            p["lin1_w"], p["lin1_b"].reshape(1, -1),
            p["lin2_w"], p["lin2_b"].reshape(1, -1),
            p["norm2_g"].reshape(1, -1), p["norm2_b"].reshape(1, -1))
    flops = 2 * N * S * D * (3 * D + D + 2 * F) + 4 * N * S * S * D
    bytes_acc = 4 * (2 * N * S * D + N * S + 4 * D * D + 2 * D * F
                     + 8 * D + F)
    return pl.pallas_call(
        functools.partial(_enc_layer_kernel, nhead=nhead, scale=scale),
        out_shape=jax.ShapeDtypeStruct((N, S, D), x.dtype),
        grid=(N,),
        in_specs=in_specs,
        out_specs=pl.BlockSpec((None, S, D), lambda n: (n, 0, 0)),
        compiler_params=pltpu.CompilerParams(
            dimension_semantics=("parallel",), vmem_limit_bytes=VMEM_LIMIT),
        cost_estimate=pl.CostEstimate(flops=flops,
                                      transcendentals=N * nhead * S * S,
                                      bytes_accessed=bytes_acc),
    )(*args)


# --------------------------------------------------------------------------
# Fused transformer decoder layer
# --------------------------------------------------------------------------
def _dec_layer_kernel(x_ref, mem_ref, tbias_ref, mbias_ref,
                      sa_wqkv_ref, sa_bqkv_ref, sa_wo_ref, sa_bo_ref,
                      g1_ref, b1_ref,
                      ca_wq_ref, ca_bq_ref, ca_wkv_ref, ca_bkv_ref,
                      ca_wo_ref, ca_bo_ref, g2_ref, b2_ref,
                      w1_ref, c1_ref, w2_ref, c2_ref, g3_ref, b3_ref,
                      o_ref, *, nhead, scale):
    x = x_ref[...]
    mem = mem_ref[...]
    D = x.shape[-1]
    # --- masked causal self-attention ---
    qkv = jnp.dot(x, sa_wqkv_ref[...],
                  preferred_element_type=jnp.float32) + sa_bqkv_ref[...]
    sa = _mha_core(qkv[:, :D], qkv[:, D:2 * D], qkv[:, 2 * D:],
                   tbias_ref[...], nhead, scale)
    sa = jnp.dot(sa, sa_wo_ref[...],
                 preferred_element_type=jnp.float32) + sa_bo_ref[...]
    x1 = _ln(x + sa, g1_ref[...], b1_ref[...])
    # --- cross-attention over encoder memory ---
    q = jnp.dot(x1, ca_wq_ref[...],
                preferred_element_type=jnp.float32) + ca_bq_ref[...]
    kv = jnp.dot(mem, ca_wkv_ref[...],
                 preferred_element_type=jnp.float32) + ca_bkv_ref[...]
    ca = _mha_core(q, kv[:, :D], kv[:, D:], mbias_ref[...], nhead, scale)
    ca = jnp.dot(ca, ca_wo_ref[...],
                 preferred_element_type=jnp.float32) + ca_bo_ref[...]
    x2 = _ln(x1 + ca, g2_ref[...], b2_ref[...])
    # --- feed-forward ---
    ff = jnp.maximum(
        jnp.dot(x2, w1_ref[...], preferred_element_type=jnp.float32) + c1_ref[...],
        0.0)
    ff = jnp.dot(ff, w2_ref[...], preferred_element_type=jnp.float32) + c2_ref[...]
    o_ref[...] = _ln(x2 + ff, g3_ref[...], b3_ref[...]).astype(o_ref.dtype)


def decoder_layer(y, memory, p, tgt_bias, mem_bias, nhead):
    N, T, D = y.shape
    S = memory.shape[1]
    F = p["lin1_w"].shape[1]
    scale = 1.0 / math.sqrt(D // nhead)
    sa, ca = p["self_attn"], p["cross_attn"]
    full = lambda shape: pl.BlockSpec(shape, lambda n: (0, 0))
    in_specs = [
        pl.BlockSpec((None, T, D), lambda n: (n, 0, 0)),   # y
        pl.BlockSpec((None, S, D), lambda n: (n, 0, 0)),   # memory
        pl.BlockSpec((None, T, T), lambda n: (n, 0, 0)),   # causal|pad bias
        pl.BlockSpec((None, 1, S), lambda n: (n, 0, 0)),   # memory pad bias
        full((D, 3 * D)), full((1, 3 * D)), full((D, D)), full((1, D)),
        full((1, D)), full((1, D)),
        full((D, D)), full((1, D)), full((D, 2 * D)), full((1, 2 * D)),
        full((D, D)), full((1, D)), full((1, D)), full((1, D)),
        full((D, F)), full((1, F)), full((F, D)), full((1, D)),
        full((1, D)), full((1, D)),
    ]
    args = (y, memory, tgt_bias, mem_bias,
            sa["wqkv"], sa["bqkv"].reshape(1, -1),
            sa["wo"], sa["bo"].reshape(1, -1),
            p["norm1_g"].reshape(1, -1), p["norm1_b"].reshape(1, -1),
            ca["wq"], ca["bq"].reshape(1, -1),
            ca["wkv"], ca["bkv"].reshape(1, -1),
            ca["wo"], ca["bo"].reshape(1, -1),
            p["norm2_g"].reshape(1, -1), p["norm2_b"].reshape(1, -1),
            p["lin1_w"], p["lin1_b"].reshape(1, -1),
            p["lin2_w"], p["lin2_b"].reshape(1, -1),
            p["norm3_g"].reshape(1, -1), p["norm3_b"].reshape(1, -1))
    flops = 2 * N * (T * D * 3 * D + 2 * T * T * D + T * D * D
                     + T * D * D + 2 * S * D * D + 2 * T * S * D + T * D * D
                     + 2 * T * D * F)
    bytes_acc = 4 * (2 * N * T * D + N * S * D + N * T * T + N * S
                     + 8 * D * D + 2 * D * F + 14 * D + F)
    return pl.pallas_call(
        functools.partial(_dec_layer_kernel, nhead=nhead, scale=scale),
        out_shape=jax.ShapeDtypeStruct((N, T, D), y.dtype),
        grid=(N,),
        in_specs=in_specs,
        out_specs=pl.BlockSpec((None, T, D), lambda n: (n, 0, 0)),
        compiler_params=pltpu.CompilerParams(
            dimension_semantics=("parallel",), vmem_limit_bytes=VMEM_LIMIT),
        cost_estimate=pl.CostEstimate(
            flops=flops,
            transcendentals=N * nhead * (T * T + T * S),
            bytes_accessed=bytes_acc),
    )(*args)


# --------------------------------------------------------------------------
# Full forward
# --------------------------------------------------------------------------
def clusters_finder_forward(params, src, tgt, src_padding_mask,
                            tgt_padding_mask, memory_padding_mask,
                            *, nhead, head_sizes):
    N, S, _ = src.shape
    T = tgt.shape[1]
    D = params["enc_norm_g"].shape[0]
    zero = jnp.float32(0.0)

    # additive biases (True in mask == padded/blocked -> -1e9, applied once)
    src_bias = jnp.where(src_padding_mask[:, None, :], NEG, zero)        # (N,1,S)
    causal = jnp.triu(jnp.ones((T, T), dtype=bool), k=1)
    tgt_blocked = causal[None, :, :] | tgt_padding_mask[:, None, :]      # (N,T,T)
    tgt_bias = jnp.where(tgt_blocked, NEG, zero)
    mem_bias = jnp.where(memory_padding_mask[:, None, :], NEG, zero)     # (N,1,S)

    # ---- embedders (single fused MLP kernel each) ----
    src_e = fused_mlp(src.reshape(N * S, -1),
                      params["input_embedder"]).reshape(N, S, D)
    tgt_e = fused_mlp(tgt.reshape(N * T, -1),
                      params["tgt_embedder"]).reshape(N, T, D)

    # ---- encoder stack ----
    x = src_e
    for lp in params["encoder_layers"]:
        x = encoder_layer(x, lp, src_bias, nhead)
    memory = layernorm(x.reshape(N * S, D), params["enc_norm_g"],
                       params["enc_norm_b"]).reshape(N, S, D)

    # ---- decoder stack ----
    y = tgt_e
    for lp in params["decoder_layers"]:
        y = decoder_layer(y, memory, lp, tgt_bias, mem_bias, nhead)

    # ---- final decoder norm fused with the 3 (concatenated) output heads ----
    heads = norm_heads(y.reshape(N * T, D), params["dec_norm_g"],
                       params["dec_norm_b"], params["heads_w"],
                       params["heads_b"]).reshape(N, T, -1)
    nc, npdg, ncont = head_sizes
    out_charge = heads[..., :nc]
    out_pdg = heads[..., nc:nc + npdg]
    out_cont = heads[..., nc + npdg:nc + npdg + ncont]
    return out_charge, out_pdg, out_cont


# --------------------------------------------------------------------------
# Deterministic parameter initialization (torch.nn.Linear-style uniform)
# --------------------------------------------------------------------------
class KeyGen:
    def __init__(self, key):
        self._key = key

    def next(self):
        self._key, sub = jax.random.split(self._key)
        return sub


def init_linear(kg, d_in, d_out):
    bound = 1.0 / math.sqrt(d_in)
    w = jax.random.uniform(kg.next(), (d_out, d_in), jnp.float32, -bound, bound)
    b = jax.random.uniform(kg.next(), (d_out,), jnp.float32, -bound, bound)
    return w.T, b  # stored transposed (d_in, d_out) for the kernels


def init_self_mha(kg, d):
    wqkv, bqkv = init_linear(kg, d, 3 * d)     # fused q,k,v in-projection
    wo, bo = init_linear(kg, d, d)
    return dict(wqkv=wqkv, bqkv=bqkv, wo=wo, bo=bo)


def init_cross_mha(kg, d):
    wq, bq = init_linear(kg, d, d)
    wkv, bkv = init_linear(kg, d, 2 * d)       # fused k,v in-projection
    wo, bo = init_linear(kg, d, d)
    return dict(wq=wq, bq=bq, wkv=wkv, bkv=bkv, wo=wo, bo=bo)


def init_embedder(kg, nlayers, d_in, d_model):
    layers = [init_linear(kg, d_in, d_model)]
    for _ in range(nlayers):
        layers.append(init_linear(kg, d_model, d_model))
    return layers


def init_enc_layer(kg, d, dff):
    l1w, l1b = init_linear(kg, d, dff)
    l2w, l2b = init_linear(kg, dff, d)
    return dict(self_attn=init_self_mha(kg, d),
                lin1_w=l1w, lin1_b=l1b, lin2_w=l2w, lin2_b=l2b,
                norm1_g=jnp.ones((d,), jnp.float32), norm1_b=jnp.zeros((d,), jnp.float32),
                norm2_g=jnp.ones((d,), jnp.float32), norm2_b=jnp.zeros((d,), jnp.float32))


def init_dec_layer(kg, d, dff):
    l1w, l1b = init_linear(kg, d, dff)
    l2w, l2b = init_linear(kg, dff, d)
    return dict(self_attn=init_self_mha(kg, d), cross_attn=init_cross_mha(kg, d),
                lin1_w=l1w, lin1_b=l1b, lin2_w=l2w, lin2_b=l2b,
                norm1_g=jnp.ones((d,), jnp.float32), norm1_b=jnp.zeros((d,), jnp.float32),
                norm2_g=jnp.ones((d,), jnp.float32), norm2_b=jnp.zeros((d,), jnp.float32),
                norm3_g=jnp.ones((d,), jnp.float32), norm3_b=jnp.zeros((d,), jnp.float32))


def init_clusters_finder(key, *, dmodel, nhid_ff, nlayers_encoder, nlayers_decoder,
                         nlayers_embder, d_input_encoder, d_input_decoder,
                         nparticles_max, ncharges_max, dof_continous):
    kg = KeyGen(key)
    hc_w, hc_b = init_linear(kg, dmodel, ncharges_max)
    hp_w, hp_b = init_linear(kg, dmodel, nparticles_max)
    hx_w, hx_b = init_linear(kg, dmodel, dof_continous)
    heads_w = jnp.concatenate([hc_w, hp_w, hx_w], axis=1)   # (D, 16) fused heads
    heads_b = jnp.concatenate([hc_b, hp_b, hx_b], axis=0)
    return dict(
        input_embedder=init_embedder(kg, nlayers_embder, d_input_encoder, dmodel),
        tgt_embedder=init_embedder(kg, nlayers_embder, d_input_decoder, dmodel),
        encoder_layers=[init_enc_layer(kg, dmodel, nhid_ff) for _ in range(nlayers_encoder)],
        decoder_layers=[init_dec_layer(kg, dmodel, nhid_ff) for _ in range(nlayers_decoder)],
        enc_norm_g=jnp.ones((dmodel,), jnp.float32), enc_norm_b=jnp.zeros((dmodel,), jnp.float32),
        dec_norm_g=jnp.ones((dmodel,), jnp.float32), dec_norm_b=jnp.zeros((dmodel,), jnp.float32),
        heads_w=heads_w, heads_b=heads_b,
    )


# --------------------------------------------------------------------------
if __name__ == "__main__":
    dmodel = 32
    nhead = 4
    nhid_ff_trsf = 64
    nlayers_encoder = 2
    nlayers_decoder = 2
    nlayers_embder = 1
    d_input_encoder = 6
    d_input_decoder = 8
    nparticles_max = 10
    ncharges_max = 3
    dof_continous = 3

    N, S, T = 2, 8, 8

    key = jax.random.PRNGKey(0)
    kp, ks, kt = jax.random.split(key, 3)

    params = init_clusters_finder(
        kp, dmodel=dmodel, nhid_ff=nhid_ff_trsf,
        nlayers_encoder=nlayers_encoder, nlayers_decoder=nlayers_decoder,
        nlayers_embder=nlayers_embder, d_input_encoder=d_input_encoder,
        d_input_decoder=d_input_decoder, nparticles_max=nparticles_max,
        ncharges_max=ncharges_max, dof_continous=dof_continous)

    src = jax.random.normal(ks, (N, S, d_input_encoder), jnp.float32)
    tgt = jax.random.normal(kt, (N, T, d_input_decoder), jnp.float32)

    # padding masks: True = padded (masked). Keep at least one valid token/row.
    src_padding_mask = jnp.zeros((N, S), dtype=bool).at[1, -2:].set(True)
    tgt_padding_mask = jnp.zeros((N, T), dtype=bool).at[1, -1:].set(True)
    memory_padding_mask = src_padding_mask

    fwd = jax.jit(functools.partial(
        clusters_finder_forward, nhead=nhead,
        head_sizes=(ncharges_max, nparticles_max, dof_continous)))
    out_charge, out_pdg, out_cont = fwd(params, src, tgt, src_padding_mask,
                                        tgt_padding_mask, memory_padding_mask)
    jax.block_until_ready((out_charge, out_pdg, out_cont))

    assert out_charge.shape == (N, T, ncharges_max)
    assert out_pdg.shape == (N, T, nparticles_max)
    assert out_cont.shape == (N, T, dof_continous)
    assert all(bool(jnp.all(jnp.isfinite(o))) for o in (out_charge, out_pdg, out_cont))
    print("KERNEL_OK")
</pallas_src>

<mosaic_0001>
module attributes {stable_mosaic.version = 11 : i64} {
  func.func @_mlp_kernel(%arg0: i32, %arg1: memref<16x6xf32, #tpu.memory_space<vmem>>, %arg2: memref<6x32xf32, #tpu.memory_space<vmem>>, %arg3: memref<1x32xf32, #tpu.memory_space<vmem>>, %arg4: memref<32x32xf32, #tpu.memory_space<vmem>>, %arg5: memref<1x32xf32, #tpu.memory_space<vmem>>, %arg6: memref<16x32xf32, #tpu.memory_space<vmem>>) attributes {dimension_semantics = [#tpu.dimension_semantics<parallel>], iteration_bounds = array<i64: 1>, scalar_prefetch = 0 : i64, scratch_operands = 0 : i64, tpu.core_type = #tpu.core_type<tc>, window_params = [{transform_indices = @transform_0, window_bounds = array<i64: 16, 6>}, {pipeline_mode = #tpu.pipeline_mode<synchronous>, transform_indices = @transform_1, window_bounds = array<i64: 6, 32>}, {pipeline_mode = #tpu.pipeline_mode<synchronous>, transform_indices = @transform_2, window_bounds = array<i64: 1, 32>}, {pipeline_mode = #tpu.pipeline_mode<synchronous>, transform_indices = @transform_3, window_bounds = array<i64: 32, 32>}, {pipeline_mode = #tpu.pipeline_mode<synchronous>, transform_indices = @transform_4, window_bounds = array<i64: 1, 32>}, {transform_indices = @transform_5, window_bounds = array<i64: 16, 32>}]} {
    %c0 = arith.constant 0 : index
    %c0_0 = arith.constant 0 : index
    %0 = vector.load %arg1[%c0, %c0_0] : memref<16x6xf32, #tpu.memory_space<vmem>>, vector<16x6xf32>
    %c0_1 = arith.constant 0 : index
    %c0_2 = arith.constant 0 : index
    %1 = vector.load %arg2[%c0_1, %c0_2] : memref<6x32xf32, #tpu.memory_space<vmem>>, vector<6x32xf32>
    %c0_3 = arith.constant 0 : index
    %c0_4 = arith.constant 0 : index
    %2 = vector.load %arg3[%c0_3, %c0_4] : memref<1x32xf32, #tpu.memory_space<vmem>>, vector<1x32xf32>
    %cst = arith.constant dense<0.000000e+00> : vector<16x32xf32>
    %3 = tpu.matmul %0, %1, %cst {dimension_numbers = #tpu.dot_dimension_numbers<[1], [0], [0], [1], [0, 0, 1, 1], [], []>} : vector<16x6xf32>, vector<6x32xf32>, vector<16x32xf32> -> vector<16x32xf32>
    %4 = vector.broadcast %2 : vector<1x32xf32> to vector<16x32xf32>
    %5 = arith.addf %3, %4 : vector<16x32xf32>
    %cst_5 = arith.constant 0.000000e+00 : f32
    %6 = vector.broadcast %cst_5 : f32 to vector<16x32xf32>
    %7 = arith.maximumf %5, %6 : vector<16x32xf32>
    %c0_6 = arith.constant 0 : index
    %c0_7 = arith.constant 0 : index
    %8 = vector.load %arg4[%c0_6, %c0_7] : memref<32x32xf32, #tpu.memory_space<vmem>>, vector<32x32xf32>
    %c0_8 = arith.constant 0 : index
    %c0_9 = arith.constant 0 : index
    %9 = vector.load %arg5[%c0_8, %c0_9] : memref<1x32xf32, #tpu.memory_space<vmem>>, vector<1x32xf32>
    %cst_10 = arith.constant dense<0.000000e+00> : vector<16x32xf32>
    %10 = tpu.matmul %7, %8, %cst_10 {dimension_numbers = #tpu.dot_dimension_numbers<[1], [0], [0], [1], [0, 0, 1, 1], [], []>} : vector<16x32xf32>, vector<32x32xf32>, vector<16x32xf32> -> vector<16x32xf32>
    %11 = vector.broadcast %9 : vector<1x32xf32> to vector<16x32xf32>
    %12 = arith.addf %10, %11 : vector<16x32xf32>
    %c0_11 = arith.constant 0 : index
    %c0_12 = arith.constant 0 : index
    %13 = vector.load %arg6[%c0_11, %c0_12] : memref<16x32xf32, #tpu.memory_space<vmem>>, vector<16x32xf32>
    tpu.vector_store %arg6[%c0_11, %c0_12], %12 {strides = array<i32>} : memref<16x32xf32, #tpu.memory_space<vmem>>, vector<16x32xf32>,
    return
  }
  func.func @transform_0(%arg0: i32) -> (i32, i32) {
    %c0_i32 = arith.constant 0 : i32
    %c0_i32_0 = arith.constant 0 : i32
    return %arg0, %c0_i32 : i32, i32
  }
  func.func @transform_1(%arg0: i32) -> (i32, i32) {
    %c0_i32 = arith.constant 0 : i32
    %c0_i32_0 = arith.constant 0 : i32
    %c0_i32_1 = arith.constant 0 : i32
    return %c0_i32, %c0_i32_0 : i32, i32
  }
  func.func @transform_2(%arg0: i32) -> (i32, i32) {
    %c0_i32 = arith.constant 0 : i32
    %c0_i32_0 = arith.constant 0 : i32
    %c0_i32_1 = arith.constant 0 : i32
    return %c0_i32, %c0_i32_0 : i32, i32
  }
  func.func @transform_3(%arg0: i32) -> (i32, i32) {
    %c0_i32 = arith.constant 0 : i32
    %c0_i32_0 = arith.constant 0 : i32
    %c0_i32_1 = arith.constant 0 : i32
    return %c0_i32, %c0_i32_0 : i32, i32
  }
  func.func @transform_4(%arg0: i32) -> (i32, i32) {
    %c0_i32 = arith.constant 0 : i32
    %c0_i32_0 = arith.constant 0 : i32
    %c0_i32_1 = arith.constant 0 : i32
    return %c0_i32, %c0_i32_0 : i32, i32
  }
  func.func @transform_5(%arg0: i32) -> (i32, i32) {
    %c0_i32 = arith.constant 0 : i32
    %c0_i32_0 = arith.constant 0 : i32
    return %arg0, %c0_i32 : i32, i32
  }
}

module attributes {stable_mosaic.version = 11 : i64} {
  func.func @_enc_layer_kernel(%arg0: i32, %arg1: memref<1x8x32xf32, #tpu.memory_space<vmem>>, %arg2: memref<1x1x8xf32, #tpu.memory_space<vmem>>, %arg3: memref<32x96xf32, #tpu.memory_space<vmem>>, %arg4: memref<1x96xf32, #tpu.memory_space<vmem>>, %arg5: memref<32x32xf32, #tpu.memory_space<vmem>>, %arg6: memref<1x32xf32, #tpu.memory_space<vmem>>, %arg7: memref<1x32xf32, #tpu.memory_space<vmem>>, %arg8: memref<1x32xf32, #tpu.memory_space<vmem>>, %arg9: memref<32x64xf32, #tpu.memory_space<vmem>>, %arg10: memref<1x64xf32, #tpu.memory_space<vmem>>, %arg11: memref<64x32xf32, #tpu.memory_space<vmem>>, %arg12: memref<1x32xf32, #tpu.memory_space<vmem>>, %arg13: memref<1x32xf32, #tpu.memory_space<vmem>>, %arg14: memref<1x32xf32, #tpu.memory_space<vmem>>, %arg15: memref<1x8x32xf32, #tpu.memory_space<vmem>>) attributes {dimension_semantics = [#tpu.dimension_semantics<parallel>], iteration_bounds = array<i64: 2>, scalar_prefetch = 0 : i64, scratch_operands = 0 : i64, tpu.core_type = #tpu.core_type<tc>, window_params = [{transform_indices = @transform_0, window_bounds = array<i64: 1, 8, 32>}, {transform_indices = @transform_1, window_bounds = array<i64: 1, 1, 8>}, {pipeline_mode = #tpu.pipeline_mode<synchronous>, transform_indices = @transform_2, window_bounds = array<i64: 32, 96>}, {pipeline_mode = #tpu.pipeline_mode<synchronous>, transform_indices = @transform_3, window_bounds = array<i64: 1, 96>}, {pipeline_mode = #tpu.pipeline_mode<synchronous>, transform_indices = @transform_4, window_bounds = array<i64: 32, 32>}, {pipeline_mode = #tpu.pipeline_mode<synchronous>, transform_indices = @transform_5, window_bounds = array<i64: 1, 32>}, {pipeline_mode = #tpu.pipeline_mode<synchronous>, transform_indices = @transform_6, window_bounds = array<i64: 1, 32>}, {pipeline_mode = #tpu.pipeline_mode<synchronous>, transform_indices = @transform_7, window_bounds = array<i64: 1, 32>}, {pipeline_mode = #tpu.pipeline_mode<synchronous>, transform_indices = @transform_8, window_bounds = array<i64: 32, 64>}, {pipeline_mode = #tpu.pipeline_mode<synchronous>, transform_indices = @transform_9, window_bounds = array<i64: 1, 64>}, {pipeline_mode = #tpu.pipeline_mode<synchronous>, transform_indices = @transform_10, window_bounds = array<i64: 64, 32>}, {pipeline_mode = #tpu.pipeline_mode<synchronous>, transform_indices = @transform_11, window_bounds = array<i64: 1, 32>}, {pipeline_mode = #tpu.pipeline_mode<synchronous>, transform_indices = @transform_12, window_bounds = array<i64: 1, 32>}, {pipeline_mode = #tpu.pipeline_mode<synchronous>, transform_indices = @transform_13, window_bounds = array<i64: 1, 32>}, {transform_indices = @transform_14, window_bounds = array<i64: 1, 8, 32>}]} {
    %c0 = arith.constant 0 : index
    %c0_0 = arith.constant 0 : index
    %c0_1 = arith.constant 0 : index
    %0 = vector.load %arg1[%c0, %c0_0, %c0_1] : memref<1x8x32xf32, #tpu.memory_space<vmem>>, vector<1x8x32xf32>
    %1 = vector.shape_cast %0 : vector<1x8x32xf32> to vector<8x32xf32>
    %c0_2 = arith.constant 0 : index
    %c0_3 = arith.constant 0 : index
    %2 = vector.load %arg3[%c0_2, %c0_3] : memref<32x96xf32, #tpu.memory_space<vmem>>, vector<32x96xf32>
    %cst = arith.constant dense<0.000000e+00> : vector<8x96xf32>
    %3 = tpu.matmul %1, %2, %cst {dimension_numbers = #tpu.dot_dimension_numbers<[1], [0], [0], [1], [0, 0, 1, 1], [], []>} : vector<8x32xf32>, vector<32x96xf32>, vector<8x96xf32> -> vector<8x96xf32>
    %c0_4 = arith.constant 0 : index
    %c0_5 = arith.constant 0 : index
    %4 = vector.load %arg4[%c0_4, %c0_5] : memref<1x96xf32, #tpu.memory_space<vmem>>, vector<1x96xf32>
    %5 = vector.broadcast %4 : vector<1x96xf32> to vector<8x96xf32>
    %6 = arith.addf %3, %5 : vector<8x96xf32>
    %7 = vector.extract_strided_slice %6 {offsets = [0, 0], sizes = [8, 32], strides = [1, 1]} : vector<8x96xf32> to vector<8x32xf32>
    %8 = vector.extract_strided_slice %6 {offsets = [0, 32], sizes = [8, 32], strides = [1, 1]} : vector<8x96xf32> to vector<8x32xf32>
    %9 = vector.extract_strided_slice %6 {offsets = [0, 64], sizes = [8, 32], strides = [1, 1]} : vector<8x96xf32> to vector<8x32xf32>
    %c0_6 = arith.constant 0 : index
    %c0_7 = arith.constant 0 : index
    %c0_8 = arith.constant 0 : index
    %10 = vector.load %arg2[%c0_6, %c0_7, %c0_8] : memref<1x1x8xf32, #tpu.memory_space<vmem>>, vector<1x1x8xf32>
    %11 = vector.shape_cast %10 : vector<1x1x8xf32> to vector<1x8xf32>
    %12 = vector.extract_strided_slice %7 {offsets = [0, 0], sizes = [8, 8], strides = [1, 1]} : vector<8x32xf32> to vector<8x8xf32>
    %13 = vector.extract_strided_slice %8 {offsets = [0, 0], sizes = [8, 8], strides = [1, 1]} : vector<8x32xf32> to vector<8x8xf32>
    %14 = vector.extract_strided_slice %9 {offsets = [0, 0], sizes = [8, 8], strides = [1, 1]} : vector<8x32xf32> to vector<8x8xf32>
    %15 = tpu.transpose %13, [1, 0] : vector<8x8xf32> -> vector<8x8xf32>
    %cst_9 = arith.constant dense<0.000000e+00> : vector<8x8xf32>
    %16 = tpu.matmul %12, %15, %cst_9 {dimension_numbers = #tpu.dot_dimension_numbers<[1], [0], [0], [1], [0, 0, 1, 1], [], []>} : vector<8x8xf32>, vector<8x8xf32>, vector<8x8xf32> -> vector<8x8xf32>
    %cst_10 = arith.constant 0.353553385 : f32
    %17 = vector.broadcast %cst_10 : f32 to vector<8x8xf32>
    %18 = arith.mulf %16, %17 : vector<8x8xf32>
    %19 = vector.broadcast %11 : vector<1x8xf32> to vector<8x8xf32>
    %20 = arith.addf %18, %19 : vector<8x8xf32>
    %cst_11 = arith.constant dense<0xFF800000> : vector<8xf32>
    %21 = vector.multi_reduction <maximumf>, %20, %cst_11 [1] : vector<8x8xf32> to vector<8xf32>
    %22 = vector.shape_cast %21 : vector<8xf32> to vector<8x1xf32>
    %23 = vector.broadcast %22 : vector<8x1xf32> to vector<8x8xf32>
    %24 = arith.subf %20, %23 : vector<8x8xf32>
    %25 = math.exp %24 : vector<8x8xf32>
    %cst_12 = arith.constant dense<0.000000e+00> : vector<8xf32>
    %26 = vector.multi_reduction <add>, %25, %cst_12 [1] : vector<8x8xf32> to vector<8xf32>
    %27 = vector.shape_cast %26 : vector<8xf32> to vector<8x1xf32>
    %cst_13 = arith.constant dense<0.000000e+00> : vector<8x8xf32>
    %28 = tpu.matmul %25, %14, %cst_13 {dimension_numbers = #tpu.dot_dimension_numbers<[1], [0], [0], [1], [0, 0, 1, 1], [], []>} : vector<8x8xf32>, vector<8x8xf32>, vector<8x8xf32> -> vector<8x8xf32>
    %29 = tpu.reciprocal %27 {approx = true} : vector<8x1xf32> -> vector<8x1xf32>
    %30 = vector.broadcast %29 : vector<8x1xf32> to vector<8x8xf32>
    %31 = arith.mulf %28, %30 : vector<8x8xf32>
    %32 = vector.extract_strided_slice %7 {offsets = [0, 8], sizes = [8, 8], strides = [1, 1]} : vector<8x32xf32> to vector<8x8xf32>
    %33 = vector.extract_strided_slice %8 {offsets = [0, 8], sizes = [8, 8], strides = [1, 1]} : vector<8x32xf32> to vector<8x8xf32>
    %34 = vector.extract_strided_slice %9 {offsets = [0, 8], sizes = [8, 8], strides = [1, 1]} : vector<8x32xf32> to vector<8x8xf32>
    %35 = tpu.transpose %33, [1, 0] : vector<8x8xf32> -> vector<8x8xf32>
    %cst_14 = arith.constant dense<0.000000e+00> : vector<8x8xf32>
    %36 = tpu.matmul %32, %35, %cst_14 {dimension_numbers = #tpu.dot_dimension_numbers<[1], [0], [0], [1], [0, 0, 1, 1], [], []>} : vector<8x8xf32>, vector<8x8xf32>, vector<8x8xf32> -> vector<8x8xf32>
    %cst_15 = arith.constant 0.353553385 : f32
    %37 = vector.broadcast %cst_15 : f32 to vector<8x8xf32>
    %38 = arith.mulf %36, %37 : vector<8x8xf32>
    %39 = vector.broadcast %11 : vector<1x8xf32> to vector<8x8xf32>
    %40 = arith.addf %38, %39 : vector<8x8xf32>
    %cst_16 = arith.constant dense<0xFF800000> : vector<8xf32>
    %41 = vector.multi_reduction <maximumf>, %40, %cst_16 [1] : vector<8x8xf32> to vector<8xf32>
    %42 = vector.shape_cast %41 : vector<8xf32> to vector<8x1xf32>
    %43 = vector.broadcast %42 : vector<8x1xf32> to vector<8x8xf32>
    %44 = arith.subf %40, %43 : vector<8x8xf32>
    %45 = math.exp %44 : vector<8x8xf32>
    %cst_17 = arith.constant dense<0.000000e+00> : vector<8xf32>
    %46 = vector.multi_reduction <add>, %45, %cst_17 [1] : vector<8x8xf32> to vector<8xf32>
    %47 = vector.shape_cast %46 : vector<8xf32> to vector<8x1xf32>
    %cst_18 = arith.constant dense<0.000000e+00> : vector<8x8xf32>
    %48 = tpu.matmul %45, %34, %cst_18 {dimension_numbers = #tpu.dot_dimension_numbers<[1], [0], [0], [1], [0, 0, 1, 1], [], []>} : vector<8x8xf32>, vector<8x8xf32>, vector<8x8xf32> -> vector<8x8xf32>
    %49 = tpu.reciprocal %47 {approx = true} : vector<8x1xf32> -> vector<8x1xf32>
    %50 = vector.broadcast %49 : vector<8x1xf32> to vector<8x8xf32>
    %51 = arith.mulf %48, %50 : vector<8x8xf32>
    %52 = vector.extract_strided_slice %7 {offsets = [0, 16], sizes = [8, 8], strides = [1, 1]} : vector<8x32xf32> to vector<8x8xf32>
    %53 = vector.extract_strided_slice %8 {offsets = [0, 16], sizes = [8, 8], strides = [1, 1]} : vector<8x32xf32> to vector<8x8xf32>
    %54 = vector.extract_strided_slice %9 {offsets = [0, 16], sizes = [8, 8], strides = [1, 1]} : vector<8x32xf32> to vector<8x8xf32>
    %55 = tpu.transpose %53, [1, 0] : vector<8x8xf32> -> vector<8x8xf32>
    %cst_19 = arith.constant dense<0.000000e+00> : vector<8x8xf32>
    %56 = tpu.matmul %52, %55, %cst_19 {dimension_numbers = #tpu.dot_dimension_numbers<[1], [0], [0], [1], [0, 0, 1, 1], [], []>} : vector<8x8xf32>, vector<8x8xf32>, vector<8x8xf32> -> vector<8x8xf32>
    %cst_20 = arith.constant 0.353553385 : f32
    %57 = vector.broadcast %cst_20 : f32 to vector<8x8xf32>
    %58 = arith.mulf %56, %57 : vector<8x8xf32>
    %59 = vector.broadcast %11 : vector<1x8xf32> to vector<8x8xf32>
    %60 = arith.addf %58, %59 : vector<8x8xf32>
    %cst_21 = arith.constant dense<0xFF800000> : vector<8xf32>
    %61 = vector.multi_reduction <maximumf>, %60, %cst_21 [1] : vector<8x8xf32> to vector<8xf32>
    %62 = vector.shape_cast %61 : vector<8xf32> to vector<8x1xf32>
    %63 = vector.broadcast %62 : vector<8x1xf32> to vector<8x8xf32>
    %64 = arith.subf %60, %63 : vector<8x8xf32>
    %65 = math.exp %64 : vector<8x8xf32>
    %cst_22 = arith.constant dense<0.000000e+00> : vector<8xf32>
    %66 = vector.multi_reduction <add>, %65, %cst_22 [1] : vector<8x8xf32> to vector<8xf32>
    %67 = vector.shape_cast %66 : vector<8xf32> to vector<8x1xf32>
    %cst_23 = arith.constant dense<0.000000e+00> : vector<8x8xf32>
    %68 = tpu.matmul %65, %54, %cst_23 {dimension_numbers = #tpu.dot_dimension_numbers<[1], [0], [0], [1], [0, 0, 1, 1], [], []>} : vector<8x8xf32>, vector<8x8xf32>, vector<8x8xf32> -> vector<8x8xf32>
    %69 = tpu.reciprocal %67 {approx = true} : vector<8x1xf32> -> vector<8x1xf32>
    %70 = vector.broadcast %69 : vector<8x1xf32> to vector<8x8xf32>
    %71 = arith.mulf %68, %70 : vector<8x8xf32>
    %72 = vector.extract_strided_slice %7 {offsets = [0, 24], sizes = [8, 8], strides = [1, 1]} : vector<8x32xf32> to vector<8x8xf32>
    %73 = vector.extract_strided_slice %8 {offsets = [0, 24], sizes = [8, 8], strides = [1, 1]} : vector<8x32xf32> to vector<8x8xf32>
    %74 = vector.extract_strided_slice %9 {offsets = [0, 24], sizes = [8, 8], strides = [1, 1]} : vector<8x32xf32> to vector<8x8xf32>
    %75 = tpu.transpose %73, [1, 0] : vector<8x8xf32> -> vector<8x8xf32>
    %cst_24 = arith.constant dense<0.000000e+00> : vector<8x8xf32>
    %76 = tpu.matmul %72, %75, %cst_24 {dimension_numbers = #tpu.dot_dimension_numbers<[1], [0], [0], [1], [0, 0, 1, 1], [], []>} : vector<8x8xf32>, vector<8x8xf32>, vector<8x8xf32> -> vector<8x8xf32>
    %cst_25 = arith.constant 0.353553385 : f32
    %77 = vector.broadcast %cst_25 : f32 to vector<8x8xf32>
    %78 = arith.mulf %76, %77 : vector<8x8xf32>
    %79 = vector.broadcast %11 : vector<1x8xf32> to vector<8x8xf32>
    %80 = arith.addf %78, %79 : vector<8x8xf32>
    %cst_26 = arith.constant dense<0xFF800000> : vector<8xf32>
    %81 = vector.multi_reduction <maximumf>, %80, %cst_26 [1] : vector<8x8xf32> to vector<8xf32>
    %82 = vector.shape_cast %81 : vector<8xf32> to vector<8x1xf32>
    %83 = vector.broadcast %82 : vector<8x1xf32> to vector<8x8xf32>
    %84 = arith.subf %80, %83 : vector<8x8xf32>
    %85 = math.exp %84 : vector<8x8xf32>
    %cst_27 = arith.constant dense<0.000000e+00> : vector<8xf32>
    %86 = vector.multi_reduction <add>, %85, %cst_27 [1] : vector<8x8xf32> to vector<8xf32>
    %87 = vector.shape_cast %86 : vector<8xf32> to vector<8x1xf32>
    %cst_28 = arith.constant dense<0.000000e+00> : vector<8x8xf32>
    %88 = tpu.matmul %85, %74, %cst_28 {dimension_numbers = #tpu.dot_dimension_numbers<[1], [0], [0], [1], [0, 0, 1, 1], [], []>} : vector<8x8xf32>, vector<8x8xf32>, vector<8x8xf32> -> vector<8x8xf32>
    %89 = tpu.reciprocal %87 {approx = true} : vector<8x1xf32> -> vector<8x1xf32>
    %90 = vector.broadcast %89 : vector<8x1xf32> to vector<8x8xf32>
    %91 = arith.mulf %88, %90 : vector<8x8xf32>
    %92 = tpu.concatenate %31, %51, %71, %91 in 1 : vector<8x8xf32>, vector<8x8xf32>, vector<8x8xf32>, vector<8x8xf32> -> vector<8x32xf32>
    %c0_29 = arith.constant 0 : index
    %c0_30 = arith.constant 0 : index
    %93 = vector.load %arg5[%c0_29, %c0_30] : memref<32x32xf32, #tpu.memory_space<vmem>>, vector<32x32xf32>
    %cst_31 = arith.constant dense<0.000000e+00> : vector<8x32xf32>
    %94 = tpu.matmul %92, %93, %cst_31 {dimension_numbers = #tpu.dot_dimension_numbers<[1], [0], [0], [1], [0, 0, 1, 1], [], []>} : vector<8x32xf32>, vector<32x32xf32>, vector<8x32xf32> -> vector<8x32xf32>
    %c0_32 = arith.constant 0 : index
    %c0_33 = arith.constant 0 : index
    %95 = vector.load %arg6[%c0_32, %c0_33] : memref<1x32xf32, #tpu.memory_space<vmem>>, vector<1x32xf32>
    %96 = vector.broadcast %95 : vector<1x32xf32> to vector<8x32xf32>
    %97 = arith.addf %94, %96 : vector<8x32xf32>
    %98 = arith.addf %1, %97 : vector<8x32xf32>
    %c0_34 = arith.constant 0 : index
    %c0_35 = arith.constant 0 : index
    %99 = vector.load %arg7[%c0_34, %c0_35] : memref<1x32xf32, #tpu.memory_space<vmem>>, vector<1x32xf32>
    %c0_36 = arith.constant 0 : index
    %c0_37 = arith.constant 0 : index
    %100 = vector.load %arg8[%c0_36, %c0_37] : memref<1x32xf32, #tpu.memory_space<vmem>>, vector<1x32xf32>
    %cst_38 = arith.constant dense<0.000000e+00> : vector<8xf32>
    %101 = vector.multi_reduction <add>, %98, %cst_38 [1] : vector<8x32xf32> to vector<8xf32>
    %102 = vector.shape_cast %101 : vector<8xf32> to vector<8x1xf32>
    %cst_39 = arith.constant 3.200000e+01 : f32
    %103 = vector.broadcast %cst_39 : f32 to vector<8x1xf32>
    %104 = arith.divf %102, %103 : vector<8x1xf32>
    %105 = vector.broadcast %104 : vector<8x1xf32> to vector<8x32xf32>
    %106 = arith.subf %98, %105 : vector<8x32xf32>
    %107 = arith.mulf %106, %106 : vector<8x32xf32>
    %cst_40 = arith.constant dense<0.000000e+00> : vector<8xf32>
    %108 = vector.multi_reduction <add>, %107, %cst_40 [1] : vector<8x32xf32> to vector<8xf32>
    %109 = vector.shape_cast %108 : vector<8xf32> to vector<8x1xf32>
    %cst_41 = arith.constant 3.200000e+01 : f32
    %110 = vector.broadcast %cst_41 : f32 to vector<8x1xf32>
    %111 = arith.divf %109, %110 : vector<8x1xf32>
    %cst_42 = arith.constant 9.99999974E-6 : f32
    %112 = vector.broadcast %cst_42 : f32 to vector<8x1xf32>
    %113 = arith.addf %111, %112 : vector<8x1xf32>
    %114 = math.rsqrt %113 : vector<8x1xf32>
    %115 = vector.broadcast %114 : vector<8x1xf32> to vector<8x32xf32>
    %116 = arith.mulf %106, %115 : vector<8x32xf32>
    %117 = vector.broadcast %99 : vector<1x32xf32> to vector<8x32xf32>
    %118 = arith.mulf %116, %117 : vector<8x32xf32>
    %119 = vector.broadcast %100 : vector<1x32xf32> to vector<8x32xf32>
    %120 = arith.addf %118, %119 : vector<8x32xf32>
    %c0_43 = arith.constant 0 : index
    %c0_44 = arith.constant 0 : index
    %121 = vector.load %arg9[%c0_43, %c0_44] : memref<32x64xf32, #tpu.memory_space<vmem>>, vector<32x64xf32>
    %cst_45 = arith.constant dense<0.000000e+00> : vector<8x64xf32>
    %122 = tpu.matmul %120, %121, %cst_45 {dimension_numbers = #tpu.dot_dimension_numbers<[1], [0], [0], [1], [0, 0, 1, 1], [], []>} : vector<8x32xf32>, vector<32x64xf32>, vector<8x64xf32> -> vector<8x64xf32>
    %c0_46 = arith.constant 0 : index
    %c0_47 = arith.constant 0 : index
    %123 = vector.load %arg10[%c0_46, %c0_47] : memref<1x64xf32, #tpu.memory_space<vmem>>, vector<1x64xf32>
    %124 = vector.broadcast %123 : vector<1x64xf32> to vector<8x64xf32>
    %125 = arith.addf %122, %124 : vector<8x64xf32>
    %cst_48 = arith.constant 0.000000e+00 : f32
    %126 = vector.broadcast %cst_48 : f32 to vector<8x64xf32>
    %127 = arith.maximumf %125, %126 : vector<8x64xf32>
    %c0_49 = arith.constant 0 : index
    %c0_50 = arith.constant 0 : index
    %128 = vector.load %arg11[%c0_49, %c0_50] : memref<64x32xf32, #tpu.memory_space<vmem>>, vector<64x32xf32>
    %cst_51 = arith.constant dense<0.000000e+00> : vector<8x32xf32>
    %129 = tpu.matmul %127, %128, %cst_51 {dimension_numbers = #tpu.dot_dimension_numbers<[1], [0], [0], [1], [0, 0, 1, 1], [], []>} : vector<8x64xf32>, vector<64x32xf32>, vector<8x32xf32> -> vector<8x32xf32>
    %c0_52 = arith.constant 0 : index
    %c0_53 = arith.constant 0 : index
    %130 = vector.load %arg12[%c0_52, %c0_53] : memref<1x32xf32, #tpu.memory_space<vmem>>, vector<1x32xf32>
    %131 = vector.broadcast %130 : vector<1x32xf32> to vector<8x32xf32>
    %132 = arith.addf %129, %131 : vector<8x32xf32>
    %133 = arith.addf %120, %132 : vector<8x32xf32>
    %c0_54 = arith.constant 0 : index
    %c0_55 = arith.constant 0 : index
    %134 = vector.load %arg13[%c0_54, %c0_55] : memref<1x32xf32, #tpu.memory_space<vmem>>, vector<1x32xf32>
    %c0_56 = arith.constant 0 : index
    %c0_57 = arith.constant 0 : index
    %135 = vector.load %arg14[%c0_56, %c0_57] : memref<1x32xf32, #tpu.memory_space<vmem>>, vector<1x32xf32>
    %cst_58 = arith.constant dense<0.000000e+00> : vector<8xf32>
    %136 = vector.multi_reduction <add>, %133, %cst_58 [1] : vector<8x32xf32> to vector<8xf32>
    %137 = vector.shape_cast %136 : vector<8xf32> to vector<8x1xf32>
    %cst_59 = arith.constant 3.200000e+01 : f32
    %138 = vector.broadcast %cst_59 : f32 to vector<8x1xf32>
    %139 = arith.divf %137, %138 : vector<8x1xf32>
    %140 = vector.broadcast %139 : vector<8x1xf32> to vector<8x32xf32>
    %141 = arith.subf %133, %140 : vector<8x32xf32>
    %142 = arith.mulf %141, %141 : vector<8x32xf32>
    %cst_60 = arith.constant dense<0.000000e+00> : vector<8xf32>
    %143 = vector.multi_reduction <add>, %142, %cst_60 [1] : vector<8x32xf32> to vector<8xf32>
    %144 = vector.shape_cast %143 : vector<8xf32> to vector<8x1xf32>
    %cst_61 = arith.constant 3.200000e+01 : f32
    %145 = vector.broadcast %cst_61 : f32 to vector<8x1xf32>
    %146 = arith.divf %144, %145 : vector<8x1xf32>
    %cst_62 = arith.constant 9.99999974E-6 : f32
    %147 = vector.broadcast %cst_62 : f32 to vector<8x1xf32>
    %148 = arith.addf %146, %147 : vector<8x1xf32>
    %149 = math.rsqrt %148 : vector<8x1xf32>
    %150 = vector.broadcast %149 : vector<8x1xf32> to vector<8x32xf32>
    %151 = arith.mulf %141, %150 : vector<8x32xf32>
    %152 = vector.broadcast %134 : vector<1x32xf32> to vector<8x32xf32>
    %153 = arith.mulf %151, %152 : vector<8x32xf32>
    %154 = vector.broadcast %135 : vector<1x32xf32> to vector<8x32xf32>
    %155 = arith.addf %153, %154 : vector<8x32xf32>
    %c0_63 = arith.constant 0 : index
    %c0_64 = arith.constant 0 : index
    %c0_65 = arith.constant 0 : index
    %156 = vector.load %arg15[%c0_63, %c0_64, %c0_65] : memref<1x8x32xf32, #tpu.memory_space<vmem>>, vector<1x8x32xf32>
    %157 = vector.shape_cast %156 : vector<1x8x32xf32> to vector<8x32xf32>
    %158 = vector.shape_cast %155 : vector<8x32xf32> to vector<1x8x32xf32>
    tpu.vector_store %arg15[%c0_63, %c0_64, %c0_65], %158 {strides = array<i32>} : memref<1x8x32xf32, #tpu.memory_space<vmem>>, vector<1x8x32xf32>,
    return
  }
  func.func @transform_0(%arg0: i32) -> (i32, i32, i32) {
    %c0_i32 = arith.constant 0 : i32
    %c0_i32_0 = arith.constant 0 : i32
    %c0_i32_1 = arith.constant 0 : i32
    return %arg0, %c0_i32, %c0_i32_0 : i32, i32, i32
  }
  func.func @transform_1(%arg0: i32) -> (i32, i32, i32) {
    %c0_i32 = arith.constant 0 : i32
    %c0_i32_0 = arith.constant 0 : i32
    %c0_i32_1 = arith.constant 0 : i32
    return %arg0, %c0_i32, %c0_i32_0 : i32, i32, i32
  }
  func.func @transform_2(%arg0: i32) -> (i32, i32) {
    %c0_i32 = arith.constant 0 : i32
    %c0_i32_0 = arith.constant 0 : i32
    %c0_i32_1 = arith.constant 0 : i32
    return %c0_i32, %c0_i32_0 : i32, i32
  }
  func.func @transform_3(%arg0: i32) -> (i32, i32) {
    %c0_i32 = arith.constant 0 : i32
    %c0_i32_0 = arith.constant 0 : i32
    %c0_i32_1 = arith.constant 0 : i32
    return %c0_i32, %c0_i32_0 : i32, i32
  }
  func.func @transform_4(%arg0: i32) -> (i32, i32) {
    %c0_i32 = arith.constant 0 : i32
    %c0_i32_0 = arith.constant 0 : i32
    %c0_i32_1 = arith.constant 0 : i32
    return %c0_i32, %c0_i32_0 : i32, i32
  }
  func.func @transform_5(%arg0: i32) -> (i32, i32) {
    %c0_i32 = arith.constant 0 : i32
    %c0_i32_0 = arith.constant 0 : i32
    %c0_i32_1 = arith.constant 0 : i32
    return %c0_i32, %c0_i32_0 : i32, i32
  }
  func.func @transform_6(%arg0: i32) -> (i32, i32) {
    %c0_i32 = arith.constant 0 : i32
    %c0_i32_0 = arith.constant 0 : i32
    %c0_i32_1 = arith.constant 0 : i32
    return %c0_i32, %c0_i32_0 : i32, i32
  }
  func.func @transform_7(%arg0: i32) -> (i32, i32) {
    %c0_i32 = arith.constant 0 : i32
    %c0_i32_0 = arith.constant 0 : i32
    %c0_i32_1 = arith.constant 0 : i32
    return %c0_i32, %c0_i32_0 : i32, i32
  }
  func.func @transform_8(%arg0: i32) -> (i32, i32) {
    %c0_i32 = arith.constant 0 : i32
    %c0_i32_0 = arith.constant 0 : i32
    %c0_i32_1 = arith.constant 0 : i32
    return %c0_i32, %c0_i32_0 : i32, i32
  }
  func.func @transform_9(%arg0: i32) -> (i32, i32) {
    %c0_i32 = arith.constant 0 : i32
    %c0_i32_0 = arith.constant 0 : i32
    %c0_i32_1 = arith.constant 0 : i32
    return %c0_i32, %c0_i32_0 : i32, i32
  }
  func.func @transform_10(%arg0: i32) -> (i32, i32) {
    %c0_i32 = arith.constant 0 : i32
    %c0_i32_0 = arith.constant 0 : i32
    %c0_i32_1 = arith.constant 0 : i32
    return %c0_i32, %c0_i32_0 : i32, i32
  }
  func.func @transform_11(%arg0: i32) -> (i32, i32) {
    %c0_i32 = arith.constant 0 : i32
    %c0_i32_0 = arith.constant 0 : i32
    %c0_i32_1 = arith.constant 0 : i32
    return %c0_i32, %c0_i32_0 : i32, i32
  }
  func.func @transform_12(%arg0: i32) -> (i32, i32) {
    %c0_i32 = arith.constant 0 : i32
    %c0_i32_0 = arith.constant 0 : i32
    %c0_i32_1 = arith.constant 0 : i32
    return %c0_i32, %c0_i32_0 : i32, i32
  }
  func.func @transform_13(%arg0: i32) -> (i32, i32) {
    %c0_i32 = arith.constant 0 : i32
    %c0_i32_0 = arith.constant 0 : i32
    %c0_i32_1 = arith.constant 0 : i32
    return %c0_i32, %c0_i32_0 : i32, i32
  }
  func.func @transform_14(%arg0: i32) -> (i32, i32, i32) {
    %c0_i32 = arith.constant 0 : i32
    %c0_i32_0 = arith.constant 0 : i32
    %c0_i32_1 = arith.constant 0 : i32
    return %arg0, %c0_i32, %c0_i32_0 : i32, i32, i32
  }
}

module attributes {stable_mosaic.version = 11 : i64} {
  func.func @_ln_kernel(%arg0: i32, %arg1: memref<16x32xf32, #tpu.memory_space<vmem>>, %arg2: memref<1x32xf32, #tpu.memory_space<vmem>>, %arg3: memref<1x32xf32, #tpu.memory_space<vmem>>, %arg4: memref<16x32xf32, #tpu.memory_space<vmem>>) attributes {dimension_semantics = [#tpu.dimension_semantics<parallel>], iteration_bounds = array<i64: 1>, scalar_prefetch = 0 : i64, scratch_operands = 0 : i64, tpu.core_type = #tpu.core_type<tc>, window_params = [{transform_indices = @transform_0, window_bounds = array<i64: 16, 32>}, {pipeline_mode = #tpu.pipeline_mode<synchronous>, transform_indices = @transform_1, window_bounds = array<i64: 1, 32>}, {pipeline_mode = #tpu.pipeline_mode<synchronous>, transform_indices = @transform_2, window_bounds = array<i64: 1, 32>}, {transform_indices = @transform_3, window_bounds = array<i64: 16, 32>}]} {
    %c0 = arith.constant 0 : index
    %c0_0 = arith.constant 0 : index
    %0 = vector.load %arg1[%c0, %c0_0] : memref<16x32xf32, #tpu.memory_space<vmem>>, vector<16x32xf32>
    %c0_1 = arith.constant 0 : index
    %c0_2 = arith.constant 0 : index
    %1 = vector.load %arg2[%c0_1, %c0_2] : memref<1x32xf32, #tpu.memory_space<vmem>>, vector<1x32xf32>
    %c0_3 = arith.constant 0 : index
    %c0_4 = arith.constant 0 : index
    %2 = vector.load %arg3[%c0_3, %c0_4] : memref<1x32xf32, #tpu.memory_space<vmem>>, vector<1x32xf32>
    %cst = arith.constant dense<0.000000e+00> : vector<16xf32>
    %3 = vector.multi_reduction <add>, %0, %cst [1] : vector<16x32xf32> to vector<16xf32>
    %4 = vector.shape_cast %3 : vector<16xf32> to vector<16x1xf32>
    %cst_5 = arith.constant 3.200000e+01 : f32
    %5 = vector.broadcast %cst_5 : f32 to vector<16x1xf32>
    %6 = arith.divf %4, %5 : vector<16x1xf32>
    %7 = vector.broadcast %6 : vector<16x1xf32> to vector<16x32xf32>
    %8 = arith.subf %0, %7 : vector<16x32xf32>
    %9 = arith.mulf %8, %8 : vector<16x32xf32>
    %cst_6 = arith.constant dense<0.000000e+00> : vector<16xf32>
    %10 = vector.multi_reduction <add>, %9, %cst_6 [1] : vector<16x32xf32> to vector<16xf32>
    %11 = vector.shape_cast %10 : vector<16xf32> to vector<16x1xf32>
    %cst_7 = arith.constant 3.200000e+01 : f32
    %12 = vector.broadcast %cst_7 : f32 to vector<16x1xf32>
    %13 = arith.divf %11, %12 : vector<16x1xf32>
    %cst_8 = arith.constant 9.99999974E-6 : f32
    %14 = vector.broadcast %cst_8 : f32 to vector<16x1xf32>
    %15 = arith.addf %13, %14 : vector<16x1xf32>
    %16 = math.rsqrt %15 : vector<16x1xf32>
    %17 = vector.broadcast %16 : vector<16x1xf32> to vector<16x32xf32>
    %18 = arith.mulf %8, %17 : vector<16x32xf32>
    %19 = vector.broadcast %1 : vector<1x32xf32> to vector<16x32xf32>
    %20 = arith.mulf %18, %19 : vector<16x32xf32>
    %21 = vector.broadcast %2 : vector<1x32xf32> to vector<16x32xf32>
    %22 = arith.addf %20, %21 : vector<16x32xf32>
    %c0_9 = arith.constant 0 : index
    %c0_10 = arith.constant 0 : index
    %23 = vector.load %arg4[%c0_9, %c0_10] : memref<16x32xf32, #tpu.memory_space<vmem>>, vector<16x32xf32>
    tpu.vector_store %arg4[%c0_9, %c0_10], %22 {strides = array<i32>} : memref<16x32xf32, #tpu.memory_space<vmem>>, vector<16x32xf32>,
    return
  }
  func.func @transform_0(%arg0: i32) -> (i32, i32) {
    %c0_i32 = arith.constant 0 : i32
    %c0_i32_0 = arith.constant 0 : i32
    return %arg0, %c0_i32 : i32, i32
  }
  func.func @transform_1(%arg0: i32) -> (i32, i32) {
    %c0_i32 = arith.constant 0 : i32
    %c0_i32_0 = arith.constant 0 : i32
    %c0_i32_1 = arith.constant 0 : i32
    return %c0_i32, %c0_i32_0 : i32, i32
  }
  func.func @transform_2(%arg0: i32) -> (i32, i32) {
    %c0_i32 = arith.constant 0 : i32
    %c0_i32_0 = arith.constant 0 : i32
    %c0_i32_1 = arith.constant 0 : i32
    return %c0_i32, %c0_i32_0 : i32, i32
  }
  func.func @transform_3(%arg0: i32) -> (i32, i32) {
    %c0_i32 = arith.constant 0 : i32
    %c0_i32_0 = arith.constant 0 : i32
    return %arg0, %c0_i32 : i32, i32
  }
}

module attributes {stable_mosaic.version = 11 : i64} {
  func.func @_mlp_kernel(%arg0: i32, %arg1: memref<16x8xf32, #tpu.memory_space<vmem>>, %arg2: memref<8x32xf32, #tpu.memory_space<vmem>>, %arg3: memref<1x32xf32, #tpu.memory_space<vmem>>, %arg4: memref<32x32xf32, #tpu.memory_space<vmem>>, %arg5: memref<1x32xf32, #tpu.memory_space<vmem>>, %arg6: memref<16x32xf32, #tpu.memory_space<vmem>>) attributes {dimension_semantics = [#tpu.dimension_semantics<parallel>], iteration_bounds = array<i64: 1>, scalar_prefetch = 0 : i64, scratch_operands = 0 : i64, tpu.core_type = #tpu.core_type<tc>, window_params = [{transform_indices = @transform_0, window_bounds = array<i64: 16, 8>}, {pipeline_mode = #tpu.pipeline_mode<synchronous>, transform_indices = @transform_1, window_bounds = array<i64: 8, 32>}, {pipeline_mode = #tpu.pipeline_mode<synchronous>, transform_indices = @transform_2, window_bounds = array<i64: 1, 32>}, {pipeline_mode = #tpu.pipeline_mode<synchronous>, transform_indices = @transform_3, window_bounds = array<i64: 32, 32>}, {pipeline_mode = #tpu.pipeline_mode<synchronous>, transform_indices = @transform_4, window_bounds = array<i64: 1, 32>}, {transform_indices = @transform_5, window_bounds = array<i64: 16, 32>}]} {
    %c0 = arith.constant 0 : index
    %c0_0 = arith.constant 0 : index
    %0 = vector.load %arg1[%c0, %c0_0] : memref<16x8xf32, #tpu.memory_space<vmem>>, vector<16x8xf32>
    %c0_1 = arith.constant 0 : index
    %c0_2 = arith.constant 0 : index
    %1 = vector.load %arg2[%c0_1, %c0_2] : memref<8x32xf32, #tpu.memory_space<vmem>>, vector<8x32xf32>
    %c0_3 = arith.constant 0 : index
    %c0_4 = arith.constant 0 : index
    %2 = vector.load %arg3[%c0_3, %c0_4] : memref<1x32xf32, #tpu.memory_space<vmem>>, vector<1x32xf32>
    %cst = arith.constant dense<0.000000e+00> : vector<16x32xf32>
    %3 = tpu.matmul %0, %1, %cst {dimension_numbers = #tpu.dot_dimension_numbers<[1], [0], [0], [1], [0, 0, 1, 1], [], []>} : vector<16x8xf32>, vector<8x32xf32>, vector<16x32xf32> -> vector<16x32xf32>
    %4 = vector.broadcast %2 : vector<1x32xf32> to vector<16x32xf32>
    %5 = arith.addf %3, %4 : vector<16x32xf32>
    %cst_5 = arith.constant 0.000000e+00 : f32
    %6 = vector.broadcast %cst_5 : f32 to vector<16x32xf32>
    %7 = arith.maximumf %5, %6 : vector<16x32xf32>
    %c0_6 = arith.constant 0 : index
    %c0_7 = arith.constant 0 : index
    %8 = vector.load %arg4[%c0_6, %c0_7] : memref<32x32xf32, #tpu.memory_space<vmem>>, vector<32x32xf32>
    %c0_8 = arith.constant 0 : index
    %c0_9 = arith.constant 0 : index
    %9 = vector.load %arg5[%c0_8, %c0_9] : memref<1x32xf32, #tpu.memory_space<vmem>>, vector<1x32xf32>
    %cst_10 = arith.constant dense<0.000000e+00> : vector<16x32xf32>
    %10 = tpu.matmul %7, %8, %cst_10 {dimension_numbers = #tpu.dot_dimension_numbers<[1], [0], [0], [1], [0, 0, 1, 1], [], []>} : vector<16x32xf32>, vector<32x32xf32>, vector<16x32xf32> -> vector<16x32xf32>
    %11 = vector.broadcast %9 : vector<1x32xf32> to vector<16x32xf32>
    %12 = arith.addf %10, %11 : vector<16x32xf32>
    %c0_11 = arith.constant 0 : index
    %c0_12 = arith.constant 0 : index
    %13 = vector.load %arg6[%c0_11, %c0_12] : memref<16x32xf32, #tpu.memory_space<vmem>>, vector<16x32xf32>
    tpu.vector_store %arg6[%c0_11, %c0_12], %12 {strides = array<i32>} : memref<16x32xf32, #tpu.memory_space<vmem>>, vector<16x32xf32>,
    return
  }
  func.func @transform_0(%arg0: i32) -> (i32, i32) {
    %c0_i32 = arith.constant 0 : i32
    %c0_i32_0 = arith.constant 0 : i32
    return %arg0, %c0_i32 : i32, i32
  }
  func.func @transform_1(%arg0: i32) -> (i32, i32) {
    %c0_i32 = arith.constant 0 : i32
    %c0_i32_0 = arith.constant 0 : i32
    %c0_i32_1 = arith.constant 0 : i32
    return %c0_i32, %c0_i32_0 : i32, i32
  }
  func.func @transform_2(%arg0: i32) -> (i32, i32) {
    %c0_i32 = arith.constant 0 : i32
    %c0_i32_0 = arith.constant 0 : i32
    %c0_i32_1 = arith.constant 0 : i32
    return %c0_i32, %c0_i32_0 : i32, i32
  }
  func.func @transform_3(%arg0: i32) -> (i32, i32) {
    %c0_i32 = arith.constant 0 : i32
    %c0_i32_0 = arith.constant 0 : i32
    %c0_i32_1 = arith.constant 0 : i32
    return %c0_i32, %c0_i32_0 : i32, i32
  }
  func.func @transform_4(%arg0: i32) -> (i32, i32) {
    %c0_i32 = arith.constant 0 : i32
    %c0_i32_0 = arith.constant 0 : i32
    %c0_i32_1 = arith.constant 0 : i32
    return %c0_i32, %c0_i32_0 : i32, i32
  }
  func.func @transform_5(%arg0: i32) -> (i32, i32) {
    %c0_i32 = arith.constant 0 : i32
    %c0_i32_0 = arith.constant 0 : i32
    return %arg0, %c0_i32 : i32, i32
  }
}

module attributes {stable_mosaic.version = 11 : i64} {
  func.func @_dec_layer_kernel(%arg0: i32, %arg1: memref<1x8x32xf32, #tpu.memory_space<vmem>>, %arg2: memref<1x8x32xf32, #tpu.memory_space<vmem>>, %arg3: memref<1x8x8xf32, #tpu.memory_space<vmem>>, %arg4: memref<1x1x8xf32, #tpu.memory_space<vmem>>, %arg5: memref<32x96xf32, #tpu.memory_space<vmem>>, %arg6: memref<1x96xf32, #tpu.memory_space<vmem>>, %arg7: memref<32x32xf32, #tpu.memory_space<vmem>>, %arg8: memref<1x32xf32, #tpu.memory_space<vmem>>, %arg9: memref<1x32xf32, #tpu.memory_space<vmem>>, %arg10: memref<1x32xf32, #tpu.memory_space<vmem>>, %arg11: memref<32x32xf32, #tpu.memory_space<vmem>>, %arg12: memref<1x32xf32, #tpu.memory_space<vmem>>, %arg13: memref<32x64xf32, #tpu.memory_space<vmem>>, %arg14: memref<1x64xf32, #tpu.memory_space<vmem>>, %arg15: memref<32x32xf32, #tpu.memory_space<vmem>>, %arg16: memref<1x32xf32, #tpu.memory_space<vmem>>, %arg17: memref<1x32xf32, #tpu.memory_space<vmem>>, %arg18: memref<1x32xf32, #tpu.memory_space<vmem>>, %arg19: memref<32x64xf32, #tpu.memory_space<vmem>>, %arg20: memref<1x64xf32, #tpu.memory_space<vmem>>, %arg21: memref<64x32xf32, #tpu.memory_space<vmem>>, %arg22: memref<1x32xf32, #tpu.memory_space<vmem>>, %arg23: memref<1x32xf32, #tpu.memory_space<vmem>>, %arg24: memref<1x32xf32, #tpu.memory_space<vmem>>, %arg25: memref<1x8x32xf32, #tpu.memory_space<vmem>>) attributes {dimension_semantics = [#tpu.dimension_semantics<parallel>], iteration_bounds = array<i64: 2>, scalar_prefetch = 0 : i64, scratch_operands = 0 : i64, tpu.core_type = #tpu.core_type<tc>, window_params = [{transform_indices = @transform_0, window_bounds = array<i64: 1, 8, 32>}, {transform_indices = @transform_1, window_bounds = array<i64: 1, 8, 32>}, {transform_indices = @transform_2, window_bounds = array<i64: 1, 8, 8>}, {transform_indices = @transform_3, window_bounds = array<i64: 1, 1, 8>}, {pipeline_mode = #tpu.pipeline_mode<synchronous>, transform_indices = @transform_4, window_bounds = array<i64: 32, 96>}, {pipeline_mode = #tpu.pipeline_mode<synchronous>, transform_indices = @transform_5, window_bounds = array<i64: 1, 96>}, {pipeline_mode = #tpu.pipeline_mode<synchronous>, transform_indices = @transform_6, window_bounds = array<i64: 32, 32>}, {pipeline_mode = #tpu.pipeline_mode<synchronous>, transform_indices = @transform_7, window_bounds = array<i64: 1, 32>}, {pipeline_mode = #tpu.pipeline_mode<synchronous>, transform_indices = @transform_8, window_bounds = array<i64: 1, 32>}, {pipeline_mode = #tpu.pipeline_mode<synchronous>, transform_indices = @transform_9, window_bounds = array<i64: 1, 32>}, {pipeline_mode = #tpu.pipeline_mode<synchronous>, transform_indices = @transform_10, window_bounds = array<i64: 32, 32>}, {pipeline_mode = #tpu.pipeline_mode<synchronous>, transform_indices = @transform_11, window_bounds = array<i64: 1, 32>}, {pipeline_mode = #tpu.pipeline_mode<synchronous>, transform_indices = @transform_12, window_bounds = array<i64: 32, 64>}, {pipeline_mode = #tpu.pipeline_mode<synchronous>, transform_indices = @transform_13, window_bounds = array<i64: 1, 64>}, {pipeline_mode = #tpu.pipeline_mode<synchronous>, transform_indices = @transform_14, window_bounds = array<i64: 32, 32>}, {pipeline_mode = #tpu.pipeline_mode<synchronous>, transform_indices = @transform_15, window_bounds = array<i64: 1, 32>}, {pipeline_mode = #tpu.pipeline_mode<synchronous>, transform_indices = @transform_16, window_bounds = array<i64: 1, 32>}, {pipeline_mode = #tpu.pipeline_mode<synchronous>, transform_indices = @transform_17, window_bounds = array<i64: 1, 32>}, {pipeline_mode = #tpu.pipeline_mode<synchronous>, transform_indices = @transform_18, window_bounds = array<i64: 32, 64>}, {pipeline_mode = #tpu.pipeline_mode<synchronous>, transform_indices = @transform_19, window_bounds = array<i64: 1, 64>}, {pipeline_mode = #tpu.pipeline_mode<synchronous>, transform_indices = @transform_20, window_bounds = array<i64: 64, 32>}, {pipeline_mode = #tpu.pipeline_mode<synchronous>, transform_indices = @transform_21, window_bounds = array<i64: 1, 32>}, {pipeline_mode = #tpu.pipeline_mode<synchronous>, transform_indices = @transform_22, window_bounds = array<i64: 1, 32>}, {pipeline_mode = #tpu.pipeline_mode<synchronous>, transform_indices = @transform_23, window_bounds = array<i64: 1, 32>}, {transform_indices = @transform_24, window_bounds = array<i64: 1, 8, 32>}]} {
    %c0 = arith.constant 0 : index
    %c0_0 = arith.constant 0 : index
    %c0_1 = arith.constant 0 : index
    %0 = vector.load %arg1[%c0, %c0_0, %c0_1] : memref<1x8x32xf32, #tpu.memory_space<vmem>>, vector<1x8x32xf32>
    %1 = vector.shape_cast %0 : vector<1x8x32xf32> to vector<8x32xf32>
    %c0_2 = arith.constant 0 : index
    %c0_3 = arith.constant 0 : index
    %c0_4 = arith.constant 0 : index
    %2 = vector.load %arg2[%c0_2, %c0_3, %c0_4] : memref<1x8x32xf32, #tpu.memory_space<vmem>>, vector<1x8x32xf32>
    %3 = vector.shape_cast %2 : vector<1x8x32xf32> to vector<8x32xf32>
    %c0_5 = arith.constant 0 : index
    %c0_6 = arith.constant 0 : index
    %4 = vector.load %arg5[%c0_5, %c0_6] : memref<32x96xf32, #tpu.memory_space<vmem>>, vector<32x96xf32>
    %cst = arith.constant dense<0.000000e+00> : vector<8x96xf32>
    %5 = tpu.matmul %1, %4, %cst {dimension_numbers = #tpu.dot_dimension_numbers<[1], [0], [0], [1], [0, 0, 1, 1], [], []>} : vector<8x32xf32>, vector<32x96xf32>, vector<8x96xf32> -> vector<8x96xf32>
    %c0_7 = arith.constant 0 : index
    %c0_8 = arith.constant 0 : index
    %6 = vector.load %arg6[%c0_7, %c0_8] : memref<1x96xf32, #tpu.memory_space<vmem>>, vector<1x96xf32>
    %7 = vector.broadcast %6 : vector<1x96xf32> to vector<8x96xf32>
    %8 = arith.addf %5, %7 : vector<8x96xf32>
    %9 = vector.extract_strided_slice %8 {offsets = [0, 0], sizes = [8, 32], strides = [1, 1]} : vector<8x96xf32> to vector<8x32xf32>
    %10 = vector.extract_strided_slice %8 {offsets = [0, 32], sizes = [8, 32], strides = [1, 1]} : vector<8x96xf32> to vector<8x32xf32>
    %11 = vector.extract_strided_slice %8 {offsets = [0, 64], sizes = [8, 32], strides = [1, 1]} : vector<8x96xf32> to vector<8x32xf32>
    %c0_9 = arith.constant 0 : index
    %c0_10 = arith.constant 0 : index
    %c0_11 = arith.constant 0 : index
    %12 = vector.load %arg3[%c0_9, %c0_10, %c0_11] : memref<1x8x8xf32, #tpu.memory_space<vmem>>, vector<1x8x8xf32>
    %13 = vector.shape_cast %12 : vector<1x8x8xf32> to vector<8x8xf32>
    %14 = vector.extract_strided_slice %9 {offsets = [0, 0], sizes = [8, 8], strides = [1, 1]} : vector<8x32xf32> to vector<8x8xf32>
    %15 = vector.extract_strided_slice %10 {offsets = [0, 0], sizes = [8, 8], strides = [1, 1]} : vector<8x32xf32> to vector<8x8xf32>
    %16 = vector.extract_strided_slice %11 {offsets = [0, 0], sizes = [8, 8], strides = [1, 1]} : vector<8x32xf32> to vector<8x8xf32>
    %17 = tpu.transpose %15, [1, 0] : vector<8x8xf32> -> vector<8x8xf32>
    %cst_12 = arith.constant dense<0.000000e+00> : vector<8x8xf32>
    %18 = tpu.matmul %14, %17, %cst_12 {dimension_numbers = #tpu.dot_dimension_numbers<[1], [0], [0], [1], [0, 0, 1, 1], [], []>} : vector<8x8xf32>, vector<8x8xf32>, vector<8x8xf32> -> vector<8x8xf32>
    %cst_13 = arith.constant 0.353553385 : f32
    %19 = vector.broadcast %cst_13 : f32 to vector<8x8xf32>
    %20 = arith.mulf %18, %19 : vector<8x8xf32>
    %21 = arith.addf %20, %13 : vector<8x8xf32>
    %cst_14 = arith.constant dense<0xFF800000> : vector<8xf32>
    %22 = vector.multi_reduction <maximumf>, %21, %cst_14 [1] : vector<8x8xf32> to vector<8xf32>
    %23 = vector.shape_cast %22 : vector<8xf32> to vector<8x1xf32>
    %24 = vector.broadcast %23 : vector<8x1xf32> to vector<8x8xf32>
    %25 = arith.subf %21, %24 : vector<8x8xf32>
    %26 = math.exp %25 : vector<8x8xf32>
    %cst_15 = arith.constant dense<0.000000e+00> : vector<8xf32>
    %27 = vector.multi_reduction <add>, %26, %cst_15 [1] : vector<8x8xf32> to vector<8xf32>
    %28 = vector.shape_cast %27 : vector<8xf32> to vector<8x1xf32>
    %cst_16 = arith.constant dense<0.000000e+00> : vector<8x8xf32>
    %29 = tpu.matmul %26, %16, %cst_16 {dimension_numbers = #tpu.dot_dimension_numbers<[1], [0], [0], [1], [0, 0, 1, 1], [], []>} : vector<8x8xf32>, vector<8x8xf32>, vector<8x8xf32> -> vector<8x8xf32>
    %30 = tpu.reciprocal %28 {approx = true} : vector<8x1xf32> -> vector<8x1xf32>
    %31 = vector.broadcast %30 : vector<8x1xf32> to vector<8x8xf32>
    %32 = arith.mulf %29, %31 : vector<8x8xf32>
    %33 = vector.extract_strided_slice %9 {offsets = [0, 8], sizes = [8, 8], strides = [1, 1]} : vector<8x32xf32> to vector<8x8xf32>
    %34 = vector.extract_strided_slice %10 {offsets = [0, 8], sizes = [8, 8], strides = [1, 1]} : vector<8x32xf32> to vector<8x8xf32>
    %35 = vector.extract_strided_slice %11 {offsets = [0, 8], sizes = [8, 8], strides = [1, 1]} : vector<8x32xf32> to vector<8x8xf32>
    %36 = tpu.transpose %34, [1, 0] : vector<8x8xf32> -> vector<8x8xf32>
    %cst_17 = arith.constant dense<0.000000e+00> : vector<8x8xf32>
    %37 = tpu.matmul %33, %36, %cst_17 {dimension_numbers = #tpu.dot_dimension_numbers<[1], [0], [0], [1], [0, 0, 1, 1], [], []>} : vector<8x8xf32>, vector<8x8xf32>, vector<8x8xf32> -> vector<8x8xf32>
    %cst_18 = arith.constant 0.353553385 : f32
    %38 = vector.broadcast %cst_18 : f32 to vector<8x8xf32>
    %39 = arith.mulf %37, %38 : vector<8x8xf32>
    %40 = arith.addf %39, %13 : vector<8x8xf32>
    %cst_19 = arith.constant dense<0xFF800000> : vector<8xf32>
    %41 = vector.multi_reduction <maximumf>, %40, %cst_19 [1] : vector<8x8xf32> to vector<8xf32>
    %42 = vector.shape_cast %41 : vector<8xf32> to vector<8x1xf32>
    %43 = vector.broadcast %42 : vector<8x1xf32> to vector<8x8xf32>
    %44 = arith.subf %40, %43 : vector<8x8xf32>
    %45 = math.exp %44 : vector<8x8xf32>
    %cst_20 = arith.constant dense<0.000000e+00> : vector<8xf32>
    %46 = vector.multi_reduction <add>, %45, %cst_20 [1] : vector<8x8xf32> to vector<8xf32>
    %47 = vector.shape_cast %46 : vector<8xf32> to vector<8x1xf32>
    %cst_21 = arith.constant dense<0.000000e+00> : vector<8x8xf32>
    %48 = tpu.matmul %45, %35, %cst_21 {dimension_numbers = #tpu.dot_dimension_numbers<[1], [0], [0], [1], [0, 0, 1, 1], [], []>} : vector<8x8xf32>, vector<8x8xf32>, vector<8x8xf32> -> vector<8x8xf32>
    %49 = tpu.reciprocal %47 {approx = true} : vector<8x1xf32> -> vector<8x1xf32>
    %50 = vector.broadcast %49 : vector<8x1xf32> to vector<8x8xf32>
    %51 = arith.mulf %48, %50 : vector<8x8xf32>
    %52 = vector.extract_strided_slice %9 {offsets = [0, 16], sizes = [8, 8], strides = [1, 1]} : vector<8x32xf32> to vector<8x8xf32>
    %53 = vector.extract_strided_slice %10 {offsets = [0, 16], sizes = [8, 8], strides = [1, 1]} : vector<8x32xf32> to vector<8x8xf32>
    %54 = vector.extract_strided_slice %11 {offsets = [0, 16], sizes = [8, 8], strides = [1, 1]} : vector<8x32xf32> to vector<8x8xf32>
    %55 = tpu.transpose %53, [1, 0] : vector<8x8xf32> -> vector<8x8xf32>
    %cst_22 = arith.constant dense<0.000000e+00> : vector<8x8xf32>
    %56 = tpu.matmul %52, %55, %cst_22 {dimension_numbers = #tpu.dot_dimension_numbers<[1], [0], [0], [1], [0, 0, 1, 1], [], []>} : vector<8x8xf32>, vector<8x8xf32>, vector<8x8xf32> -> vector<8x8xf32>
    %cst_23 = arith.constant 0.353553385 : f32
    %57 = vector.broadcast %cst_23 : f32 to vector<8x8xf32>
    %58 = arith.mulf %56, %57 : vector<8x8xf32>
    %59 = arith.addf %58, %13 : vector<8x8xf32>
    %cst_24 = arith.constant dense<0xFF800000> : vector<8xf32>
    %60 = vector.multi_reduction <maximumf>, %59, %cst_24 [1] : vector<8x8xf32> to vector<8xf32>
    %61 = vector.shape_cast %60 : vector<8xf32> to vector<8x1xf32>
    %62 = vector.broadcast %61 : vector<8x1xf32> to vector<8x8xf32>
    %63 = arith.subf %59, %62 : vector<8x8xf32>
    %64 = math.exp %63 : vector<8x8xf32>
    %cst_25 = arith.constant dense<0.000000e+00> : vector<8xf32>
    %65 = vector.multi_reduction <add>, %64, %cst_25 [1] : vector<8x8xf32> to vector<8xf32>
    %66 = vector.shape_cast %65 : vector<8xf32> to vector<8x1xf32>
    %cst_26 = arith.constant dense<0.000000e+00> : vector<8x8xf32>
    %67 = tpu.matmul %64, %54, %cst_26 {dimension_numbers = #tpu.dot_dimension_numbers<[1], [0], [0], [1], [0, 0, 1, 1], [], []>} : vector<8x8xf32>, vector<8x8xf32>, vector<8x8xf32> -> vector<8x8xf32>
    %68 = tpu.reciprocal %66 {approx = true} : vector<8x1xf32> -> vector<8x1xf32>
    %69 = vector.broadcast %68 : vector<8x1xf32> to vector<8x8xf32>
    %70 = arith.mulf %67, %69 : vector<8x8xf32>
    %71 = vector.extract_strided_slice %9 {offsets = [0, 24], sizes = [8, 8], strides = [1, 1]} : vector<8x32xf32> to vector<8x8xf32>
    %72 = vector.extract_strided_slice %10 {offsets = [0, 24], sizes = [8, 8], strides = [1, 1]} : vector<8x32xf32> to vector<8x8xf32>
    %73 = vector.extract_strided_slice %11 {offsets = [0, 24], sizes = [8, 8], strides = [1, 1]} : vector<8x32xf32> to vector<8x8xf32>
    %74 = tpu.transpose %72, [1, 0] : vector<8x8xf32> -> vector<8x8xf32>
    %cst_27 = arith.constant dense<0.000000e+00> : vector<8x8xf32>
    %75 = tpu.matmul %71, %74, %cst_27 {dimension_numbers = #tpu.dot_dimension_numbers<[1], [0], [0], [1], [0, 0, 1, 1], [], []>} : vector<8x8xf32>, vector<8x8xf32>, vector<8x8xf32> -> vector<8x8xf32>
    %cst_28 = arith.constant 0.353553385 : f32
    %76 = vector.broadcast %cst_28 : f32 to vector<8x8xf32>
    %77 = arith.mulf %75, %76 : vector<8x8xf32>
    %78 = arith.addf %77, %13 : vector<8x8xf32>
    %cst_29 = arith.constant dense<0xFF800000> : vector<8xf32>
    %79 = vector.multi_reduction <maximumf>, %78, %cst_29 [1] : vector<8x8xf32> to vector<8xf32>
    %80 = vector.shape_cast %79 : vector<8xf32> to vector<8x1xf32>
    %81 = vector.broadcast %80 : vector<8x1xf32> to vector<8x8xf32>
    %82 = arith.subf %78, %81 : vector<8x8xf32>
    %83 = math.exp %82 : vector<8x8xf32>
    %cst_30 = arith.constant dense<0.000000e+00> : vector<8xf32>
    %84 = vector.multi_reduction <add>, %83, %cst_30 [1] : vector<8x8xf32> to vector<8xf32>
    %85 = vector.shape_cast %84 : vector<8xf32> to vector<8x1xf32>
    %cst_31 = arith.constant dense<0.000000e+00> : vector<8x8xf32>
    %86 = tpu.matmul %83, %73, %cst_31 {dimension_numbers = #tpu.dot_dimension_numbers<[1], [0], [0], [1], [0, 0, 1, 1], [], []>} : vector<8x8xf32>, vector<8x8xf32>, vector<8x8xf32> -> vector<8x8xf32>
    %87 = tpu.reciprocal %85 {approx = true} : vector<8x1xf32> -> vector<8x1xf32>
    %88 = vector.broadcast %87 : vector<8x1xf32> to vector<8x8xf32>
    %89 = arith.mulf %86, %88 : vector<8x8xf32>
    %90 = tpu.concatenate %32, %51, %70, %89 in 1 : vector<8x8xf32>, vector<8x8xf32>, vector<8x8xf32>, vector<8x8xf32> -> vector<8x32xf32>
    %c0_32 = arith.constant 0 : index
    %c0_33 = arith.constant 0 : index
    %91 = vector.load %arg7[%c0_32, %c0_33] : memref<32x32xf32, #tpu.memory_space<vmem>>, vector<32x32xf32>
    %cst_34 = arith.constant dense<0.000000e+00> : vector<8x32xf32>
    %92 = tpu.matmul %90, %91, %cst_34 {dimension_numbers = #tpu.dot_dimension_numbers<[1], [0], [0], [1], [0, 0, 1, 1], [], []>} : vector<8x32xf32>, vector<32x32xf32>, vector<8x32xf32> -> vector<8x32xf32>
    %c0_35 = arith.constant 0 : index
    %c0_36 = arith.constant 0 : index
    %93 = vector.load %arg8[%c0_35, %c0_36] : memref<1x32xf32, #tpu.memory_space<vmem>>, vector<1x32xf32>
    %94 = vector.broadcast %93 : vector<1x32xf32> to vector<8x32xf32>
    %95 = arith.addf %92, %94 : vector<8x32xf32>
    %96 = arith.addf %1, %95 : vector<8x32xf32>
    %c0_37 = arith.constant 0 : index
    %c0_38 = arith.constant 0 : index
    %97 = vector.load %arg9[%c0_37, %c0_38] : memref<1x32xf32, #tpu.memory_space<vmem>>, vector<1x32xf32>
    %c0_39 = arith.constant 0 : index
    %c0_40 = arith.constant 0 : index
    %98 = vector.load %arg10[%c0_39, %c0_40] : memref<1x32xf32, #tpu.memory_space<vmem>>, vector<1x32xf32>
    %cst_41 = arith.constant dense<0.000000e+00> : vector<8xf32>
    %99 = vector.multi_reduction <add>, %96, %cst_41 [1] : vector<8x32xf32> to vector<8xf32>
    %100 = vector.shape_cast %99 : vector<8xf32> to vector<8x1xf32>
    %cst_42 = arith.constant 3.200000e+01 : f32
    %101 = vector.broadcast %cst_42 : f32 to vector<8x1xf32>
    %102 = arith.divf %100, %101 : vector<8x1xf32>
    %103 = vector.broadcast %102 : vector<8x1xf32> to vector<8x32xf32>
    %104 = arith.subf %96, %103 : vector<8x32xf32>
    %105 = arith.mulf %104, %104 : vector<8x32xf32>
    %cst_43 = arith.constant dense<0.000000e+00> : vector<8xf32>
    %106 = vector.multi_reduction <add>, %105, %cst_43 [1] : vector<8x32xf32> to vector<8xf32>
    %107 = vector.shape_cast %106 : vector<8xf32> to vector<8x1xf32>
    %cst_44 = arith.constant 3.200000e+01 : f32
    %108 = vector.broadcast %cst_44 : f32 to vector<8x1xf32>
    %109 = arith.divf %107, %108 : vector<8x1xf32>
    %cst_45 = arith.constant 9.99999974E-6 : f32
    %110 = vector.broadcast %cst_45 : f32 to vector<8x1xf32>
    %111 = arith.addf %109, %110 : vector<8x1xf32>
    %112 = math.rsqrt %111 : vector<8x1xf32>
    %113 = vector.broadcast %112 : vector<8x1xf32> to vector<8x32xf32>
    %114 = arith.mulf %104, %113 : vector<8x32xf32>
    %115 = vector.broadcast %97 : vector<1x32xf32> to vector<8x32xf32>
    %116 = arith.mulf %114, %115 : vector<8x32xf32>
    %117 = vector.broadcast %98 : vector<1x32xf32> to vector<8x32xf32>
    %118 = arith.addf %116, %117 : vector<8x32xf32>
    %c0_46 = arith.constant 0 : index
    %c0_47 = arith.constant 0 : index
    %119 = vector.load %arg11[%c0_46, %c0_47] : memref<32x32xf32, #tpu.memory_space<vmem>>, vector<32x32xf32>
    %cst_48 = arith.constant dense<0.000000e+00> : vector<8x32xf32>
    %120 = tpu.matmul %118, %119, %cst_48 {dimension_numbers = #tpu.dot_dimension_numbers<[1], [0], [0], [1], [0, 0, 1, 1], [], []>} : vector<8x32xf32>, vector<32x32xf32>, vector<8x32xf32> -> vector<8x32xf32>
    %c0_49 = arith.constant 0 : index
    %c0_50 = arith.constant 0 : index
    %121 = vector.load %arg12[%c0_49, %c0_50] : memref<1x32xf32, #tpu.memory_space<vmem>>, vector<1x32xf32>
    %122 = vector.broadcast %121 : vector<1x32xf32> to vector<8x32xf32>
    %123 = arith.addf %120, %122 : vector<8x32xf32>
    %c0_51 = arith.constant 0 : index
    %c0_52 = arith.constant 0 : index
    %124 = vector.load %arg13[%c0_51, %c0_52] : memref<32x64xf32, #tpu.memory_space<vmem>>, vector<32x64xf32>
    %cst_53 = arith.constant dense<0.000000e+00> : vector<8x64xf32>
    %125 = tpu.matmul %3, %124, %cst_53 {dimension_numbers = #tpu.dot_dimension_numbers<[1], [0], [0], [1], [0, 0, 1, 1], [], []>} : vector<8x32xf32>, vector<32x64xf32>, vector<8x64xf32> -> vector<8x64xf32>
    %c0_54 = arith.constant 0 : index
    %c0_55 = arith.constant 0 : index
    %126 = vector.load %arg14[%c0_54, %c0_55] : memref<1x64xf32, #tpu.memory_space<vmem>>, vector<1x64xf32>
    %127 = vector.broadcast %126 : vector<1x64xf32> to vector<8x64xf32>
    %128 = arith.addf %125, %127 : vector<8x64xf32>
    %129 = vector.extract_strided_slice %128 {offsets = [0, 0], sizes = [8, 32], strides = [1, 1]} : vector<8x64xf32> to vector<8x32xf32>
    %130 = vector.extract_strided_slice %128 {offsets = [0, 32], sizes = [8, 32], strides = [1, 1]} : vector<8x64xf32> to vector<8x32xf32>
    %c0_56 = arith.constant 0 : index
    %c0_57 = arith.constant 0 : index
    %c0_58 = arith.constant 0 : index
    %131 = vector.load %arg4[%c0_56, %c0_57, %c0_58] : memref<1x1x8xf32, #tpu.memory_space<vmem>>, vector<1x1x8xf32>
    %132 = vector.shape_cast %131 : vector<1x1x8xf32> to vector<1x8xf32>
    %133 = vector.extract_strided_slice %123 {offsets = [0, 0], sizes = [8, 8], strides = [1, 1]} : vector<8x32xf32> to vector<8x8xf32>
    %134 = vector.extract_strided_slice %129 {offsets = [0, 0], sizes = [8, 8], strides = [1, 1]} : vector<8x32xf32> to vector<8x8xf32>
    %135 = vector.extract_strided_slice %130 {offsets = [0, 0], sizes = [8, 8], strides = [1, 1]} : vector<8x32xf32> to vector<8x8xf32>
    %136 = tpu.transpose %134, [1, 0] : vector<8x8xf32> -> vector<8x8xf32>
    %cst_59 = arith.constant dense<0.000000e+00> : vector<8x8xf32>
    %137 = tpu.matmul %133, %136, %cst_59 {dimension_numbers = #tpu.dot_dimension_numbers<[1], [0], [0], [1], [0, 0, 1, 1], [], []>} : vector<8x8xf32>, vector<8x8xf32>, vector<8x8xf32> -> vector<8x8xf32>
    %cst_60 = arith.constant 0.353553385 : f32
    %138 = vector.broadcast %cst_60 : f32 to vector<8x8xf32>
    %139 = arith.mulf %137, %138 : vector<8x8xf32>
    %140 = vector.broadcast %132 : vector<1x8xf32> to vector<8x8xf32>
    %141 = arith.addf %139, %140 : vector<8x8xf32>
    %cst_61 = arith.constant dense<0xFF800000> : vector<8xf32>
    %142 = vector.multi_reduction <maximumf>, %141, %cst_61 [1] : vector<8x8xf32> to vector<8xf32>
    %143 = vector.shape_cast %142 : vector<8xf32> to vector<8x1xf32>
    %144 = vector.broadcast %143 : vector<8x1xf32> to vector<8x8xf32>
    %145 = arith.subf %141, %144 : vector<8x8xf32>
    %146 = math.exp %145 : vector<8x8xf32>
    %cst_62 = arith.constant dense<0.000000e+00> : vector<8xf32>
    %147 = vector.multi_reduction <add>, %146, %cst_62 [1] : vector<8x8xf32> to vector<8xf32>
    %148 = vector.shape_cast %147 : vector<8xf32> to vector<8x1xf32>
    %cst_63 = arith.constant dense<0.000000e+00> : vector<8x8xf32>
    %149 = tpu.matmul %146, %135, %cst_63 {dimension_numbers = #tpu.dot_dimension_numbers<[1], [0], [0], [1], [0, 0, 1, 1], [], []>} : vector<8x8xf32>, vector<8x8xf32>, vector<8x8xf32> -> vector<8x8xf32>
    %150 = tpu.reciprocal %148 {approx = true} : vector<8x1xf32> -> vector<8x1xf32>
    %151 = vector.broadcast %150 : vector<8x1xf32> to vector<8x8xf32>
    %152 = arith.mulf %149, %151 : vector<8x8xf32>
    %153 = vector.extract_strided_slice %123 {offsets = [0, 8], sizes = [8, 8], strides = [1, 1]} : vector<8x32xf32> to vector<8x8xf32>
    %154 = vector.extract_strided_slice %129 {offsets = [0, 8], sizes = [8, 8], strides = [1, 1]} : vector<8x32xf32> to vector<8x8xf32>
    %155 = vector.extract_strided_slice %130 {offsets = [0, 8], sizes = [8, 8], strides = [1, 1]} : vector<8x32xf32> to vector<8x8xf32>
    %156 = tpu.transpose %154, [1, 0] : vector<8x8xf32> -> vector<8x8xf32>
    %cst_64 = arith.constant dense<0.000000e+00> : vector<8x8xf32>
    %157 = tpu.matmul %153, %156, %cst_64 {dimension_numbers = #tpu.dot_dimension_numbers<[1], [0], [0], [1], [0, 0, 1, 1], [], []>} : vector<8x8xf32>, vector<8x8xf32>, vector<8x8xf32> -> vector<8x8xf32>
    %cst_65 = arith.constant 0.353553385 : f32
    %158 = vector.broadcast %cst_65 : f32 to vector<8x8xf32>
    %159 = arith.mulf %157, %158 : vector<8x8xf32>
    %160 = vector.broadcast %132 : vector<1x8xf32> to vector<8x8xf32>
    %161 = arith.addf %159, %160 : vector<8x8xf32>
    %cst_66 = arith.constant dense<0xFF800000> : vector<8xf32>
    %162 = vector.multi_reduction <maximumf>, %161, %cst_66 [1] : vector<8x8xf32> to vector<8xf32>
    %163 = vector.shape_cast %162 : vector<8xf32> to vector<8x1xf32>
    %164 = vector.broadcast %163 : vector<8x1xf32> to vector<8x8xf32>
    %165 = arith.subf %161, %164 : vector<8x8xf32>
    %166 = math.exp %165 : vector<8x8xf32>
    %cst_67 = arith.constant dense<0.000000e+00> : vector<8xf32>
    %167 = vector.multi_reduction <add>, %166, %cst_67 [1] : vector<8x8xf32> to vector<8xf32>
    %168 = vector.shape_cast %167 : vector<8xf32> to vector<8x1xf32>
    %cst_68 = arith.constant dense<0.000000e+00> : vector<8x8xf32>
    %169 = tpu.matmul %166, %155, %cst_68 {dimension_numbers = #tpu.dot_dimension_numbers<[1], [0], [0], [1], [0, 0, 1, 1], [], []>} : vector<8x8xf32>, vector<8x8xf32>, vector<8x8xf32> -> vector<8x8xf32>
    %170 = tpu.reciprocal %168 {approx = true} : vector<8x1xf32> -> vector<8x1xf32>
    %171 = vector.broadcast %170 : vector<8x1xf32> to vector<8x8xf32>
    %172 = arith.mulf %169, %171 : vector<8x8xf32>
    %173 = vector.extract_strided_slice %123 {offsets = [0, 16], sizes = [8, 8], strides = [1, 1]} : vector<8x32xf32> to vector<8x8xf32>
    %174 = vector.extract_strided_slice %129 {offsets = [0, 16], sizes = [8, 8], strides = [1, 1]} : vector<8x32xf32> to vector<8x8xf32>
    %175 = vector.extract_strided_slice %130 {offsets = [0, 16], sizes = [8, 8], strides = [1, 1]} : vector<8x32xf32> to vector<8x8xf32>
    %176 = tpu.transpose %174, [1, 0] : vector<8x8xf32> -> vector<8x8xf32>
    %cst_69 = arith.constant dense<0.000000e+00> : vector<8x8xf32>
    %177 = tpu.matmul %173, %176, %cst_69 {dimension_numbers = #tpu.dot_dimension_numbers<[1], [0], [0], [1], [0, 0, 1, 1], [], []>} : vector<8x8xf32>, vector<8x8xf32>, vector<8x8xf32> -> vector<8x8xf32>
    %cst_70 = arith.constant 0.353553385 : f32
    %178 = vector.broadcast %cst_70 : f32 to vector<8x8xf32>
    %179 = arith.mulf %177, %178 : vector<8x8xf32>
    %180 = vector.broadcast %132 : vector<1x8xf32> to vector<8x8xf32>
    %181 = arith.addf %179, %180 : vector<8x8xf32>
    %cst_71 = arith.constant dense<0xFF800000> : vector<8xf32>
    %182 = vector.multi_reduction <maximumf>, %181, %cst_71 [1] : vector<8x8xf32> to vector<8xf32>
    %183 = vector.shape_cast %182 : vector<8xf32> to vector<8x1xf32>
    %184 = vector.broadcast %183 : vector<8x1xf32> to vector<8x8xf32>
    %185 = arith.subf %181, %184 : vector<8x8xf32>
    %186 = math.exp %185 : vector<8x8xf32>
    %cst_72 = arith.constant dense<0.000000e+00> : vector<8xf32>
    %187 = vector.multi_reduction <add>, %186, %cst_72 [1] : vector<8x8xf32> to vector<8xf32>
    %188 = vector.shape_cast %187 : vector<8xf32> to vector<8x1xf32>
    %cst_73 = arith.constant dense<0.000000e+00> : vector<8x8xf32>
    %189 = tpu.matmul %186, %175, %cst_73 {dimension_numbers = #tpu.dot_dimension_numbers<[1], [0], [0], [1], [0, 0, 1, 1], [], []>} : vector<8x8xf32>, vector<8x8xf32>, vector<8x8xf32> -> vector<8x8xf32>
    %190 = tpu.reciprocal %188 {approx = true} : vector<8x1xf32> -> vector<8x1xf32>
    %191 = vector.broadcast %190 : vector<8x1xf32> to vector<8x8xf32>
    %192 = arith.mulf %189, %191 : vector<8x8xf32>
    %193 = vector.extract_strided_slice %123 {offsets = [0, 24], sizes = [8, 8], strides = [1, 1]} : vector<8x32xf32> to vector<8x8xf32>
    %194 = vector.extract_strided_slice %129 {offsets = [0, 24], sizes = [8, 8], strides = [1, 1]} : vector<8x32xf32> to vector<8x8xf32>
    %195 = vector.extract_strided_slice %130 {offsets = [0, 24], sizes = [8, 8], strides = [1, 1]} : vector<8x32xf32> to vector<8x8xf32>
    %196 = tpu.transpose %194, [1, 0] : vector<8x8xf32> -> vector<8x8xf32>
    %cst_74 = arith.constant dense<0.000000e+00> : vector<8x8xf32>
    %197 = tpu.matmul %193, %196, %cst_74 {dimension_numbers = #tpu.dot_dimension_numbers<[1], [0], [0], [1], [0, 0, 1, 1], [], []>} : vector<8x8xf32>, vector<8x8xf32>, vector<8x8xf32> -> vector<8x8xf32>
    %cst_75 = arith.constant 0.353553385 : f32
    %198 = vector.broadcast %cst_75 : f32 to vector<8x8xf32>
    %199 = arith.mulf %197, %198 : vector<8x8xf32>
    %200 = vector.broadcast %132 : vector<1x8xf32> to vector<8x8xf32>
    %201 = arith.addf %199, %200 : vector<8x8xf32>
    %cst_76 = arith.constant dense<0xFF800000> : vector<8xf32>
    %202 = vector.multi_reduction <maximumf>, %201, %cst_76 [1] : vector<8x8xf32> to vector<8xf32>
    %203 = vector.shape_cast %202 : vector<8xf32> to vector<8x1xf32>
    %204 = vector.broadcast %203 : vector<8x1xf32> to vector<8x8xf32>
    %205 = arith.subf %201, %204 : vector<8x8xf32>
    %206 = math.exp %205 : vector<8x8xf32>
    %cst_77 = arith.constant dense<0.000000e+00> : vector<8xf32>
    %207 = vector.multi_reduction <add>, %206, %cst_77 [1] : vector<8x8xf32> to vector<8xf32>
    %208 = vector.shape_cast %207 : vector<8xf32> to vector<8x1xf32>
    %cst_78 = arith.constant dense<0.000000e+00> : vector<8x8xf32>
    %209 = tpu.matmul %206, %195, %cst_78 {dimension_numbers = #tpu.dot_dimension_numbers<[1], [0], [0], [1], [0, 0, 1, 1], [], []>} : vector<8x8xf32>, vector<8x8xf32>, vector<8x8xf32> -> vector<8x8xf32>
    %210 = tpu.reciprocal %208 {approx = true} : vector<8x1xf32> -> vector<8x1xf32>
    %211 = vector.broadcast %210 : vector<8x1xf32> to vector<8x8xf32>
    %212 = arith.mulf %209, %211 : vector<8x8xf32>
    %213 = tpu.concatenate %152, %172, %192, %212 in 1 : vector<8x8xf32>, vector<8x8xf32>, vector<8x8xf32>, vector<8x8xf32> -> vector<8x32xf32>
    %c0_79 = arith.constant 0 : index
    %c0_80 = arith.constant 0 : index
    %214 = vector.load %arg15[%c0_79, %c0_80] : memref<32x32xf32, #tpu.memory_space<vmem>>, vector<32x32xf32>
    %cst_81 = arith.constant dense<0.000000e+00> : vector<8x32xf32>
    %215 = tpu.matmul %213, %214, %cst_81 {dimension_numbers = #tpu.dot_dimension_numbers<[1], [0], [0], [1], [0, 0, 1, 1], [], []>} : vector<8x32xf32>, vector<32x32xf32>, vector<8x32xf32> -> vector<8x32xf32>
    %c0_82 = arith.constant 0 : index
    %c0_83 = arith.constant 0 : index
    %216 = vector.load %arg16[%c0_82, %c0_83] : memref<1x32xf32, #tpu.memory_space<vmem>>, vector<1x32xf32>
    %217 = vector.broadcast %216 : vector<1x32xf32> to vector<8x32xf32>
    %218 = arith.addf %215, %217 : vector<8x32xf32>
    %219 = arith.addf %118, %218 : vector<8x32xf32>
    %c0_84 = arith.constant 0 : index
    %c0_85 = arith.constant 0 : index
    %220 = vector.load %arg17[%c0_84, %c0_85] : memref<1x32xf32, #tpu.memory_space<vmem>>, vector<1x32xf32>
    %c0_86 = arith.constant 0 : index
    %c0_87 = arith.constant 0 : index
    %221 = vector.load %arg18[%c0_86, %c0_87] : memref<1x32xf32, #tpu.memory_space<vmem>>, vector<1x32xf32>
    %cst_88 = arith.constant dense<0.000000e+00> : vector<8xf32>
    %222 = vector.multi_reduction <add>, %219, %cst_88 [1] : vector<8x32xf32> to vector<8xf32>
    %223 = vector.shape_cast %222 : vector<8xf32> to vector<8x1xf32>
    %cst_89 = arith.constant 3.200000e+01 : f32
    %224 = vector.broadcast %cst_89 : f32 to vector<8x1xf32>
    %225 = arith.divf %223, %224 : vector<8x1xf32>
    %226 = vector.broadcast %225 : vector<8x1xf32> to vector<8x32xf32>
    %227 = arith.subf %219, %226 : vector<8x32xf32>
    %228 = arith.mulf %227, %227 : vector<8x32xf32>
    %cst_90 = arith.constant dense<0.000000e+00> : vector<8xf32>
    %229 = vector.multi_reduction <add>, %228, %cst_90 [1] : vector<8x32xf32> to vector<8xf32>
    %230 = vector.shape_cast %229 : vector<8xf32> to vector<8x1xf32>
    %cst_91 = arith.constant 3.200000e+01 : f32
    %231 = vector.broadcast %cst_91 : f32 to vector<8x1xf32>
    %232 = arith.divf %230, %231 : vector<8x1xf32>
    %cst_92 = arith.constant 9.99999974E-6 : f32
    %233 = vector.broadcast %cst_92 : f32 to vector<8x1xf32>
    %234 = arith.addf %232, %233 : vector<8x1xf32>
    %235 = math.rsqrt %234 : vector<8x1xf32>
    %236 = vector.broadcast %235 : vector<8x1xf32> to vector<8x32xf32>
    %237 = arith.mulf %227, %236 : vector<8x32xf32>
    %238 = vector.broadcast %220 : vector<1x32xf32> to vector<8x32xf32>
    %239 = arith.mulf %237, %238 : vector<8x32xf32>
    %240 = vector.broadcast %221 : vector<1x32xf32> to vector<8x32xf32>
    %241 = arith.addf %239, %240 : vector<8x32xf32>
    %c0_93 = arith.constant 0 : index
    %c0_94 = arith.constant 0 : index
    %242 = vector.load %arg19[%c0_93, %c0_94] : memref<32x64xf32, #tpu.memory_space<vmem>>, vector<32x64xf32>
    %cst_95 = arith.constant dense<0.000000e+00> : vector<8x64xf32>
    %243 = tpu.matmul %241, %242, %cst_95 {dimension_numbers = #tpu.dot_dimension_numbers<[1], [0], [0], [1], [0, 0, 1, 1], [], []>} : vector<8x32xf32>, vector<32x64xf32>, vector<8x64xf32> -> vector<8x64xf32>
    %c0_96 = arith.constant 0 : index
    %c0_97 = arith.constant 0 : index
    %244 = vector.load %arg20[%c0_96, %c0_97] : memref<1x64xf32, #tpu.memory_space<vmem>>, vector<1x64xf32>
    %245 = vector.broadcast %244 : vector<1x64xf32> to vector<8x64xf32>
    %246 = arith.addf %243, %245 : vector<8x64xf32>
    %cst_98 = arith.constant 0.000000e+00 : f32
    %247 = vector.broadcast %cst_98 : f32 to vector<8x64xf32>
    %248 = arith.maximumf %246, %247 : vector<8x64xf32>
    %c0_99 = arith.constant 0 : index
    %c0_100 = arith.constant 0 : index
    %249 = vector.load %arg21[%c0_99, %c0_100] : memref<64x32xf32, #tpu.memory_space<vmem>>, vector<64x32xf32>
    %cst_101 = arith.constant dense<0.000000e+00> : vector<8x32xf32>
    %250 = tpu.matmul %248, %249, %cst_101 {dimension_numbers = #tpu.dot_dimension_numbers<[1], [0], [0], [1], [0, 0, 1, 1], [], []>} : vector<8x64xf32>, vector<64x32xf32>, vector<8x32xf32> -> vector<8x32xf32>
    %c0_102 = arith.constant 0 : index
    %c0_103 = arith.constant 0 : index
    %251 = vector.load %arg22[%c0_102, %c0_103] : memref<1x32xf32, #tpu.memory_space<vmem>>, vector<1x32xf32>
    %252 = vector.broadcast %251 : vector<1x32xf32> to vector<8x32xf32>
    %253 = arith.addf %250, %252 : vector<8x32xf32>
    %254 = arith.addf %241, %253 : vector<8x32xf32>
    %c0_104 = arith.constant 0 : index
    %c0_105 = arith.constant 0 : index
    %255 = vector.load %arg23[%c0_104, %c0_105] : memref<1x32xf32, #tpu.memory_space<vmem>>, vector<1x32xf32>
    %c0_106 = arith.constant 0 : index
    %c0_107 = arith.constant 0 : index
    %256 = vector.load %arg24[%c0_106, %c0_107] : memref<1x32xf32, #tpu.memory_space<vmem>>, vector<1x32xf32>
    %cst_108 = arith.constant dense<0.000000e+00> : vector<8xf32>
    %257 = vector.multi_reduction <add>, %254, %cst_108 [1] : vector<8x32xf32> to vector<8xf32>
    %258 = vector.shape_cast %257 : vector<8xf32> to vector<8x1xf32>
    %cst_109 = arith.constant 3.200000e+01 : f32
    %259 = vector.broadcast %cst_109 : f32 to vector<8x1xf32>
    %260 = arith.divf %258, %259 : vector<8x1xf32>
    %261 = vector.broadcast %260 : vector<8x1xf32> to vector<8x32xf32>
    %262 = arith.subf %254, %261 : vector<8x32xf32>
    %263 = arith.mulf %262, %262 : vector<8x32xf32>
    %cst_110 = arith.constant dense<0.000000e+00> : vector<8xf32>
    %264 = vector.multi_reduction <add>, %263, %cst_110 [1] : vector<8x32xf32> to vector<8xf32>
    %265 = vector.shape_cast %264 : vector<8xf32> to vector<8x1xf32>
    %cst_111 = arith.constant 3.200000e+01 : f32
    %266 = vector.broadcast %cst_111 : f32 to vector<8x1xf32>
    %267 = arith.divf %265, %266 : vector<8x1xf32>
    %cst_112 = arith.constant 9.99999974E-6 : f32
    %268 = vector.broadcast %cst_112 : f32 to vector<8x1xf32>
    %269 = arith.addf %267, %268 : vector<8x1xf32>
    %270 = math.rsqrt %269 : vector<8x1xf32>
    %271 = vector.broadcast %270 : vector<8x1xf32> to vector<8x32xf32>
    %272 = arith.mulf %262, %271 : vector<8x32xf32>
    %273 = vector.broadcast %255 : vector<1x32xf32> to vector<8x32xf32>
    %274 = arith.mulf %272, %273 : vector<8x32xf32>
    %275 = vector.broadcast %256 : vector<1x32xf32> to vector<8x32xf32>
    %276 = arith.addf %274, %275 : vector<8x32xf32>
    %c0_113 = arith.constant 0 : index
    %c0_114 = arith.constant 0 : index
    %c0_115 = arith.constant 0 : index
    %277 = vector.load %arg25[%c0_113, %c0_114, %c0_115] : memref<1x8x32xf32, #tpu.memory_space<vmem>>, vector<1x8x32xf32>
    %278 = vector.shape_cast %277 : vector<1x8x32xf32> to vector<8x32xf32>
    %279 = vector.shape_cast %276 : vector<8x32xf32> to vector<1x8x32xf32>
    tpu.vector_store %arg25[%c0_113, %c0_114, %c0_115], %279 {strides = array<i32>} : memref<1x8x32xf32, #tpu.memory_space<vmem>>, vector<1x8x32xf32>,
    return
  }
  func.func @transform_0(%arg0: i32) -> (i32, i32, i32) {
    %c0_i32 = arith.constant 0 : i32
    %c0_i32_0 = arith.constant 0 : i32
    %c0_i32_1 = arith.constant 0 : i32
    return %arg0, %c0_i32, %c0_i32_0 : i32, i32, i32
  }
  func.func @transform_1(%arg0: i32) -> (i32, i32, i32) {
    %c0_i32 = arith.constant 0 : i32
    %c0_i32_0 = arith.constant 0 : i32
    %c0_i32_1 = arith.constant 0 : i32
    return %arg0, %c0_i32, %c0_i32_0 : i32, i32, i32
  }
  func.func @transform_2(%arg0: i32) -> (i32, i32, i32) {
    %c0_i32 = arith.constant 0 : i32
    %c0_i32_0 = arith.constant 0 : i32
    %c0_i32_1 = arith.constant 0 : i32
    return %arg0, %c0_i32, %c0_i32_0 : i32, i32, i32
  }
  func.func @transform_3(%arg0: i32) -> (i32, i32, i32) {
    %c0_i32 = arith.constant 0 : i32
    %c0_i32_0 = arith.constant 0 : i32
    %c0_i32_1 = arith.constant 0 : i32
    return %arg0, %c0_i32, %c0_i32_0 : i32, i32, i32
  }
  func.func @transform_4(%arg0: i32) -> (i32, i32) {
    %c0_i32 = arith.constant 0 : i32
    %c0_i32_0 = arith.constant 0 : i32
    %c0_i32_1 = arith.constant 0 : i32
    return %c0_i32, %c0_i32_0 : i32, i32
  }
  func.func @transform_5(%arg0: i32) -> (i32, i32) {
    %c0_i32 = arith.constant 0 : i32
    %c0_i32_0 = arith.constant 0 : i32
    %c0_i32_1 = arith.constant 0 : i32
    return %c0_i32, %c0_i32_0 : i32, i32
  }
  func.func @transform_6(%arg0: i32) -> (i32, i32) {
    %c0_i32 = arith.constant 0 : i32
    %c0_i32_0 = arith.constant 0 : i32
    %c0_i32_1 = arith.constant 0 : i32
    return %c0_i32, %c0_i32_0 : i32, i32
  }
  func.func @transform_7(%arg0: i32) -> (i32, i32) {
    %c0_i32 = arith.constant 0 : i32
    %c0_i32_0 = arith.constant 0 : i32
    %c0_i32_1 = arith.constant 0 : i32
    return %c0_i32, %c0_i32_0 : i32, i32
  }
  func.func @transform_8(%arg0: i32) -> (i32, i32) {
    %c0_i32 = arith.constant 0 : i32
    %c0_i32_0 = arith.constant 0 : i32
    %c0_i32_1 = arith.constant 0 : i32
    return %c0_i32, %c0_i32_0 : i32, i32
  }
  func.func @transform_9(%arg0: i32) -> (i32, i32) {
    %c0_i32 = arith.constant 0 : i32
    %c0_i32_0 = arith.constant 0 : i32
    %c0_i32_1 = arith.constant 0 : i32
    return %c0_i32, %c0_i32_0 : i32, i32
  }
  func.func @transform_10(%arg0: i32) -> (i32, i32) {
    %c0_i32 = arith.constant 0 : i32
    %c0_i32_0 = arith.constant 0 : i32
    %c0_i32_1 = arith.constant 0 : i32
    return %c0_i32, %c0_i32_0 : i32, i32
  }
  func.func @transform_11(%arg0: i32) -> (i32, i32) {
    %c0_i32 = arith.constant 0 : i32
    %c0_i32_0 = arith.constant 0 : i32
    %c0_i32_1 = arith.constant 0 : i32
    return %c0_i32, %c0_i32_0 : i32, i32
  }
  func.func @transform_12(%arg0: i32) -> (i32, i32) {
    %c0_i32 = arith.constant 0 : i32
    %c0_i32_0 = arith.constant 0 : i32
    %c0_i32_1 = arith.constant 0 : i32
    return %c0_i32, %c0_i32_0 : i32, i32
  }
  func.func @transform_13(%arg0: i32) -> (i32, i32) {
    %c0_i32 = arith.constant 0 : i32
    %c0_i32_0 = arith.constant 0 : i32
    %c0_i32_1 = arith.constant 0 : i32
    return %c0_i32, %c0_i32_0 : i32, i32
  }
  func.func @transform_14(%arg0: i32) -> (i32, i32) {
    %c0_i32 = arith.constant 0 : i32
    %c0_i32_0 = arith.constant 0 : i32
    %c0_i32_1 = arith.constant 0 : i32
    return %c0_i32, %c0_i32_0 : i32, i32
  }
  func.func @transform_15(%arg0: i32) -> (i32, i32) {
    %c0_i32 = arith.constant 0 : i32
    %c0_i32_0 = arith.constant 0 : i32
    %c0_i32_1 = arith.constant 0 : i32
    return %c0_i32, %c0_i32_0 : i32, i32
  }
  func.func @transform_16(%arg0: i32) -> (i32, i32) {
    %c0_i32 = arith.constant 0 : i32
    %c0_i32_0 = arith.constant 0 : i32
    %c0_i32_1 = arith.constant 0 : i32
    return %c0_i32, %c0_i32_0 : i32, i32
  }
  func.func @transform_17(%arg0: i32) -> (i32, i32) {
    %c0_i32 = arith.constant 0 : i32
    %c0_i32_0 = arith.constant 0 : i32
    %c0_i32_1 = arith.constant 0 : i32
    return %c0_i32, %c0_i32_0 : i32, i32
  }
  func.func @transform_18(%arg0: i32) -> (i32, i32) {
    %c0_i32 = arith.constant 0 : i32
    %c0_i32_0 = arith.constant 0 : i32
    %c0_i32_1 = arith.constant 0 : i32
    return %c0_i32, %c0_i32_0 : i32, i32
  }
  func.func @transform_19(%arg0: i32) -> (i32, i32) {
    %c0_i32 = arith.constant 0 : i32
    %c0_i32_0 = arith.constant 0 : i32
    %c0_i32_1 = arith.constant 0 : i32
    return %c0_i32, %c0_i32_0 : i32, i32
  }
  func.func @transform_20(%arg0: i32) -> (i32, i32) {
    %c0_i32 = arith.constant 0 : i32
    %c0_i32_0 = arith.constant 0 : i32
    %c0_i32_1 = arith.constant 0 : i32
    return %c0_i32, %c0_i32_0 : i32, i32
  }
  func.func @transform_21(%arg0: i32) -> (i32, i32) {
    %c0_i32 = arith.constant 0 : i32
    %c0_i32_0 = arith.constant 0 : i32
    %c0_i32_1 = arith.constant 0 : i32
    return %c0_i32, %c0_i32_0 : i32, i32
  }
  func.func @transform_22(%arg0: i32) -> (i32, i32) {
    %c0_i32 = arith.constant 0 : i32
    %c0_i32_0 = arith.constant 0 : i32
    %c0_i32_1 = arith.constant 0 : i32
    return %c0_i32, %c0_i32_0 : i32, i32
  }
  func.func @transform_23(%arg0: i32) -> (i32, i32) {
    %c0_i32 = arith.constant 0 : i32
    %c0_i32_0 = arith.constant 0 : i32
    %c0_i32_1 = arith.constant 0 : i32
    return %c0_i32, %c0_i32_0 : i32, i32
  }
  func.func @transform_24(%arg0: i32) -> (i32, i32, i32) {
    %c0_i32 = arith.constant 0 : i32
    %c0_i32_0 = arith.constant 0 : i32
    %c0_i32_1 = arith.constant 0 : i32
    return %arg0, %c0_i32, %c0_i32_0 : i32, i32, i32
  }
}

module attributes {stable_mosaic.version = 11 : i64} {
  func.func @_dec_layer_kernel(%arg0: i32, %arg1: memref<1x8x32xf32, #tpu.memory_space<vmem>>, %arg2: memref<1x8x32xf32, #tpu.memory_space<vmem>>, %arg3: memref<1x8x8xf32, #tpu.memory_space<vmem>>, %arg4: memref<1x1x8xf32, #tpu.memory_space<vmem>>, %arg5: memref<32x96xf32, #tpu.memory_space<vmem>>, %arg6: memref<1x96xf32, #tpu.memory_space<vmem>>, %arg7: memref<32x32xf32, #tpu.memory_space<vmem>>, %arg8: memref<1x32xf32, #tpu.memory_space<vmem>>, %arg9: memref<1x32xf32, #tpu.memory_space<vmem>>, %arg10: memref<1x32xf32, #tpu.memory_space<vmem>>, %arg11: memref<32x32xf32, #tpu.memory_space<vmem>>, %arg12: memref<1x32xf32, #tpu.memory_space<vmem>>, %arg13: memref<32x64xf32, #tpu.memory_space<vmem>>, %arg14: memref<1x64xf32, #tpu.memory_space<vmem>>, %arg15: memref<32x32xf32, #tpu.memory_space<vmem>>, %arg16: memref<1x32xf32, #tpu.memory_space<vmem>>, %arg17: memref<1x32xf32, #tpu.memory_space<vmem>>, %arg18: memref<1x32xf32, #tpu.memory_space<vmem>>, %arg19: memref<32x64xf32, #tpu.memory_space<vmem>>, %arg20: memref<1x64xf32, #tpu.memory_space<vmem>>, %arg21: memref<64x32xf32, #tpu.memory_space<vmem>>, %arg22: memref<1x32xf32, #tpu.memory_space<vmem>>, %arg23: memref<1x32xf32, #tpu.memory_space<vmem>>, %arg24: memref<1x32xf32, #tpu.memory_space<vmem>>, %arg25: memref<1x8x32xf32, #tpu.memory_space<vmem>>) attributes {dimension_semantics = [#tpu.dimension_semantics<parallel>], iteration_bounds = array<i64: 2>, scalar_prefetch = 0 : i64, scratch_operands = 0 : i64, tpu.core_type = #tpu.core_type<tc>, window_params = [{transform_indices = @transform_0, window_bounds = array<i64: 1, 8, 32>}, {transform_indices = @transform_1, window_bounds = array<i64: 1, 8, 32>}, {transform_indices = @transform_2, window_bounds = array<i64: 1, 8, 8>}, {transform_indices = @transform_3, window_bounds = array<i64: 1, 1, 8>}, {pipeline_mode = #tpu.pipeline_mode<synchronous>, transform_indices = @transform_4, window_bounds = array<i64: 32, 96>}, {pipeline_mode = #tpu.pipeline_mode<synchronous>, transform_indices = @transform_5, window_bounds = array<i64: 1, 96>}, {pipeline_mode = #tpu.pipeline_mode<synchronous>, transform_indices = @transform_6, window_bounds = array<i64: 32, 32>}, {pipeline_mode = #tpu.pipeline_mode<synchronous>, transform_indices = @transform_7, window_bounds = array<i64: 1, 32>}, {pipeline_mode = #tpu.pipeline_mode<synchronous>, transform_indices = @transform_8, window_bounds = array<i64: 1, 32>}, {pipeline_mode = #tpu.pipeline_mode<synchronous>, transform_indices = @transform_9, window_bounds = array<i64: 1, 32>}, {pipeline_mode = #tpu.pipeline_mode<synchronous>, transform_indices = @transform_10, window_bounds = array<i64: 32, 32>}, {pipeline_mode = #tpu.pipeline_mode<synchronous>, transform_indices = @transform_11, window_bounds = array<i64: 1, 32>}, {pipeline_mode = #tpu.pipeline_mode<synchronous>, transform_indices = @transform_12, window_bounds = array<i64: 32, 64>}, {pipeline_mode = #tpu.pipeline_mode<synchronous>, transform_indices = @transform_13, window_bounds = array<i64: 1, 64>}, {pipeline_mode = #tpu.pipeline_mode<synchronous>, transform_indices = @transform_14, window_bounds = array<i64: 32, 32>}, {pipeline_mode = #tpu.pipeline_mode<synchronous>, transform_indices = @transform_15, window_bounds = array<i64: 1, 32>}, {pipeline_mode = #tpu.pipeline_mode<synchronous>, transform_indices = @transform_16, window_bounds = array<i64: 1, 32>}, {pipeline_mode = #tpu.pipeline_mode<synchronous>, transform_indices = @transform_17, window_bounds = array<i64: 1, 32>}, {pipeline_mode = #tpu.pipeline_mode<synchronous>, transform_indices = @transform_18, window_bounds = array<i64: 32, 64>}, {pipeline_mode = #tpu.pipeline_mode<synchronous>, transform_indices = @transform_19, window_bounds = array<i64: 1, 64>}, {pipeline_mode = #tpu.pipeline_mode<synchronous>, transform_indices = @transform_20, window_bounds = array<i64: 64, 32>}, {pipeline_mode = #tpu.pipeline_mode<synchronous>, transform_indices = @transform_21, window_bounds = array<i64: 1, 32>}, {pipeline_mode = #tpu.pipeline_mode<synchronous>, transform_indices = @transform_22, window_bounds = array<i64: 1, 32>}, {pipeline_mode = #tpu.pipeline_mode<synchronous>, transform_indices = @transform_23, window_bounds = array<i64: 1, 32>}, {transform_indices = @transform_24, window_bounds = array<i64: 1, 8, 32>}]} {
    %c0 = arith.constant 0 : index
    %c0_0 = arith.constant 0 : index
    %c0_1 = arith.constant 0 : index
    %0 = vector.load %arg1[%c0, %c0_0, %c0_1] : memref<1x8x32xf32, #tpu.memory_space<vmem>>, vector<1x8x32xf32>
    %1 = vector.shape_cast %0 : vector<1x8x32xf32> to vector<8x32xf32>
    %c0_2 = arith.constant 0 : index
    %c0_3 = arith.constant 0 : index
    %c0_4 = arith.constant 0 : index
    %2 = vector.load %arg2[%c0_2, %c0_3, %c0_4] : memref<1x8x32xf32, #tpu.memory_space<vmem>>, vector<1x8x32xf32>
    %3 = vector.shape_cast %2 : vector<1x8x32xf32> to vector<8x32xf32>
    %c0_5 = arith.constant 0 : index
    %c0_6 = arith.constant 0 : index
    %4 = vector.load %arg5[%c0_5, %c0_6] : memref<32x96xf32, #tpu.memory_space<vmem>>, vector<32x96xf32>
    %cst = arith.constant dense<0.000000e+00> : vector<8x96xf32>
    %5 = tpu.matmul %1, %4, %cst {dimension_numbers = #tpu.dot_dimension_numbers<[1], [0], [0], [1], [0, 0, 1, 1], [], []>} : vector<8x32xf32>, vector<32x96xf32>, vector<8x96xf32> -> vector<8x96xf32>
    %c0_7 = arith.constant 0 : index
    %c0_8 = arith.constant 0 : index
    %6 = vector.load %arg6[%c0_7, %c0_8] : memref<1x96xf32, #tpu.memory_space<vmem>>, vector<1x96xf32>
    %7 = vector.broadcast %6 : vector<1x96xf32> to vector<8x96xf32>
    %8 = arith.addf %5, %7 : vector<8x96xf32>
    %9 = vector.extract_strided_slice %8 {offsets = [0, 0], sizes = [8, 32], strides = [1, 1]} : vector<8x96xf32> to vector<8x32xf32>
    %10 = vector.extract_strided_slice %8 {offsets = [0, 32], sizes = [8, 32], strides = [1, 1]} : vector<8x96xf32> to vector<8x32xf32>
    %11 = vector.extract_strided_slice %8 {offsets = [0, 64], sizes = [8, 32], strides = [1, 1]} : vector<8x96xf32> to vector<8x32xf32>
    %c0_9 = arith.constant 0 : index
    %c0_10 = arith.constant 0 : index
    %c0_11 = arith.constant 0 : index
    %12 = vector.load %arg3[%c0_9, %c0_10, %c0_11] : memref<1x8x8xf32, #tpu.memory_space<vmem>>, vector<1x8x8xf32>
    %13 = vector.shape_cast %12 : vector<1x8x8xf32> to vector<8x8xf32>
    %14 = vector.extract_strided_slice %9 {offsets = [0, 0], sizes = [8, 8], strides = [1, 1]} : vector<8x32xf32> to vector<8x8xf32>
    %15 = vector.extract_strided_slice %10 {offsets = [0, 0], sizes = [8, 8], strides = [1, 1]} : vector<8x32xf32> to vector<8x8xf32>
    %16 = vector.extract_strided_slice %11 {offsets = [0, 0], sizes = [8, 8], strides = [1, 1]} : vector<8x32xf32> to vector<8x8xf32>
    %17 = tpu.transpose %15, [1, 0] : vector<8x8xf32> -> vector<8x8xf32>
    %cst_12 = arith.constant dense<0.000000e+00> : vector<8x8xf32>
    %18 = tpu.matmul %14, %17, %cst_12 {dimension_numbers = #tpu.dot_dimension_numbers<[1], [0], [0], [1], [0, 0, 1, 1], [], []>} : vector<8x8xf32>, vector<8x8xf32>, vector<8x8xf32> -> vector<8x8xf32>
    %cst_13 = arith.constant 0.353553385 : f32
    %19 = vector.broadcast %cst_13 : f32 to vector<8x8xf32>
    %20 = arith.mulf %18, %19 : vector<8x8xf32>
    %21 = arith.addf %20, %13 : vector<8x8xf32>
    %cst_14 = arith.constant dense<0xFF800000> : vector<8xf32>
    %22 = vector.multi_reduction <maximumf>, %21, %cst_14 [1] : vector<8x8xf32> to vector<8xf32>
    %23 = vector.shape_cast %22 : vector<8xf32> to vector<8x1xf32>
    %24 = vector.broadcast %23 : vector<8x1xf32> to vector<8x8xf32>
    %25 = arith.subf %21, %24 : vector<8x8xf32>
    %26 = math.exp %25 : vector<8x8xf32>
    %cst_15 = arith.constant dense<0.000000e+00> : vector<8xf32>
    %27 = vector.multi_reduction <add>, %26, %cst_15 [1] : vector<8x8xf32> to vector<8xf32>
    %28 = vector.shape_cast %27 : vector<8xf32> to vector<8x1xf32>
    %cst_16 = arith.constant dense<0.000000e+00> : vector<8x8xf32>
    %29 = tpu.matmul %26, %16, %cst_16 {dimension_numbers = #tpu.dot_dimension_numbers<[1], [0], [0], [1], [0, 0, 1, 1], [], []>} : vector<8x8xf32>, vector<8x8xf32>, vector<8x8xf32> -> vector<8x8xf32>
    %30 = tpu.reciprocal %28 {approx = true} : vector<8x1xf32> -> vector<8x1xf32>
    %31 = vector.broadcast %30 : vector<8x1xf32> to vector<8x8xf32>
    %32 = arith.mulf %29, %31 : vector<8x8xf32>
    %33 = vector.extract_strided_slice %9 {offsets = [0, 8], sizes = [8, 8], strides = [1, 1]} : vector<8x32xf32> to vector<8x8xf32>
    %34 = vector.extract_strided_slice %10 {offsets = [0, 8], sizes = [8, 8], strides = [1, 1]} : vector<8x32xf32> to vector<8x8xf32>
    %35 = vector.extract_strided_slice %11 {offsets = [0, 8], sizes = [8, 8], strides = [1, 1]} : vector<8x32xf32> to vector<8x8xf32>
    %36 = tpu.transpose %34, [1, 0] : vector<8x8xf32> -> vector<8x8xf32>
    %cst_17 = arith.constant dense<0.000000e+00> : vector<8x8xf32>
    %37 = tpu.matmul %33, %36, %cst_17 {dimension_numbers = #tpu.dot_dimension_numbers<[1], [0], [0], [1], [0, 0, 1, 1], [], []>} : vector<8x8xf32>, vector<8x8xf32>, vector<8x8xf32> -> vector<8x8xf32>
    %cst_18 = arith.constant 0.353553385 : f32
    %38 = vector.broadcast %cst_18 : f32 to vector<8x8xf32>
    %39 = arith.mulf %37, %38 : vector<8x8xf32>
    %40 = arith.addf %39, %13 : vector<8x8xf32>
    %cst_19 = arith.constant dense<0xFF800000> : vector<8xf32>
    %41 = vector.multi_reduction <maximumf>, %40, %cst_19 [1] : vector<8x8xf32> to vector<8xf32>
    %42 = vector.shape_cast %41 : vector<8xf32> to vector<8x1xf32>
    %43 = vector.broadcast %42 : vector<8x1xf32> to vector<8x8xf32>
    %44 = arith.subf %40, %43 : vector<8x8xf32>
    %45 = math.exp %44 : vector<8x8xf32>
    %cst_20 = arith.constant dense<0.000000e+00> : vector<8xf32>
    %46 = vector.multi_reduction <add>, %45, %cst_20 [1] : vector<8x8xf32> to vector<8xf32>
    %47 = vector.shape_cast %46 : vector<8xf32> to vector<8x1xf32>
    %cst_21 = arith.constant dense<0.000000e+00> : vector<8x8xf32>
    %48 = tpu.matmul %45, %35, %cst_21 {dimension_numbers = #tpu.dot_dimension_numbers<[1], [0], [0], [1], [0, 0, 1, 1], [], []>} : vector<8x8xf32>, vector<8x8xf32>, vector<8x8xf32> -> vector<8x8xf32>
    %49 = tpu.reciprocal %47 {approx = true} : vector<8x1xf32> -> vector<8x1xf32>
    %50 = vector.broadcast %49 : vector<8x1xf32> to vector<8x8xf32>
    %51 = arith.mulf %48, %50 : vector<8x8xf32>
    %52 = vector.extract_strided_slice %9 {offsets = [0, 16], sizes = [8, 8], strides = [1, 1]} : vector<8x32xf32> to vector<8x8xf32>
    %53 = vector.extract_strided_slice %10 {offsets = [0, 16], sizes = [8, 8], strides = [1, 1]} : vector<8x32xf32> to vector<8x8xf32>
    %54 = vector.extract_strided_slice %11 {offsets = [0, 16], sizes = [8, 8], strides = [1, 1]} : vector<8x32xf32> to vector<8x8xf32>
    %55 = tpu.transpose %53, [1, 0] : vector<8x8xf32> -> vector<8x8xf32>
    %cst_22 = arith.constant dense<0.000000e+00> : vector<8x8xf32>
    %56 = tpu.matmul %52, %55, %cst_22 {dimension_numbers = #tpu.dot_dimension_numbers<[1], [0], [0], [1], [0, 0, 1, 1], [], []>} : vector<8x8xf32>, vector<8x8xf32>, vector<8x8xf32> -> vector<8x8xf32>
    %cst_23 = arith.constant 0.353553385 : f32
    %57 = vector.broadcast %cst_23 : f32 to vector<8x8xf32>
    %58 = arith.mulf %56, %57 : vector<8x8xf32>
    %59 = arith.addf %58, %13 : vector<8x8xf32>
    %cst_24 = arith.constant dense<0xFF800000> : vector<8xf32>
    %60 = vector.multi_reduction <maximumf>, %59, %cst_24 [1] : vector<8x8xf32> to vector<8xf32>
    %61 = vector.shape_cast %60 : vector<8xf32> to vector<8x1xf32>
    %62 = vector.broadcast %61 : vector<8x1xf32> to vector<8x8xf32>
    %63 = arith.subf %59, %62 : vector<8x8xf32>
    %64 = math.exp %63 : vector<8x8xf32>
    %cst_25 = arith.constant dense<0.000000e+00> : vector<8xf32>
    %65 = vector.multi_reduction <add>, %64, %cst_25 [1] : vector<8x8xf32> to vector<8xf32>
    %66 = vector.shape_cast %65 : vector<8xf32> to vector<8x1xf32>
    %cst_26 = arith.constant dense<0.000000e+00> : vector<8x8xf32>
    %67 = tpu.matmul %64, %54, %cst_26 {dimension_numbers = #tpu.dot_dimension_numbers<[1], [0], [0], [1], [0, 0, 1, 1], [], []>} : vector<8x8xf32>, vector<8x8xf32>, vector<8x8xf32> -> vector<8x8xf32>
    %68 = tpu.reciprocal %66 {approx = true} : vector<8x1xf32> -> vector<8x1xf32>
    %69 = vector.broadcast %68 : vector<8x1xf32> to vector<8x8xf32>
    %70 = arith.mulf %67, %69 : vector<8x8xf32>
    %71 = vector.extract_strided_slice %9 {offsets = [0, 24], sizes = [8, 8], strides = [1, 1]} : vector<8x32xf32> to vector<8x8xf32>
    %72 = vector.extract_strided_slice %10 {offsets = [0, 24], sizes = [8, 8], strides = [1, 1]} : vector<8x32xf32> to vector<8x8xf32>
    %73 = vector.extract_strided_slice %11 {offsets = [0, 24], sizes = [8, 8], strides = [1, 1]} : vector<8x32xf32> to vector<8x8xf32>
    %74 = tpu.transpose %72, [1, 0] : vector<8x8xf32> -> vector<8x8xf32>
    %cst_27 = arith.constant dense<0.000000e+00> : vector<8x8xf32>
    %75 = tpu.matmul %71, %74, %cst_27 {dimension_numbers = #tpu.dot_dimension_numbers<[1], [0], [0], [1], [0, 0, 1, 1], [], []>} : vector<8x8xf32>, vector<8x8xf32>, vector<8x8xf32> -> vector<8x8xf32>
    %cst_28 = arith.constant 0.353553385 : f32
    %76 = vector.broadcast %cst_28 : f32 to vector<8x8xf32>
    %77 = arith.mulf %75, %76 : vector<8x8xf32>
    %78 = arith.addf %77, %13 : vector<8x8xf32>
    %cst_29 = arith.constant dense<0xFF800000> : vector<8xf32>
    %79 = vector.multi_reduction <maximumf>, %78, %cst_29 [1] : vector<8x8xf32> to vector<8xf32>
    %80 = vector.shape_cast %79 : vector<8xf32> to vector<8x1xf32>
    %81 = vector.broadcast %80 : vector<8x1xf32> to vector<8x8xf32>
    %82 = arith.subf %78, %81 : vector<8x8xf32>
    %83 = math.exp %82 : vector<8x8xf32>
    %cst_30 = arith.constant dense<0.000000e+00> : vector<8xf32>
    %84 = vector.multi_reduction <add>, %83, %cst_30 [1] : vector<8x8xf32> to vector<8xf32>
    %85 = vector.shape_cast %84 : vector<8xf32> to vector<8x1xf32>
    %cst_31 = arith.constant dense<0.000000e+00> : vector<8x8xf32>
    %86 = tpu.matmul %83, %73, %cst_31 {dimension_numbers = #tpu.dot_dimension_numbers<[1], [0], [0], [1], [0, 0, 1, 1], [], []>} : vector<8x8xf32>, vector<8x8xf32>, vector<8x8xf32> -> vector<8x8xf32>
    %87 = tpu.reciprocal %85 {approx = true} : vector<8x1xf32> -> vector<8x1xf32>
    %88 = vector.broadcast %87 : vector<8x1xf32> to vector<8x8xf32>
    %89 = arith.mulf %86, %88 : vector<8x8xf32>
    %90 = tpu.concatenate %32, %51, %70, %89 in 1 : vector<8x8xf32>, vector<8x8xf32>, vector<8x8xf32>, vector<8x8xf32> -> vector<8x32xf32>
    %c0_32 = arith.constant 0 : index
    %c0_33 = arith.constant 0 : index
    %91 = vector.load %arg7[%c0_32, %c0_33] : memref<32x32xf32, #tpu.memory_space<vmem>>, vector<32x32xf32>
    %cst_34 = arith.constant dense<0.000000e+00> : vector<8x32xf32>
    %92 = tpu.matmul %90, %91, %cst_34 {dimension_numbers = #tpu.dot_dimension_numbers<[1], [0], [0], [1], [0, 0, 1, 1], [], []>} : vector<8x32xf32>, vector<32x32xf32>, vector<8x32xf32> -> vector<8x32xf32>
    %c0_35 = arith.constant 0 : index
    %c0_36 = arith.constant 0 : index
    %93 = vector.load %arg8[%c0_35, %c0_36] : memref<1x32xf32, #tpu.memory_space<vmem>>, vector<1x32xf32>
    %94 = vector.broadcast %93 : vector<1x32xf32> to vector<8x32xf32>
    %95 = arith.addf %92, %94 : vector<8x32xf32>
    %96 = arith.addf %1, %95 : vector<8x32xf32>
    %c0_37 = arith.constant 0 : index
    %c0_38 = arith.constant 0 : index
    %97 = vector.load %arg9[%c0_37, %c0_38] : memref<1x32xf32, #tpu.memory_space<vmem>>, vector<1x32xf32>
    %c0_39 = arith.constant 0 : index
    %c0_40 = arith.constant 0 : index
    %98 = vector.load %arg10[%c0_39, %c0_40] : memref<1x32xf32, #tpu.memory_space<vmem>>, vector<1x32xf32>
    %cst_41 = arith.constant dense<0.000000e+00> : vector<8xf32>
    %99 = vector.multi_reduction <add>, %96, %cst_41 [1] : vector<8x32xf32> to vector<8xf32>
    %100 = vector.shape_cast %99 : vector<8xf32> to vector<8x1xf32>
    %cst_42 = arith.constant 3.200000e+01 : f32
    %101 = vector.broadcast %cst_42 : f32 to vector<8x1xf32>
    %102 = arith.divf %100, %101 : vector<8x1xf32>
    %103 = vector.broadcast %102 : vector<8x1xf32> to vector<8x32xf32>
    %104 = arith.subf %96, %103 : vector<8x32xf32>
    %105 = arith.mulf %104, %104 : vector<8x32xf32>
    %cst_43 = arith.constant dense<0.000000e+00> : vector<8xf32>
    %106 = vector.multi_reduction <add>, %105, %cst_43 [1] : vector<8x32xf32> to vector<8xf32>
    %107 = vector.shape_cast %106 : vector<8xf32> to vector<8x1xf32>
    %cst_44 = arith.constant 3.200000e+01 : f32
    %108 = vector.broadcast %cst_44 : f32 to vector<8x1xf32>
    %109 = arith.divf %107, %108 : vector<8x1xf32>
    %cst_45 = arith.constant 9.99999974E-6 : f32
    %110 = vector.broadcast %cst_45 : f32 to vector<8x1xf32>
    %111 = arith.addf %109, %110 : vector<8x1xf32>
    %112 = math.rsqrt %111 : vector<8x1xf32>
    %113 = vector.broadcast %112 : vector<8x1xf32> to vector<8x32xf32>
    %114 = arith.mulf %104, %113 : vector<8x32xf32>
    %115 = vector.broadcast %97 : vector<1x32xf32> to vector<8x32xf32>
    %116 = arith.mulf %114, %115 : vector<8x32xf32>
    %117 = vector.broadcast %98 : vector<1x32xf32> to vector<8x32xf32>
    %118 = arith.addf %116, %117 : vector<8x32xf32>
    %c0_46 = arith.constant 0 : index
    %c0_47 = arith.constant 0 : index
    %119 = vector.load %arg11[%c0_46, %c0_47] : memref<32x32xf32, #tpu.memory_space<vmem>>, vector<32x32xf32>
    %cst_48 = arith.constant dense<0.000000e+00> : vector<8x32xf32>
    %120 = tpu.matmul %118, %119, %cst_48 {dimension_numbers = #tpu.dot_dimension_numbers<[1], [0], [0], [1], [0, 0, 1, 1], [], []>} : vector<8x32xf32>, vector<32x32xf32>, vector<8x32xf32> -> vector<8x32xf32>
    %c0_49 = arith.constant 0 : index
    %c0_50 = arith.constant 0 : index
    %121 = vector.load %arg12[%c0_49, %c0_50] : memref<1x32xf32, #tpu.memory_space<vmem>>, vector<1x32xf32>
    %122 = vector.broadcast %121 : vector<1x32xf32> to vector<8x32xf32>
    %123 = arith.addf %120, %122 : vector<8x32xf32>
    %c0_51 = arith.constant 0 : index
    %c0_52 = arith.constant 0 : index
    %124 = vector.load %arg13[%c0_51, %c0_52] : memref<32x64xf32, #tpu.memory_space<vmem>>, vector<32x64xf32>
    %cst_53 = arith.constant dense<0.000000e+00> : vector<8x64xf32>
    %125 = tpu.matmul %3, %124, %cst_53 {dimension_numbers = #tpu.dot_dimension_numbers<[1], [0], [0], [1], [0, 0, 1, 1], [], []>} : vector<8x32xf32>, vector<32x64xf32>, vector<8x64xf32> -> vector<8x64xf32>
    %c0_54 = arith.constant 0 : index
    %c0_55 = arith.constant 0 : index
    %126 = vector.load %arg14[%c0_54, %c0_55] : memref<1x64xf32, #tpu.memory_space<vmem>>, vector<1x64xf32>
    %127 = vector.broadcast %126 : vector<1x64xf32> to vector<8x64xf32>
    %128 = arith.addf %125, %127 : vector<8x64xf32>
    %129 = vector.extract_strided_slice %128 {offsets = [0, 0], sizes = [8, 32], strides = [1, 1]} : vector<8x64xf32> to vector<8x32xf32>
    %130 = vector.extract_strided_slice %128 {offsets = [0, 32], sizes = [8, 32], strides = [1, 1]} : vector<8x64xf32> to vector<8x32xf32>
    %c0_56 = arith.constant 0 : index
    %c0_57 = arith.constant 0 : index
    %c0_58 = arith.constant 0 : index
    %131 = vector.load %arg4[%c0_56, %c0_57, %c0_58] : memref<1x1x8xf32, #tpu.memory_space<vmem>>, vector<1x1x8xf32>
    %132 = vector.shape_cast %131 : vector<1x1x8xf32> to vector<1x8xf32>
    %133 = vector.extract_strided_slice %123 {offsets = [0, 0], sizes = [8, 8], strides = [1, 1]} : vector<8x32xf32> to vector<8x8xf32>
    %134 = vector.extract_strided_slice %129 {offsets = [0, 0], sizes = [8, 8], strides = [1, 1]} : vector<8x32xf32> to vector<8x8xf32>
    %135 = vector.extract_strided_slice %130 {offsets = [0, 0], sizes = [8, 8], strides = [1, 1]} : vector<8x32xf32> to vector<8x8xf32>
    %136 = tpu.transpose %134, [1, 0] : vector<8x8xf32> -> vector<8x8xf32>
    %cst_59 = arith.constant dense<0.000000e+00> : vector<8x8xf32>
    %137 = tpu.matmul %133, %136, %cst_59 {dimension_numbers = #tpu.dot_dimension_numbers<[1], [0], [0], [1], [0, 0, 1, 1], [], []>} : vector<8x8xf32>, vector<8x8xf32>, vector<8x8xf32> -> vector<8x8xf32>
    %cst_60 = arith.constant 0.353553385 : f32
    %138 = vector.broadcast %cst_60 : f32 to vector<8x8xf32>
    %139 = arith.mulf %137, %138 : vector<8x8xf32>
    %140 = vector.broadcast %132 : vector<1x8xf32> to vector<8x8xf32>
    %141 = arith.addf %139, %140 : vector<8x8xf32>
    %cst_61 = arith.constant dense<0xFF800000> : vector<8xf32>
    %142 = vector.multi_reduction <maximumf>, %141, %cst_61 [1] : vector<8x8xf32> to vector<8xf32>
    %143 = vector.shape_cast %142 : vector<8xf32> to vector<8x1xf32>
    %144 = vector.broadcast %143 : vector<8x1xf32> to vector<8x8xf32>
    %145 = arith.subf %141, %144 : vector<8x8xf32>
    %146 = math.exp %145 : vector<8x8xf32>
    %cst_62 = arith.constant dense<0.000000e+00> : vector<8xf32>
    %147 = vector.multi_reduction <add>, %146, %cst_62 [1] : vector<8x8xf32> to vector<8xf32>
    %148 = vector.shape_cast %147 : vector<8xf32> to vector<8x1xf32>
    %cst_63 = arith.constant dense<0.000000e+00> : vector<8x8xf32>
    %149 = tpu.matmul %146, %135, %cst_63 {dimension_numbers = #tpu.dot_dimension_numbers<[1], [0], [0], [1], [0, 0, 1, 1], [], []>} : vector<8x8xf32>, vector<8x8xf32>, vector<8x8xf32> -> vector<8x8xf32>
    %150 = tpu.reciprocal %148 {approx = true} : vector<8x1xf32> -> vector<8x1xf32>
    %151 = vector.broadcast %150 : vector<8x1xf32> to vector<8x8xf32>
    %152 = arith.mulf %149, %151 : vector<8x8xf32>
    %153 = vector.extract_strided_slice %123 {offsets = [0, 8], sizes = [8, 8], strides = [1, 1]} : vector<8x32xf32> to vector<8x8xf32>
    %154 = vector.extract_strided_slice %129 {offsets = [0, 8], sizes = [8, 8], strides = [1, 1]} : vector<8x32xf32> to vector<8x8xf32>
    %155 = vector.extract_strided_slice %130 {offsets = [0, 8], sizes = [8, 8], strides = [1, 1]} : vector<8x32xf32> to vector<8x8xf32>
    %156 = tpu.transpose %154, [1, 0] : vector<8x8xf32> -> vector<8x8xf32>
    %cst_64 = arith.constant dense<0.000000e+00> : vector<8x8xf32>
    %157 = tpu.matmul %153, %156, %cst_64 {dimension_numbers = #tpu.dot_dimension_numbers<[1], [0], [0], [1], [0, 0, 1, 1], [], []>} : vector<8x8xf32>, vector<8x8xf32>, vector<8x8xf32> -> vector<8x8xf32>
    %cst_65 = arith.constant 0.353553385 : f32
    %158 = vector.broadcast %cst_65 : f32 to vector<8x8xf32>
    %159 = arith.mulf %157, %158 : vector<8x8xf32>
    %160 = vector.broadcast %132 : vector<1x8xf32> to vector<8x8xf32>
    %161 = arith.addf %159, %160 : vector<8x8xf32>
    %cst_66 = arith.constant dense<0xFF800000> : vector<8xf32>
    %162 = vector.multi_reduction <maximumf>, %161, %cst_66 [1] : vector<8x8xf32> to vector<8xf32>
    %163 = vector.shape_cast %162 : vector<8xf32> to vector<8x1xf32>
    %164 = vector.broadcast %163 : vector<8x1xf32> to vector<8x8xf32>
    %165 = arith.subf %161, %164 : vector<8x8xf32>
    %166 = math.exp %165 : vector<8x8xf32>
    %cst_67 = arith.constant dense<0.000000e+00> : vector<8xf32>
    %167 = vector.multi_reduction <add>, %166, %cst_67 [1] : vector<8x8xf32> to vector<8xf32>
    %168 = vector.shape_cast %167 : vector<8xf32> to vector<8x1xf32>
    %cst_68 = arith.constant dense<0.000000e+00> : vector<8x8xf32>
    %169 = tpu.matmul %166, %155, %cst_68 {dimension_numbers = #tpu.dot_dimension_numbers<[1], [0], [0], [1], [0, 0, 1, 1], [], []>} : vector<8x8xf32>, vector<8x8xf32>, vector<8x8xf32> -> vector<8x8xf32>
    %170 = tpu.reciprocal %168 {approx = true} : vector<8x1xf32> -> vector<8x1xf32>
    %171 = vector.broadcast %170 : vector<8x1xf32> to vector<8x8xf32>
    %172 = arith.mulf %169, %171 : vector<8x8xf32>
    %173 = vector.extract_strided_slice %123 {offsets = [0, 16], sizes = [8, 8], strides = [1, 1]} : vector<8x32xf32> to vector<8x8xf32>
    %174 = vector.extract_strided_slice %129 {offsets = [0, 16], sizes = [8, 8], strides = [1, 1]} : vector<8x32xf32> to vector<8x8xf32>
    %175 = vector.extract_strided_slice %130 {offsets = [0, 16], sizes = [8, 8], strides = [1, 1]} : vector<8x32xf32> to vector<8x8xf32>
    %176 = tpu.transpose %174, [1, 0] : vector<8x8xf32> -> vector<8x8xf32>
    %cst_69 = arith.constant dense<0.000000e+00> : vector<8x8xf32>
    %177 = tpu.matmul %173, %176, %cst_69 {dimension_numbers = #tpu.dot_dimension_numbers<[1], [0], [0], [1], [0, 0, 1, 1], [], []>} : vector<8x8xf32>, vector<8x8xf32>, vector<8x8xf32> -> vector<8x8xf32>
    %cst_70 = arith.constant 0.353553385 : f32
    %178 = vector.broadcast %cst_70 : f32 to vector<8x8xf32>
    %179 = arith.mulf %177, %178 : vector<8x8xf32>
    %180 = vector.broadcast %132 : vector<1x8xf32> to vector<8x8xf32>
    %181 = arith.addf %179, %180 : vector<8x8xf32>
    %cst_71 = arith.constant dense<0xFF800000> : vector<8xf32>
    %182 = vector.multi_reduction <maximumf>, %181, %cst_71 [1] : vector<8x8xf32> to vector<8xf32>
    %183 = vector.shape_cast %182 : vector<8xf32> to vector<8x1xf32>
    %184 = vector.broadcast %183 : vector<8x1xf32> to vector<8x8xf32>
    %185 = arith.subf %181, %184 : vector<8x8xf32>
    %186 = math.exp %185 : vector<8x8xf32>
    %cst_72 = arith.constant dense<0.000000e+00> : vector<8xf32>
    %187 = vector.multi_reduction <add>, %186, %cst_72 [1] : vector<8x8xf32> to vector<8xf32>
    %188 = vector.shape_cast %187 : vector<8xf32> to vector<8x1xf32>
    %cst_73 = arith.constant dense<0.000000e+00> : vector<8x8xf32>
    %189 = tpu.matmul %186, %175, %cst_73 {dimension_numbers = #tpu.dot_dimension_numbers<[1], [0], [0], [1], [0, 0, 1, 1], [], []>} : vector<8x8xf32>, vector<8x8xf32>, vector<8x8xf32> -> vector<8x8xf32>
    %190 = tpu.reciprocal %188 {approx = true} : vector<8x1xf32> -> vector<8x1xf32>
    %191 = vector.broadcast %190 : vector<8x1xf32> to vector<8x8xf32>
    %192 = arith.mulf %189, %191 : vector<8x8xf32>
    %193 = vector.extract_strided_slice %123 {offsets = [0, 24], sizes = [8, 8], strides = [1, 1]} : vector<8x32xf32> to vector<8x8xf32>
    %194 = vector.extract_strided_slice %129 {offsets = [0, 24], sizes = [8, 8], strides = [1, 1]} : vector<8x32xf32> to vector<8x8xf32>
    %195 = vector.extract_strided_slice %130 {offsets = [0, 24], sizes = [8, 8], strides = [1, 1]} : vector<8x32xf32> to vector<8x8xf32>
    %196 = tpu.transpose %194, [1, 0] : vector<8x8xf32> -> vector<8x8xf32>
    %cst_74 = arith.constant dense<0.000000e+00> : vector<8x8xf32>
    %197 = tpu.matmul %193, %196, %cst_74 {dimension_numbers = #tpu.dot_dimension_numbers<[1], [0], [0], [1], [0, 0, 1, 1], [], []>} : vector<8x8xf32>, vector<8x8xf32>, vector<8x8xf32> -> vector<8x8xf32>
    %cst_75 = arith.constant 0.353553385 : f32
    %198 = vector.broadcast %cst_75 : f32 to vector<8x8xf32>
    %199 = arith.mulf %197, %198 : vector<8x8xf32>
    %200 = vector.broadcast %132 : vector<1x8xf32> to vector<8x8xf32>
    %201 = arith.addf %199, %200 : vector<8x8xf32>
    %cst_76 = arith.constant dense<0xFF800000> : vector<8xf32>
    %202 = vector.multi_reduction <maximumf>, %201, %cst_76 [1] : vector<8x8xf32> to vector<8xf32>
    %203 = vector.shape_cast %202 : vector<8xf32> to vector<8x1xf32>
    %204 = vector.broadcast %203 : vector<8x1xf32> to vector<8x8xf32>
    %205 = arith.subf %201, %204 : vector<8x8xf32>
    %206 = math.exp %205 : vector<8x8xf32>
    %cst_77 = arith.constant dense<0.000000e+00> : vector<8xf32>
    %207 = vector.multi_reduction <add>, %206, %cst_77 [1] : vector<8x8xf32> to vector<8xf32>
    %208 = vector.shape_cast %207 : vector<8xf32> to vector<8x1xf32>
    %cst_78 = arith.constant dense<0.000000e+00> : vector<8x8xf32>
    %209 = tpu.matmul %206, %195, %cst_78 {dimension_numbers = #tpu.dot_dimension_numbers<[1], [0], [0], [1], [0, 0, 1, 1], [], []>} : vector<8x8xf32>, vector<8x8xf32>, vector<8x8xf32> -> vector<8x8xf32>
    %210 = tpu.reciprocal %208 {approx = true} : vector<8x1xf32> -> vector<8x1xf32>
    %211 = vector.broadcast %210 : vector<8x1xf32> to vector<8x8xf32>
    %212 = arith.mulf %209, %211 : vector<8x8xf32>
    %213 = tpu.concatenate %152, %172, %192, %212 in 1 : vector<8x8xf32>, vector<8x8xf32>, vector<8x8xf32>, vector<8x8xf32> -> vector<8x32xf32>
    %c0_79 = arith.constant 0 : index
    %c0_80 = arith.constant 0 : index
    %214 = vector.load %arg15[%c0_79, %c0_80] : memref<32x32xf32, #tpu.memory_space<vmem>>, vector<32x32xf32>
    %cst_81 = arith.constant dense<0.000000e+00> : vector<8x32xf32>
    %215 = tpu.matmul %213, %214, %cst_81 {dimension_numbers = #tpu.dot_dimension_numbers<[1], [0], [0], [1], [0, 0, 1, 1], [], []>} : vector<8x32xf32>, vector<32x32xf32>, vector<8x32xf32> -> vector<8x32xf32>
    %c0_82 = arith.constant 0 : index
    %c0_83 = arith.constant 0 : index
    %216 = vector.load %arg16[%c0_82, %c0_83] : memref<1x32xf32, #tpu.memory_space<vmem>>, vector<1x32xf32>
    %217 = vector.broadcast %216 : vector<1x32xf32> to vector<8x32xf32>
    %218 = arith.addf %215, %217 : vector<8x32xf32>
    %219 = arith.addf %118, %218 : vector<8x32xf32>
    %c0_84 = arith.constant 0 : index
    %c0_85 = arith.constant 0 : index
    %220 = vector.load %arg17[%c0_84, %c0_85] : memref<1x32xf32, #tpu.memory_space<vmem>>, vector<1x32xf32>
    %c0_86 = arith.constant 0 : index
    %c0_87 = arith.constant 0 : index
    %221 = vector.load %arg18[%c0_86, %c0_87] : memref<1x32xf32, #tpu.memory_space<vmem>>, vector<1x32xf32>
    %cst_88 = arith.constant dense<0.000000e+00> : vector<8xf32>
    %222 = vector.multi_reduction <add>, %219, %cst_88 [1] : vector<8x32xf32> to vector<8xf32>
    %223 = vector.shape_cast %222 : vector<8xf32> to vector<8x1xf32>
    %cst_89 = arith.constant 3.200000e+01 : f32
    %224 = vector.broadcast %cst_89 : f32 to vector<8x1xf32>
    %225 = arith.divf %223, %224 : vector<8x1xf32>
    %226 = vector.broadcast %225 : vector<8x1xf32> to vector<8x32xf32>
    %227 = arith.subf %219, %226 : vector<8x32xf32>
    %228 = arith.mulf %227, %227 : vector<8x32xf32>
    %cst_90 = arith.constant dense<0.000000e+00> : vector<8xf32>
    %229 = vector.multi_reduction <add>, %228, %cst_90 [1] : vector<8x32xf32> to vector<8xf32>
    %230 = vector.shape_cast %229 : vector<8xf32> to vector<8x1xf32>
    %cst_91 = arith.constant 3.200000e+01 : f32
    %231 = vector.broadcast %cst_91 : f32 to vector<8x1xf32>
    %232 = arith.divf %230, %231 : vector<8x1xf32>
    %cst_92 = arith.constant 9.99999974E-6 : f32
    %233 = vector.broadcast %cst_92 : f32 to vector<8x1xf32>
    %234 = arith.addf %232, %233 : vector<8x1xf32>
    %235 = math.rsqrt %234 : vector<8x1xf32>
    %236 = vector.broadcast %235 : vector<8x1xf32> to vector<8x32xf32>
    %237 = arith.mulf %227, %236 : vector<8x32xf32>
    %238 = vector.broadcast %220 : vector<1x32xf32> to vector<8x32xf32>
    %239 = arith.mulf %237, %238 : vector<8x32xf32>
    %240 = vector.broadcast %221 : vector<1x32xf32> to vector<8x32xf32>
    %241 = arith.addf %239, %240 : vector<8x32xf32>
    %c0_93 = arith.constant 0 : index
    %c0_94 = arith.constant 0 : index
    %242 = vector.load %arg19[%c0_93, %c0_94] : memref<32x64xf32, #tpu.memory_space<vmem>>, vector<32x64xf32>
    %cst_95 = arith.constant dense<0.000000e+00> : vector<8x64xf32>
    %243 = tpu.matmul %241, %242, %cst_95 {dimension_numbers = #tpu.dot_dimension_numbers<[1], [0], [0], [1], [0, 0, 1, 1], [], []>} : vector<8x32xf32>, vector<32x64xf32>, vector<8x64xf32> -> vector<8x64xf32>
    %c0_96 = arith.constant 0 : index
    %c0_97 = arith.constant 0 : index
    %244 = vector.load %arg20[%c0_96, %c0_97] : memref<1x64xf32, #tpu.memory_space<vmem>>, vector<1x64xf32>
    %245 = vector.broadcast %244 : vector<1x64xf32> to vector<8x64xf32>
    %246 = arith.addf %243, %245 : vector<8x64xf32>
    %cst_98 = arith.constant 0.000000e+00 : f32
    %247 = vector.broadcast %cst_98 : f32 to vector<8x64xf32>
    %248 = arith.maximumf %246, %247 : vector<8x64xf32>
    %c0_99 = arith.constant 0 : index
    %c0_100 = arith.constant 0 : index
    %249 = vector.load %arg21[%c0_99, %c0_100] : memref<64x32xf32, #tpu.memory_space<vmem>>, vector<64x32xf32>
    %cst_101 = arith.constant dense<0.000000e+00> : vector<8x32xf32>
    %250 = tpu.matmul %248, %249, %cst_101 {dimension_numbers = #tpu.dot_dimension_numbers<[1], [0], [0], [1], [0, 0, 1, 1], [], []>} : vector<8x64xf32>, vector<64x32xf32>, vector<8x32xf32> -> vector<8x32xf32>
    %c0_102 = arith.constant 0 : index
    %c0_103 = arith.constant 0 : index
    %251 = vector.load %arg22[%c0_102, %c0_103] : memref<1x32xf32, #tpu.memory_space<vmem>>, vector<1x32xf32>
    %252 = vector.broadcast %251 : vector<1x32xf32> to vector<8x32xf32>
    %253 = arith.addf %250, %252 : vector<8x32xf32>
    %254 = arith.addf %241, %253 : vector<8x32xf32>
    %c0_104 = arith.constant 0 : index
    %c0_105 = arith.constant 0 : index
    %255 = vector.load %arg23[%c0_104, %c0_105] : memref<1x32xf32, #tpu.memory_space<vmem>>, vector<1x32xf32>
    %c0_106 = arith.constant 0 : index
    %c0_107 = arith.constant 0 : index
    %256 = vector.load %arg24[%c0_106, %c0_107] : memref<1x32xf32, #tpu.memory_space<vmem>>, vector<1x32xf32>
    %cst_108 = arith.constant dense<0.000000e+00> : vector<8xf32>
    %257 = vector.multi_reduction <add>, %254, %cst_108 [1] : vector<8x32xf32> to vector<8xf32>
    %258 = vector.shape_cast %257 : vector<8xf32> to vector<8x1xf32>
    %cst_109 = arith.constant 3.200000e+01 : f32
    %259 = vector.broadcast %cst_109 : f32 to vector<8x1xf32>
    %260 = arith.divf %258, %259 : vector<8x1xf32>
    %261 = vector.broadcast %260 : vector<8x1xf32> to vector<8x32xf32>
    %262 = arith.subf %254, %261 : vector<8x32xf32>
    %263 = arith.mulf %262, %262 : vector<8x32xf32>
    %cst_110 = arith.constant dense<0.000000e+00> : vector<8xf32>
    %264 = vector.multi_reduction <add>, %263, %cst_110 [1] : vector<8x32xf32> to vector<8xf32>
    %265 = vector.shape_cast %264 : vector<8xf32> to vector<8x1xf32>
    %cst_111 = arith.constant 3.200000e+01 : f32
    %266 = vector.broadcast %cst_111 : f32 to vector<8x1xf32>
    %267 = arith.divf %265, %266 : vector<8x1xf32>
    %cst_112 = arith.constant 9.99999974E-6 : f32
    %268 = vector.broadcast %cst_112 : f32 to vector<8x1xf32>
    %269 = arith.addf %267, %268 : vector<8x1xf32>
    %270 = math.rsqrt %269 : vector<8x1xf32>
    %271 = vector.broadcast %270 : vector<8x1xf32> to vector<8x32xf32>
    %272 = arith.mulf %262, %271 : vector<8x32xf32>
    %273 = vector.broadcast %255 : vector<1x32xf32> to vector<8x32xf32>
    %274 = arith.mulf %272, %273 : vector<8x32xf32>
    %275 = vector.broadcast %256 : vector<1x32xf32> to vector<8x32xf32>
    %276 = arith.addf %274, %275 : vector<8x32xf32>
    %c0_113 = arith.constant 0 : index
    %c0_114 = arith.constant 0 : index
    %c0_115 = arith.constant 0 : index
    %277 = vector.load %arg25[%c0_113, %c0_114, %c0_115] : memref<1x8x32xf32, #tpu.memory_space<vmem>>, vector<1x8x32xf32>
    %278 = vector.shape_cast %277 : vector<1x8x32xf32> to vector<8x32xf32>
    %279 = vector.shape_cast %276 : vector<8x32xf32> to vector<1x8x32xf32>
    tpu.vector_store %arg25[%c0_113, %c0_114, %c0_115], %279 {strides = array<i32>} : memref<1x8x32xf32, #tpu.memory_space<vmem>>, vector<1x8x32xf32>,
    return
  }
  func.func @transform_0(%arg0: i32) -> (i32, i32, i32) {
    %c0_i32 = arith.constant 0 : i32
    %c0_i32_0 = arith.constant 0 : i32
    %c0_i32_1 = arith.constant 0 : i32
    return %arg0, %c0_i32, %c0_i32_0 : i32, i32, i32
  }
  func.func @transform_1(%arg0: i32) -> (i32, i32, i32) {
    %c0_i32 = arith.constant 0 : i32
    %c0_i32_0 = arith.constant 0 : i32
    %c0_i32_1 = arith.constant 0 : i32
    return %arg0, %c0_i32, %c0_i32_0 : i32, i32, i32
  }
  func.func @transform_2(%arg0: i32) -> (i32, i32, i32) {
    %c0_i32 = arith.constant 0 : i32
    %c0_i32_0 = arith.constant 0 : i32
    %c0_i32_1 = arith.constant 0 : i32
    return %arg0, %c0_i32, %c0_i32_0 : i32, i32, i32
  }
  func.func @transform_3(%arg0: i32) -> (i32, i32, i32) {
    %c0_i32 = arith.constant 0 : i32
    %c0_i32_0 = arith.constant 0 : i32
    %c0_i32_1 = arith.constant 0 : i32
    return %arg0, %c0_i32, %c0_i32_0 : i32, i32, i32
  }
  func.func @transform_4(%arg0: i32) -> (i32, i32) {
    %c0_i32 = arith.constant 0 : i32
    %c0_i32_0 = arith.constant 0 : i32
    %c0_i32_1 = arith.constant 0 : i32
    return %c0_i32, %c0_i32_0 : i32, i32
  }
  func.func @transform_5(%arg0: i32) -> (i32, i32) {
    %c0_i32 = arith.constant 0 : i32
    %c0_i32_0 = arith.constant 0 : i32
    %c0_i32_1 = arith.constant 0 : i32
    return %c0_i32, %c0_i32_0 : i32, i32
  }
  func.func @transform_6(%arg0: i32) -> (i32, i32) {
    %c0_i32 = arith.constant 0 : i32
    %c0_i32_0 = arith.constant 0 : i32
    %c0_i32_1 = arith.constant 0 : i32
    return %c0_i32, %c0_i32_0 : i32, i32
  }
  func.func @transform_7(%arg0: i32) -> (i32, i32) {
    %c0_i32 = arith.constant 0 : i32
    %c0_i32_0 = arith.constant 0 : i32
    %c0_i32_1 = arith.constant 0 : i32
    return %c0_i32, %c0_i32_0 : i32, i32
  }
  func.func @transform_8(%arg0: i32) -> (i32, i32) {
    %c0_i32 = arith.constant 0 : i32
    %c0_i32_0 = arith.constant 0 : i32
    %c0_i32_1 = arith.constant 0 : i32
    return %c0_i32, %c0_i32_0 : i32, i32
  }
  func.func @transform_9(%arg0: i32) -> (i32, i32) {
    %c0_i32 = arith.constant 0 : i32
    %c0_i32_0 = arith.constant 0 : i32
    %c0_i32_1 = arith.constant 0 : i32
    return %c0_i32, %c0_i32_0 : i32, i32
  }
  func.func @transform_10(%arg0: i32) -> (i32, i32) {
    %c0_i32 = arith.constant 0 : i32
    %c0_i32_0 = arith.constant 0 : i32
    %c0_i32_1 = arith.constant 0 : i32
    return %c0_i32, %c0_i32_0 : i32, i32
  }
  func.func @transform_11(%arg0: i32) -> (i32, i32) {
    %c0_i32 = arith.constant 0 : i32
    %c0_i32_0 = arith.constant 0 : i32
    %c0_i32_1 = arith.constant 0 : i32
    return %c0_i32, %c0_i32_0 : i32, i32
  }
  func.func @transform_12(%arg0: i32) -> (i32, i32) {
    %c0_i32 = arith.constant 0 : i32
    %c0_i32_0 = arith.constant 0 : i32
    %c0_i32_1 = arith.constant 0 : i32
    return %c0_i32, %c0_i32_0 : i32, i32
  }
  func.func @transform_13(%arg0: i32) -> (i32, i32) {
    %c0_i32 = arith.constant 0 : i32
    %c0_i32_0 = arith.constant 0 : i32
    %c0_i32_1 = arith.constant 0 : i32
    return %c0_i32, %c0_i32_0 : i32, i32
  }
  func.func @transform_14(%arg0: i32) -> (i32, i32) {
    %c0_i32 = arith.constant 0 : i32
    %c0_i32_0 = arith.constant 0 : i32
    %c0_i32_1 = arith.constant 0 : i32
    return %c0_i32, %c0_i32_0 : i32, i32
  }
  func.func @transform_15(%arg0: i32) -> (i32, i32) {
    %c0_i32 = arith.constant 0 : i32
    %c0_i32_0 = arith.constant 0 : i32
    %c0_i32_1 = arith.constant 0 : i32
    return %c0_i32, %c0_i32_0 : i32, i32
  }
  func.func @transform_16(%arg0: i32) -> (i32, i32) {
    %c0_i32 = arith.constant 0 : i32
    %c0_i32_0 = arith.constant 0 : i32
    %c0_i32_1 = arith.constant 0 : i32
    return %c0_i32, %c0_i32_0 : i32, i32
  }
  func.func @transform_17(%arg0: i32) -> (i32, i32) {
    %c0_i32 = arith.constant 0 : i32
    %c0_i32_0 = arith.constant 0 : i32
    %c0_i32_1 = arith.constant 0 : i32
    return %c0_i32, %c0_i32_0 : i32, i32
  }
  func.func @transform_18(%arg0: i32) -> (i32, i32) {
    %c0_i32 = arith.constant 0 : i32
    %c0_i32_0 = arith.constant 0 : i32
    %c0_i32_1 = arith.constant 0 : i32
    return %c0_i32, %c0_i32_0 : i32, i32
  }
  func.func @transform_19(%arg0: i32) -> (i32, i32) {
    %c0_i32 = arith.constant 0 : i32
    %c0_i32_0 = arith.constant 0 : i32
    %c0_i32_1 = arith.constant 0 : i32
    return %c0_i32, %c0_i32_0 : i32, i32
  }
  func.func @transform_20(%arg0: i32) -> (i32, i32) {
    %c0_i32 = arith.constant 0 : i32
    %c0_i32_0 = arith.constant 0 : i32
    %c0_i32_1 = arith.constant 0 : i32
    return %c0_i32, %c0_i32_0 : i32, i32
  }
  func.func @transform_21(%arg0: i32) -> (i32, i32) {
    %c0_i32 = arith.constant 0 : i32
    %c0_i32_0 = arith.constant 0 : i32
    %c0_i32_1 = arith.constant 0 : i32
    return %c0_i32, %c0_i32_0 : i32, i32
  }
  func.func @transform_22(%arg0: i32) -> (i32, i32) {
    %c0_i32 = arith.constant 0 : i32
    %c0_i32_0 = arith.constant 0 : i32
    %c0_i32_1 = arith.constant 0 : i32
    return %c0_i32, %c0_i32_0 : i32, i32
  }
  func.func @transform_23(%arg0: i32) -> (i32, i32) {
    %c0_i32 = arith.constant 0 : i32
    %c0_i32_0 = arith.constant 0 : i32
    %c0_i32_1 = arith.constant 0 : i32
    return %c0_i32, %c0_i32_0 : i32, i32
  }
  func.func @transform_24(%arg0: i32) -> (i32, i32, i32) {
    %c0_i32 = arith.constant 0 : i32
    %c0_i32_0 = arith.constant 0 : i32
    %c0_i32_1 = arith.constant 0 : i32
    return %arg0, %c0_i32, %c0_i32_0 : i32, i32, i32
  }
}

module attributes {stable_mosaic.version = 11 : i64} {
  func.func @_norm_heads_kernel(%arg0: i32, %arg1: memref<16x32xf32, #tpu.memory_space<vmem>>, %arg2: memref<1x32xf32, #tpu.memory_space<vmem>>, %arg3: memref<1x32xf32, #tpu.memory_space<vmem>>, %arg4: memref<32x16xf32, #tpu.memory_space<vmem>>, %arg5: memref<1x16xf32, #tpu.memory_space<vmem>>, %arg6: memref<16x16xf32, #tpu.memory_space<vmem>>) attributes {dimension_semantics = [#tpu.dimension_semantics<parallel>], iteration_bounds = array<i64: 1>, scalar_prefetch = 0 : i64, scratch_operands = 0 : i64, tpu.core_type = #tpu.core_type<tc>, window_params = [{transform_indices = @transform_0, window_bounds = array<i64: 16, 32>}, {pipeline_mode = #tpu.pipeline_mode<synchronous>, transform_indices = @transform_1, window_bounds = array<i64: 1, 32>}, {pipeline_mode = #tpu.pipeline_mode<synchronous>, transform_indices = @transform_2, window_bounds = array<i64: 1, 32>}, {pipeline_mode = #tpu.pipeline_mode<synchronous>, transform_indices = @transform_3, window_bounds = array<i64: 32, 16>}, {pipeline_mode = #tpu.pipeline_mode<synchronous>, transform_indices = @transform_4, window_bounds = array<i64: 1, 16>}, {transform_indices = @transform_5, window_bounds = array<i64: 16, 16>}]} {
    %c0 = arith.constant 0 : index
    %c0_0 = arith.constant 0 : index
    %0 = vector.load %arg1[%c0, %c0_0] : memref<16x32xf32, #tpu.memory_space<vmem>>, vector<16x32xf32>
    %c0_1 = arith.constant 0 : index
    %c0_2 = arith.constant 0 : index
    %1 = vector.load %arg2[%c0_1, %c0_2] : memref<1x32xf32, #tpu.memory_space<vmem>>, vector<1x32xf32>
    %c0_3 = arith.constant 0 : index
    %c0_4 = arith.constant 0 : index
    %2 = vector.load %arg3[%c0_3, %c0_4] : memref<1x32xf32, #tpu.memory_space<vmem>>, vector<1x32xf32>
    %cst = arith.constant dense<0.000000e+00> : vector<16xf32>
    %3 = vector.multi_reduction <add>, %0, %cst [1] : vector<16x32xf32> to vector<16xf32>
    %4 = vector.shape_cast %3 : vector<16xf32> to vector<16x1xf32>
    %cst_5 = arith.constant 3.200000e+01 : f32
    %5 = vector.broadcast %cst_5 : f32 to vector<16x1xf32>
    %6 = arith.divf %4, %5 : vector<16x1xf32>
    %7 = vector.broadcast %6 : vector<16x1xf32> to vector<16x32xf32>
    %8 = arith.subf %0, %7 : vector<16x32xf32>
    %9 = arith.mulf %8, %8 : vector<16x32xf32>
    %cst_6 = arith.constant dense<0.000000e+00> : vector<16xf32>
    %10 = vector.multi_reduction <add>, %9, %cst_6 [1] : vector<16x32xf32> to vector<16xf32>
    %11 = vector.shape_cast %10 : vector<16xf32> to vector<16x1xf32>
    %cst_7 = arith.constant 3.200000e+01 : f32
    %12 = vector.broadcast %cst_7 : f32 to vector<16x1xf32>
    %13 = arith.divf %11, %12 : vector<16x1xf32>
    %cst_8 = arith.constant 9.99999974E-6 : f32
    %14 = vector.broadcast %cst_8 : f32 to vector<16x1xf32>
    %15 = arith.addf %13, %14 : vector<16x1xf32>
    %16 = math.rsqrt %15 : vector<16x1xf32>
    %17 = vector.broadcast %16 : vector<16x1xf32> to vector<16x32xf32>
    %18 = arith.mulf %8, %17 : vector<16x32xf32>
    %19 = vector.broadcast %1 : vector<1x32xf32> to vector<16x32xf32>
    %20 = arith.mulf %18, %19 : vector<16x32xf32>
    %21 = vector.broadcast %2 : vector<1x32xf32> to vector<16x32xf32>
    %22 = arith.addf %20, %21 : vector<16x32xf32>
    %c0_9 = arith.constant 0 : index
    %c0_10 = arith.constant 0 : index
    %23 = vector.load %arg4[%c0_9, %c0_10] : memref<32x16xf32, #tpu.memory_space<vmem>>, vector<32x16xf32>
    %cst_11 = arith.constant dense<0.000000e+00> : vector<16x16xf32>
    %24 = tpu.matmul %22, %23, %cst_11 {dimension_numbers = #tpu.dot_dimension_numbers<[1], [0], [0], [1], [0, 0, 1, 1], [], []>} : vector<16x32xf32>, vector<32x16xf32>, vector<16x16xf32> -> vector<16x16xf32>
    %c0_12 = arith.constant 0 : index
    %c0_13 = arith.constant 0 : index
    %25 = vector.load %arg5[%c0_12, %c0_13] : memref<1x16xf32, #tpu.memory_space<vmem>>, vector<1x16xf32>
    %26 = vector.broadcast %25 : vector<1x16xf32> to vector<16x16xf32>
    %27 = arith.addf %24, %26 : vector<16x16xf32>
    %c0_14 = arith.constant 0 : index
    %c0_15 = arith.constant 0 : index
    %28 = vector.load %arg6[%c0_14, %c0_15] : memref<16x16xf32, #tpu.memory_space<vmem>>, vector<16x16xf32>
    tpu.vector_store %arg6[%c0_14, %c0_15], %27 {strides = array<i32>} : memref<16x16xf32, #tpu.memory_space<vmem>>, vector<16x16xf32>,
    return
  }
  func.func @transform_0(%arg0: i32) -> (i32, i32) {
    %c0_i32 = arith.constant 0 : i32
    %c0_i32_0 = arith.constant 0 : i32
    return %arg0, %c0_i32 : i32, i32
  }
  func.func @transform_1(%arg0: i32) -> (i32, i32) {
    %c0_i32 = arith.constant 0 : i32
    %c0_i32_0 = arith.constant 0 : i32
    %c0_i32_1 = arith.constant 0 : i32
    return %c0_i32, %c0_i32_0 : i32, i32
  }
  func.func @transform_2(%arg0: i32) -> (i32, i32) {
    %c0_i32 = arith.constant 0 : i32
    %c0_i32_0 = arith.constant 0 : i32
    %c0_i32_1 = arith.constant 0 : i32
    return %c0_i32, %c0_i32_0 : i32, i32
  }
  func.func @transform_3(%arg0: i32) -> (i32, i32) {
    %c0_i32 = arith.constant 0 : i32
    %c0_i32_0 = arith.constant 0 : i32
    %c0_i32_1 = arith.constant 0 : i32
    return %c0_i32, %c0_i32_0 : i32, i32
  }
  func.func @transform_4(%arg0: i32) -> (i32, i32) {
    %c0_i32 = arith.constant 0 : i32
    %c0_i32_0 = arith.constant 0 : i32
    %c0_i32_1 = arith.constant 0 : i32
    return %c0_i32, %c0_i32_0 : i32, i32
  }
  func.func @transform_5(%arg0: i32) -> (i32, i32) {
    %c0_i32 = arith.constant 0 : i32
    %c0_i32_0 = arith.constant 0 : i32
    return %arg0, %c0_i32 : i32, i32
  }
}

</mosaic_0001>

<bundles_post_ra>
// kernel: clusters_finder_forward.12
= control target key start
LH: loop header
LB: loop body
LE: loop exit
PB: predicated region body
PF: predicated region fallthrough
CT: control target
= control target key end

     0   :  { %vm18_vm0 = vcmask 261120   ;;  %s118_s0 = inlined_call_operand.vmem [shape: f32[16,32], index: 0, kind: input, shape index: {}]   ;;  %s119_s1 = inlined_call_operand.vmem [shape: f32[1,32], index: 1, kind: input, shape index: {}]   ;;  %s120_s2 = inlined_call_operand.vmem [shape: f32[1,32], index: 2, kind: input, shape index: {}]   ;;  %s121_s3 = inlined_call_operand.vmem [shape: f32[16,32], index: 3, kind: output, shape index: {}]  }
   0x1   :  { %v14_v0 = vld [vmem:[%s118_s0] sm:$0xff]  ;;  %v15_v1 = vld [vmem:[%s118_s0 + $0x8] sm:$0xff] }
   0x2   :  { %v19_v2 = vsel %vm18_vm0, %v14_v0, 0.0  ;;  %v22_v3 = vsel %vm18_vm0, %v15_v1, 0.0  ;;  %v68_v21 = vld [vmem:[%s119_s1] ss:$0 sm:$0xff] }
   0x3   :  { %20 = vadd.xlane.f32.xlu0 %v19_v2  ;;  %v69_v23 = vld [vmem:[%s120_s2] ss:$0 sm:$0xff] }
   0x7   :  { %23 = vadd.xlane.f32.xlu0 %v22_v3 }
  0x8c   :  { %v21_v4 = vpop.xlane.xlu0 %20 }
  0x8d   :  { %v26_v5 = vmul.f32 0.03125, %v21_v4 }
  0x8f   :  { %v28_v6 = vsub.f32 %v14_v0, %v26_v5 }
  0x90   :  { %v24_v7 = vpop.xlane.xlu0 %23 }
  0x91   :  { %v27_v8 = vmul.f32 0.03125, %v24_v7  ;;  %v30_v9 = vmul.f32 %v28_v6, %v28_v6 }
  0x93   :  { %v29_v10 = vsub.f32 %v15_v1, %v27_v8  ;;  %v32_v11 = vsel %vm18_vm0, %v30_v9, 0.0 }
  0x94   :  { %33 = vadd.xlane.f32.xlu1 %v32_v11 }
  0x95   :  { %v31_v12 = vmul.f32 %v29_v10, %v29_v10 }
  0x97   :  { %v35_v13 = vsel %vm18_vm0, %v31_v12, 0.0 }
  0x98   :  { %36 = vadd.xlane.f32.xlu1 %v35_v13 }
 0x11d   :  { %v34_v14 = vpop.xlane.xlu1 %33 }
 0x11e   :  { %v38_v15 = vmul.f32 0.03125, %v34_v14 }
 0x120   :  { %v40_v16 = vadd.f32 1e-05, %v38_v15 }
 0x121   :  { %v37_v17 = vpop.xlane.xlu1 %36 }
 0x122   :  { %70 = vrsqrt.f32 %v40_v16  ;;  %v39_v18 = vmul.f32 0.03125, %v37_v17 }
 0x124   :  { %v41_v19 = vadd.f32 1e-05, %v39_v18 }
 0x126   :  { %72 = vrsqrt.f32 %v41_v19 }
 0x12f   :  { %v71_v20 = vpop.eup %70 }
 0x130   :  { %v44_v22 = vmul.f32 %v71_v20, %v28_v6 }
 0x132   :  { %v52_v24 = vmul.f32 %v68_v21, %v44_v22 }
 0x133   :  { %v73_v25 = vpop.eup %72 }
 0x134   :  { %v60_v26 = vadd.f32 %v69_v23, %v52_v24  ;;  %v45_v27 = vmul.f32 %v73_v25, %v29_v10 }
 0x136   :  { %62 = vst.msk [vmem:[%s121_s3] sm:$0xff] %vm18_vm0, %v60_v26  ;;  %v53_v28 = vmul.f32 %v68_v21, %v45_v27 }
 0x138   :  { %v61_v29 = vadd.f32 %v69_v23, %v53_v28 }
 0x13a   :  { %63 = vst.msk [vmem:[%s121_s3 + $0x8] sm:$0xff] %vm18_vm0, %v61_v29 }

// kernel: clusters_finder_forward.8
= control target key start
LH: loop header
LB: loop body
LE: loop exit
PB: predicated region body
PF: predicated region fallthrough
CT: control target
= control target key end

     0   :  { %vm37_vm0 = vcmask 1045504   ;;  %vm30_vm1 = vcmask 48128   ;;  %vm129_vm2 = vcmask 261120   ;;  %s312_s1 = inlined_call_operand.vmem [shape: f32[6,32], index: 1, kind: input, shape index: {}]   ;;  %s313_s0 = inlined_call_operand.vmem [shape: f32[16,6], index: 0, kind: input, shape index: {}]   ;;  %s314_s3 = inlined_call_operand.vmem [shape: f32[32,32], index: 3, kind: input, shape index: {}]   ;;  %s315_s2 = inlined_call_operand.vmem [shape: f32[1,32], index: 2, kind: input, shape index: {}]   ;;  %s316_s4 = inlined_call_operand.vmem [shape: f32[1,32], index: 4, kind: input, shape index: {}]   ;;  %s317_s5 = inlined_call_operand.vmem [shape: f32[16,32], index: 5, kind: output, shape index: {}]  }
   0x1   :  { %v22_v0 = vld [vmem:[%s312_s1] sm:$0x3f]  ;;  %v21_v2 = vld [vmem:[%s313_s0 + $0x8] sm:$0xff]  ;;  %v121_v3 = vld [vmem:[%s314_s3 + $0x18] sm:$0xff] }
   0x2   :  { %v20_v1 = vld [vmem:[%s313_s0] sm:$0xff]  ;;  %233 = vmatprep.subr.msk.mxu0 %vm37_vm0, %v22_v0  ;;  %238 = vmatprep.subr.mxu1 %v121_v3  ;;  %v120_v4 = vld [vmem:[%s314_s3 + $0x10] sm:$0xff]  ;;  %v119_v5 = vld [vmem:[%s314_s3 + $0x8] sm:$0xff] }
   0x3   :  { %235 = vmatprep.mubr.msk.f32.mxu0 %vm30_vm1, %v20_v1  ;;  %234 = vmatpush3.msk.msra.mxu0 %vm37_vm0, %v22_v0  ;;  %v118_v6 = vld [vmem:[%s314_s3] sm:$0xff] }
   0x4   :  { %236 = vmatmul.mubr.msk.f32.vlgmr.msra.gmra.mxu0 %vm30_vm1, %v21_v2  ;;  %239 = vmatpush3.msra.mxu1 %v121_v3  ;;  %v217_v7 = vld [vmem:[%s315_s2] ss:$0 sm:$0xff] }
   0x5   :  { %240 = vmatprep.subr.mxu1 %v120_v4  ;;  %v221_v14 = vld [vmem:[%s316_s4] ss:$0 sm:$0xff] }
   0x6   :  { %241 = vmatpush3.msra.mxu1 %v120_v4 }
   0x7   :  { %242 = vmatprep.subr.mxu1 %v119_v5 }
   0x8   :  { %243 = vmatpush3.msra.mxu1 %v119_v5 }
   0x9   :  { %244 = vmatprep.subr.mxu1 %v118_v6 }
   0xa   :  { %245 = vmatpush3.msra.mxu1 %v118_v6 }
  0xc4   :  { %v237_v8 = vpop.f32.mrf.mxu0 }
  0xc5   :  { %v113_v9 = vadd.f32 %v237_v8, %v217_v7 }
  0xc6   :  { %v107_v10 = vpop.f32.mrf.mxu0 }
  0xc7   :  { %v108_v11 = vadd.f32 %v217_v7, %v107_v10  ;;  %v117_v13 = vmax.f32 %v113_v9, 0.0 }
  0xc9   :  { %v116_v12 = vmax.f32 %v108_v11, 0.0 }
  0xcb   :  { %246 = vmatprep.mubr.msk.f32.mxu1 %vm129_vm2, %v116_v12 }
  0xcc   :  { %247 = vmatmul.mubr.msk.f32.vlgmr.msra.gmra.mxu1 %vm129_vm2, %v117_v13 }
 0x18c   :  { %v248_v15 = vpop.f32.mrf.mxu1 }
 0x18d   :  { %v208_v16 = vadd.f32 %v248_v15, %v221_v14 }
 0x18e   :  { %v202_v17 = vpop.f32.mrf.mxu1 }
 0x18f   :  { %212 = vst.msk [vmem:[%s317_s5 + $0x8] sm:$0xff] %vm129_vm2, %v208_v16  ;;  %v203_v18 = vadd.f32 %v221_v14, %v202_v17 }
 0x191   :  { %211 = vst.msk [vmem:[%s317_s5] sm:$0xff] %vm129_vm2, %v203_v18 }

// kernel: clusters_finder_forward.9
= control target key start
LH: loop header
LB: loop body
LE: loop exit
PB: predicated region body
PF: predicated region fallthrough
CT: control target
= control target key end

     0   :  { %vm30_vm0 = vcmask 64512   ;;  %vm125_vm1 = vcmask 261120   ;;  %s307_s1 = inlined_call_operand.vmem [shape: f32[8,32], index: 1, kind: input, shape index: {}]   ;;  %s308_s0 = inlined_call_operand.vmem [shape: f32[16,8], index: 0, kind: input, shape index: {}]   ;;  %s309_s3 = inlined_call_operand.vmem [shape: f32[32,32], index: 3, kind: input, shape index: {}]   ;;  %s310_s2 = inlined_call_operand.vmem [shape: f32[1,32], index: 2, kind: input, shape index: {}]   ;;  %s311_s4 = inlined_call_operand.vmem [shape: f32[1,32], index: 4, kind: input, shape index: {}]   ;;  %s312_s5 = inlined_call_operand.vmem [shape: f32[16,32], index: 5, kind: output, shape index: {}]  }
   0x1   :  { %v22_v0 = vld [vmem:[%s307_s1] sm:$0xff]  ;;  %v21_v2 = vld [vmem:[%s308_s0 + $0x8] sm:$0xff]  ;;  %v117_v3 = vld [vmem:[%s309_s3 + $0x18] sm:$0xff] }
   0x2   :  { %v20_v1 = vld [vmem:[%s308_s0] sm:$0xff]  ;;  %228 = vmatprep.subr.mxu0 %v22_v0  ;;  %233 = vmatprep.subr.mxu1 %v117_v3  ;;  %v116_v4 = vld [vmem:[%s309_s3 + $0x10] sm:$0xff]  ;;  %v115_v5 = vld [vmem:[%s309_s3 + $0x8] sm:$0xff] }
   0x3   :  { %230 = vmatprep.mubr.msk.f32.mxu0 %vm30_vm0, %v20_v1  ;;  %229 = vmatpush3.msra.mxu0 %v22_v0  ;;  %v114_v6 = vld [vmem:[%s309_s3] sm:$0xff] }
   0x4   :  { %231 = vmatmul.mubr.msk.f32.vlgmr.msra.gmra.mxu0 %vm30_vm0, %v21_v2  ;;  %234 = vmatpush3.msra.mxu1 %v117_v3  ;;  %v213_v7 = vld [vmem:[%s310_s2] ss:$0 sm:$0xff] }
   0x5   :  { %235 = vmatprep.subr.mxu1 %v116_v4  ;;  %v216_v14 = vld [vmem:[%s311_s4] ss:$0 sm:$0xff] }
   0x6   :  { %236 = vmatpush3.msra.mxu1 %v116_v4 }
   0x7   :  { %237 = vmatprep.subr.mxu1 %v115_v5 }
   0x8   :  { %238 = vmatpush3.msra.mxu1 %v115_v5 }
   0x9   :  { %239 = vmatprep.subr.mxu1 %v114_v6 }
   0xa   :  { %240 = vmatpush3.msra.mxu1 %v114_v6 }
  0xc4   :  { %v232_v8 = vpop.f32.mrf.mxu0 }
  0xc5   :  { %v109_v9 = vadd.f32 %v232_v8, %v213_v7 }
  0xc6   :  { %v103_v10 = vpop.f32.mrf.mxu0 }
  0xc7   :  { %v104_v11 = vadd.f32 %v213_v7, %v103_v10  ;;  %v113_v13 = vmax.f32 %v109_v9, 0.0 }
  0xc9   :  { %v112_v12 = vmax.f32 %v104_v11, 0.0 }
  0xcb   :  { %241 = vmatprep.mubr.msk.f32.mxu1 %vm125_vm1, %v112_v12 }
  0xcc   :  { %242 = vmatmul.mubr.msk.f32.vlgmr.msra.gmra.mxu1 %vm125_vm1, %v113_v13 }
 0x18c   :  { %v243_v15 = vpop.f32.mrf.mxu1 }
 0x18d   :  { %v204_v16 = vadd.f32 %v243_v15, %v216_v14 }
 0x18e   :  { %v198_v17 = vpop.f32.mrf.mxu1 }
 0x18f   :  { %208 = vst.msk [vmem:[%s312_s5 + $0x8] sm:$0xff] %vm125_vm1, %v204_v16  ;;  %v199_v18 = vadd.f32 %v216_v14, %v198_v17 }
 0x191   :  { %207 = vst.msk [vmem:[%s312_s5] sm:$0xff] %vm125_vm1, %v199_v18 }

// kernel: clusters_finder_forward.10
= control target key start
LH: loop header
LB: loop body
LE: loop exit
PB: predicated region body
PF: predicated region fallthrough
CT: control target
= control target key end

     0   :  { %s1946_s29 = smov 0   ;;  %s2157_s0 = inlined_call_operand.vmem [shape: f32[2,8,32], index: 0, kind: input, shape index: {}]   ;;  %s2158_s1 = inlined_call_operand.vmem [shape: f32[2,1,8], index: 1, kind: input, shape index: {}]   ;;  %s2159_s2 = inlined_call_operand.vmem [shape: f32[32,96], index: 2, kind: input, shape index: {}]   ;;  %s2160_s3 = inlined_call_operand.vmem [shape: f32[1,96], index: 3, kind: input, shape index: {}]   ;;  %s2161_s4 = inlined_call_operand.vmem [shape: f32[32,32], index: 4, kind: input, shape index: {}]   ;;  %s2162_s5 = inlined_call_operand.vmem [shape: f32[1,32], index: 5, kind: input, shape index: {}]   ;;  %s2163_s6 = inlined_call_operand.vmem [shape: f32[1,32], index: 6, kind: input, shape index: {}]   ;;  %s2164_s7 = inlined_call_operand.vmem [shape: f32[1,32], index: 7, kind: input, shape index: {}]   ;;  %s2165_s8 = inlined_call_operand.vmem [shape: f32[32,64], index: 8, kind: input, shape index: {}]   ;;  %s2166_s9 = inlined_call_operand.vmem [shape: f32[1,64], index: 9, kind: input, shape index: {}]   ;;  %s2167_s10 = inlined_call_operand.vmem [shape: f32[64,32], index: 10, kind: input, shape index: {}]   ;;  %s2168_s11 = inlined_call_operand.vmem [shape: f32[1,32], index: 11, kind: input, shape index: {}]   ;;  %s2169_s12 = inlined_call_operand.vmem [shape: f32[1,32], index: 12, kind: input, shape index: {}]   ;;  %s2170_s13 = inlined_call_operand.vmem [shape: f32[1,32], index: 13, kind: input, shape index: {}]   ;;  %s2171_s14 = inlined_call_operand.vmem [shape: f32[2,8,32], index: 14, kind: output, shape index: {}]  }
   0x1 LB: > { %s1637_s30 = sadd.s32 4294967295, %s1853_s29   ;;  %p1641_p0 = scmp.ge.s32.totalorder %s1853_s29, 1  ;;  %s1853_s29 = sphi %s1946_s29, %s24_s29  }
   0x2   : > { %p419_p1 = scmp.lt.s32.totalorder %s1853_s29, 3 }
   0x4   : > { %p420_p2 = pnand %p1641_p0, %p419_p1 }
   0x5   : > { %p466_p3 = scmp.lt.s32.totalorder (!%p420_p2), %s1637_s30, 1  ;;  %s1857_s15 = smov (!%p420_p2), 120  }
   0x6   : > { %423 = sbr.rel (%p420_p2) target bundleno = 2259 (0x8d3), region = 76  ;;  %s1858_s16 = smov (!%p420_p2), 96  }
   0x7   : > { %s1859_s17 = smov (!%p420_p2), 80   ;;  %s1860_s18 = smov (!%p420_p2), 88  }
   0x8   : > { %s1861_s19 = smov (!%p420_p2), 72   ;;  %s1862_s20 = smov (!%p420_p2), 112  }
   0x9   : > { %s1863_s22 = smov (!%p420_p2), 104   ;;  %s1865_s27 = smov (!%p420_p2), 64  }
   0xa   : > { %s1866_s28 = smov (!%p420_p2), 40   ;;  %s1869_s24 = smov (!%p420_p2), 16  }
   0xb   : > { %v481_v0 = vld [vmem:[%s2159_s2 + $0x18] sm:$0xff]  ;;  %v1855_v1 = vmov 0.0   ;;  %v480_v2 = vld [vmem:[%s2159_s2 + $0x10] sm:$0xff]  ;;  %vm1856_vm0 = vmmov 0   ;;  %s2173_s30 = smov (!%p466_p3, %s1637_s30), 1  ;;  %v479_v3 = vld [vmem:[%s2159_s2 + $0x8] sm:$0xff] }
   0xc   : > { %1711 = vmatprep.subr.mxu1 %v1855_v1  ;;  %1719 = vmatprep.mubr.msk.f32.mxu1 %vm1856_vm0, %v1855_v1  ;;  %s1642_s21 = sshll.u32 %s2173_s30, 3  ;;  %v478_v4 = vld [vmem:[%s2159_s2] sm:$0xff]  ;;  %vm489_vm1 = vcmask 261120   ;;  %vm567_vm2 = vcmask 64512   ;;  %s472_s25 = scalar_lea.vmem %s2158_s1, %s2173_s30  ;;  %vm1251_vm3 = vcmask 130048   ;;  %vm1253_vm4 = vcmask 195584  }
   0xd   : > { %1712 = vmatpush3.msra.mxu1 %v481_v0  ;;  %1732 = vmatprep.subr.mxu0 %v1855_v1  ;;  %s469_s26 = scalar_lea.vmem %s2157_s0, %s1642_s21  ;;  %v1644_v6 = vld [vmem:[%s2160_s3] ss:$0 sm:$0xff]  ;;  %vm1470_vm5 = vcmask 523264  }
   0xe   : > { %1713 = vmatprep.subr.mxu1 %v1855_v1  ;;  %1734 = vmatprep.mubr.msk.f32.mxu0 %vm1856_vm0, %v1855_v1  ;;  %v1982_v5 = vld [vmem:[%s469_s26] sm:$0xff]  ;;  %s1864_s26 = smov 56  }
   0xf   : > { %1714 = vmatpush3.msra.mxu1 %v480_v2  ;;  %v1648_v18 = vld [vmem:[%s472_s25] ss:$0 sm:$0xff] }
  0x10   : > { %1715 = vmatprep.subr.mxu1 %v1855_v1 }
  0x11   : > { %1716 = vmatpush3.msra.mxu1 %v479_v3 }
  0x12   : > { %1717 = vmatprep.subr.mxu1 %v1855_v1 }
  0x13   : > { %1718 = vmatpush3.msra.mxu1 %v478_v4 }
  0x14   : > { %1720 = vmatmul.mubr.msk.f32.vlgmr.msra.gmra.mxu1 %vm489_vm1, %v1982_v5  ;;  %1722 = vmatprep.subr.mxu1 %v1855_v1 }
  0x15   : > { %1724 = vmatprep.mubr.msk.f32.mxu1 %vm1856_vm0, %v1855_v1 }
  0xd4   : > { %v559_v7 = vpop.f32.mrf.mxu1 }
  0xd5   : > { %v1993_v8 = vadd.f32 %v1644_v6, %v559_v7 }
  0xd6   : > { %v1721_v9 = vpop.f32.mrf.mxu1 }
  0xd7   : > { %737 = vrot.lane.b32.xlu1 %v1993_v8, %s1857_s15  ;;  %565 = vrot.lane.b32.xlu0 %v1993_v8, %s1858_s16  ;;  %s1867_s15 = smov 48   ;;  %s1868_s16 = smov 8   ;;  %v1257_v9 = vld [vmem:[%s2161_s4 + $0x10] sm:$0xff] }
  0xdb   : > { %906 = vrot.lane.b32.xlu1 %v1993_v8, %s1859_s17  ;;  %739 = vrot.lane.b32.xlu0 %v1993_v8, %s1860_s18 }
  0xdf   : > { %1073 = vrot.lane.b32.xlu1 %v1993_v8, %s1861_s19  ;;  %904 = vrot.lane.b32.xlu0 %v1993_v8, %s1862_s20 }
  0xe3   : > { %1071 = vrot.lane.b32.xlu0 %v1993_v8, %s1863_s22 }
 0x149   : > { %v738_v10 = vpop.permute.xlu1 %737  ;;  %v566_v11 = vpop.permute.xlu0 %565 }
 0x14a   : > { %1723 = vmatpush3.xpose.msk.msra.mxu1 %vm567_vm2, %v566_v11 }
 0x14b   : > { %1727 = vmatprep.subr.mxu1 %v1855_v1 }
 0x14d   : > { %1725 = vmatmul.mubr.msk.f32.vlgmr.msra.gmra.mxu1 %vm567_vm2, %v1993_v8  ;;  %v740_v12 = vpop.permute.xlu0 %739  ;;  %v907_v13 = vpop.permute.xlu1 %906 }
 0x14e   : > { %1733 = vmatpush3.xpose.msk.msra.mxu0 %vm567_vm2, %v740_v12  ;;  %1729 = vmatprep.mubr.msk.f32.mxu1 %vm1856_vm0, %v1855_v1 }
 0x14f   : > { %1742 = vmatprep.subr.mxu0 %v1855_v1 }
 0x151   : > { %1735 = vmatmul.mubr.msk.f32.vlgmr.msra.gmra.mxu0 %vm567_vm2, %v738_v10  ;;  %v905_v14 = vpop.permute.xlu0 %904  ;;  %v1074_v15 = vpop.permute.xlu1 %1073  ;;  %v1256_v10 = vld [vmem:[%s2161_s4 + $0x8] sm:$0xff] }
 0x152   : > { %1743 = vmatpush3.xpose.msk.msra.mxu0 %vm567_vm2, %v907_v13  ;;  %1744 = vmatprep.mubr.msk.f32.mxu0 %vm1856_vm0, %v1855_v1 }
 0x153   : > { %1752 = vmatprep.subr.mxu0 %v1855_v1 }
 0x155   : > { %1745 = vmatmul.mubr.msk.f32.vlgmr.msra.gmra.mxu0 %vm567_vm2, %v905_v14  ;;  %v1072_v16 = vpop.permute.xlu0 %1071 }
 0x156   : > { %1753 = vmatpush3.xpose.msk.msra.mxu0 %vm567_vm2, %v1074_v15  ;;  %1754 = vmatprep.mubr.msk.f32.mxu0 %vm1856_vm0, %v1855_v1 }
 0x157   : > { %1762 = vmatprep.subr.mxu0 %v1855_v1 }
 0x159   : > { %1755 = vmatmul.mubr.msk.f32.vlgmr.msra.gmra.mxu0 %vm567_vm2, %v1072_v16  ;;  %v1255_v16 = vld [vmem:[%s2161_s4] sm:$0xff] }
 0x15a   : > { %1770 = vmatprep.mubr.msk.f32.mxu0 %vm1856_vm0, %v1855_v1 }
 0x20d   : > { %v638_v17 = vpop.f32.mrf.mxu1 }
 0x20e   : > { %v642_v19 = vmul.f32 0.35355338, %v638_v17 }
 0x20f   : > { %v1726_v20 = vpop.f32.mrf.mxu1 }
 0x210   : > { %v649_v21 = vadd.f32 %v1648_v18, %v642_v19 }
 0x211   : > { %v811_v22 = vpop.f32.mrf.mxu0 }
 0x212   : > { %v815_v23 = vmul.f32 0.35355338, %v811_v22  ;;  %v650_v24 = vsel %vm567_vm2, %v649_v21, -inf }
 0x213   : > { %v1736_v25 = vpop.f32.mrf.mxu0  ;;  %651 = vmax.xlane.f32.xlu1 %v650_v24 }
 0x214   : > { %v816_v26 = vadd.f32 %v1648_v18, %v815_v23 }
 0x215   : > { %v978_v27 = vpop.f32.mrf.mxu0 }
 0x216   : > { %v982_v28 = vmul.f32 0.35355338, %v978_v27  ;;  %v817_v29 = vsel %vm567_vm2, %v816_v26, -inf }
 0x217   : > { %818 = vmax.xlane.f32.xlu0 %v817_v29  ;;  %v1746_v30 = vpop.f32.mrf.mxu0 }
 0x218   : > { %v983_v31 = vadd.f32 %v1648_v18, %v982_v28  ;;  %v1659_v30 = vld [vmem:[%s2162_s5] ss:$0 sm:$0xff] }
 0x219   : > { %v1145_v32 = vpop.f32.mrf.mxu0 }
 0x21a   : > { %v984_v33 = vsel %vm567_vm2, %v983_v31, -inf  ;;  %v1149_v35 = vmul.f32 0.35355338, %v1145_v32 }
 0x21b   : > { %985 = vmax.xlane.f32.xlu0 %v984_v33  ;;  %v1756_v34 = vpop.f32.mrf.mxu0 }
 0x21c   : > { %v1150_v36 = vadd.f32 %v1648_v18, %v1149_v35 }
 0x21e   : > { %v1151_v37 = vsel %vm567_vm2, %v1150_v36, -inf }
 0x224   : > { %826 = vrot.lane.b32.xlu1 %v1993_v8, %s1864_s26 }
 0x231   : > { %659 = vrot.lane.b32.xlu0 %v1993_v8, %s1865_s27  ;;  %s1870_s27 = smov 24  }
 0x235   : > { %1160 = vrot.lane.b32.xlu0 %v1993_v8, %s1866_s28 }
 0x248   : > { %1152 = vmax.xlane.f32.xlu1 %v1151_v37 }
 0x259   : > { %993 = vrot.lane.b32.xlu1 %v1993_v8, %s1867_s15  ;;  %v1258_v8 = vld [vmem:[%s2161_s4 + $0x18] sm:$0xff]  ;;  %s476_s15 = scalar_lea.vmem %s2171_s14, %s1642_s21 }
 0x25a   : > { %1763 = vmatpush3.msra.mxu0 %v1258_v8 }
 0x25b   : > { %1764 = vmatprep.subr.mxu0 %v1855_v1 }
 0x25c   : > { %1765 = vmatpush3.msra.mxu0 %v1257_v9 }
 0x25d   : > { %1766 = vmatprep.subr.mxu0 %v1855_v1 }
 0x25e   : > { %1767 = vmatpush3.msra.mxu0 %v1256_v10 }
 0x25f   : > { %1768 = vmatprep.subr.mxu0 %v1855_v1 }
 0x260   : > { %1769 = vmatpush3.msra.mxu0 %v1255_v16 }
 0x261   : > { %1784 = vmatprep.subr.mxu0 %v1855_v1 }
 0x29c   : > { %v652_v38 = vpop.xlane.xlu1 %651 }
 0x29d   : > { %v653_v39 = vsub.f32 %v649_v21, %v652_v38 }
 0x29f   : > { %v654_v40 = vmul.f32 1.442695, %v653_v39 }
 0x2a0   : > { %v819_v41 = vpop.xlane.xlu0 %818  ;;  %v827_v49 = vpop.permute.xlu1 %826 }
 0x2a1   : > { %1827 = vpow2.f32 %v654_v40  ;;  %v820_v42 = vsub.f32 %v816_v26, %v819_v41  ;;  %v1373_v41 = vld [vmem:[%s2165_s8 + $0x18] sm:$0xff] }
 0x2a3   : > { %v821_v43 = vmul.f32 1.442695, %v820_v42  ;;  %v1372_v42 = vld [vmem:[%s2165_s8 + $0x10] sm:$0xff] }
 0x2a4   : > { %v986_v44 = vpop.xlane.xlu0 %985 }
 0x2a5   : > { %1829 = vpow2.f32 %v821_v43  ;;  %v987_v45 = vsub.f32 %v983_v31, %v986_v44  ;;  %v1370_v43 = vld [vmem:[%s2165_s8] sm:$0xff]  ;;  %v1462_v44 = vld [vmem:[%s2167_s10 + $0x38] sm:$0xff] }
 0x2a7   : > { %v988_v46 = vmul.f32 1.442695, %v987_v45  ;;  %v1461_v45 = vld [vmem:[%s2167_s10 + $0x30] sm:$0xff] }
 0x2a8   : > { %v660_v47 = vpop.permute.xlu0 %659 }
 0x2a9   : > { %1831 = vpow2.f32 %v988_v46  ;;  %1728 = vmatpush3.msra.mxu1 %v660_v47  ;;  %v1460_v46 = vld [vmem:[%s2167_s10 + $0x28] sm:$0xff]  ;;  %v1459_v47 = vld [vmem:[%s2167_s10 + $0x20] sm:$0xff] }
 0x2aa   : > { %1737 = vmatprep.subr.mxu1 %v1855_v1 }
 0x2ac   : > { %v1161_v59 = vpop.permute.xlu0 %1160 }
 0x2ae   : > { %v1828_v48 = vpop.eup %1827 }
 0x2af   : > { %1730 = vmatmul.mubr.msk.f32.vlgmr.msra.gmra.mxu1 %vm567_vm2, %v1828_v48  ;;  %v656_v54 = vsel %vm567_vm2, %v1828_v48, 0.0  ;;  %v1458_v48 = vld [vmem:[%s2167_s10 + $0x18] sm:$0xff] }
 0x2b0   : > { %1738 = vmatpush3.msra.mxu1 %v827_v49  ;;  %1739 = vmatprep.mubr.msk.f32.mxu1 %vm1856_vm0, %v1855_v1 }
 0x2b1   : > { %1747 = vmatprep.subr.mxu1 %v1855_v1 }
 0x2b2   : > { %v1830_v50 = vpop.eup %1829 }
 0x2b3   : > { %1740 = vmatmul.mubr.msk.f32.vlgmr.msra.gmra.mxu1 %vm567_vm2, %v1830_v50  ;;  %v823_v51 = vsel %vm567_vm2, %v1830_v50, 0.0 }
 0x2b4   : > { %824 = vadd.xlane.f32.xlu1 %v823_v51  ;;  %1749 = vmatprep.mubr.msk.f32.mxu1 %vm1856_vm0, %v1855_v1 }
 0x2b6   : > { %v1832_v52 = vpop.eup %1831 }
 0x2b7   : > { %v990_v53 = vsel %vm567_vm2, %v1832_v52, 0.0 }
 0x2b8   : > { %991 = vadd.xlane.f32.xlu0 %v990_v53  ;;  %657 = vadd.xlane.f32.xlu1 %v656_v54  ;;  %v1661_v53 = vld [vmem:[%s2163_s6] ss:$0 sm:$0xff] }
 0x2d1   : > { %v1153_v55 = vpop.xlane.xlu1 %1152 }
 0x2d2   : > { %v1154_v56 = vsub.f32 %v1150_v36, %v1153_v55  ;;  %v1662_v55 = vld [vmem:[%s2164_s7] ss:$0 sm:$0xff] }
 0x2d4   : > { %v1155_v57 = vmul.f32 1.442695, %v1154_v56 }
 0x2d5   : > { %v994_v58 = vpop.permute.xlu1 %993 }
 0x2d6   : > { %1833 = vpow2.f32 %v1155_v57  ;;  %1748 = vmatpush3.msra.mxu1 %v994_v58  ;;  %v1457_v58 = vld [vmem:[%s2167_s10 + $0x10] sm:$0xff] }
 0x2d7   : > { %1750 = vmatmul.mubr.msk.f32.vlgmr.msra.gmra.mxu1 %vm567_vm2, %v1832_v52  ;;  %1757 = vmatprep.subr.mxu1 %v1855_v1 }
 0x2d8   : > { %1758 = vmatpush3.msra.mxu1 %v1161_v59  ;;  %1759 = vmatprep.mubr.msk.f32.mxu1 %vm1856_vm0, %v1855_v1  ;;  %v1456_v59 = vld [vmem:[%s2167_s10 + $0x8] sm:$0xff] }
 0x2d9   : > { %1773 = vmatprep.subr.mxu1 %v1855_v1 }
 0x2e3   : > { %v1834_v60 = vpop.eup %1833 }
 0x2e4   : > { %1760 = vmatmul.mubr.msk.f32.vlgmr.msra.gmra.mxu1 %vm567_vm2, %v1834_v60  ;;  %v1157_v61 = vsel %vm567_vm2, %v1834_v60, 0.0  ;;  %v1455_v60 = vld [vmem:[%s2167_s10] sm:$0xff] }
 0x2e5   : > { %1158 = vadd.xlane.f32.xlu0 %v1157_v61  ;;  %1781 = vmatprep.mubr.msk.f32.mxu1 %vm1856_vm0, %v1855_v1  ;;  %v1663_v61 = vld [vmem:[%s2166_s9] ss:$0 sm:$0xff] }
 0x2e6   : > { %1774 = vmatpush3.msra.mxu1 %v1373_v41 }
 0x2e7   : > { %1775 = vmatprep.subr.mxu1 %v1855_v1 }
 0x2e8   : > { %1776 = vmatpush3.msra.mxu1 %v1372_v42 }
 0x2e9   : > { %1777 = vmatprep.subr.mxu1 %v1855_v1 }
 0x33d   : > { %v825_v62 = vpop.xlane.xlu1 %824 }
 0x33e   : > { %1835 = vrcp.f32 %v825_v62 }
 0x341   : > { %v992_v7 = vpop.xlane.xlu0 %991  ;;  %v658_v21 = vpop.xlane.xlu1 %657 }
 0x342   : > { %1837 = vrcp.f32 %v992_v7 }
 0x34b   : > { %v1836_v2 = vpop.eup %1835 }
 0x34f   : > { %v1838_v12 = vpop.eup %1837 }
 0x36e   : > { %v1159_v11 = vpop.xlane.xlu0 %1158 }
 0x36f   : > { %v731_v63 = vpop.f32.mrf.mxu1  ;;  %1839 = vrcp.f32 %v1159_v11 }
 0x370   : > { %1841 = vrcp.f32 %v658_v21 }
 0x371   : > { %v1731_v0 = vpop.f32.mrf.mxu1 }
 0x373   : > { %v898_v3 = vpop.f32.mrf.mxu1 }
 0x374   : > { %v903_v4 = vmul.f32 %v1836_v2, %v898_v3  ;;  %v1665_v3 = vld [vmem:[%s2168_s11] ss:$0 sm:$0xff] }
 0x375   : > { %v1741_v6 = vpop.f32.mrf.mxu1 }
 0x376   : > { %1239 = vrot.lane.b32.xlu0 %v903_v4, %s1868_s16 }
 0x37c   : > { %v1840_v17 = vpop.eup %1839 }
 0x37d   : > { %v1842_v22 = vpop.eup %1841 }
 0x37e   : > { %v736_v25 = vmul.f32 %v1842_v22, %v731_v63 }
 0x397   : > { %v1065_v13 = vpop.f32.mrf.mxu1 }
 0x398   : > { %v1070_v14 = vmul.f32 %v1838_v12, %v1065_v13 }
 0x399   : > { %v1751_v15 = vpop.f32.mrf.mxu1 }
 0x39a   : > { %1243 = vrot.lane.b32.xlu1 %v1070_v14, %s1869_s24 }
 0x3a4   : > { %v1232_v18 = vpop.f32.mrf.mxu1 }
 0x3a5   : > { %v1237_v19 = vmul.f32 %v1840_v17, %v1232_v18  ;;  %v1667_v18 = vld [vmem:[%s2169_s12] ss:$0 sm:$0xff] }
 0x3a6   : > { %v1761_v20 = vpop.f32.mrf.mxu1 }
 0x3a7   : > { %1247 = vrot.lane.b32.xlu1 %v1237_v19, %s1870_s27  ;;  %v1668_v20 = vld [vmem:[%s2170_s13] ss:$0 sm:$0xff] }
 0x3e8   : > { %v1240_v23 = vpop.permute.xlu0 %1239 }
 0x3e9   : > { %v1250_v26 = vsel %vm567_vm2, %v736_v25, %v1240_v23 }
 0x40c   : > { %v1244_v24 = vpop.permute.xlu1 %1243 }
 0x40d   : > { %v1252_v27 = vsel %vm1251_vm3, %v1250_v26, %v1244_v24 }
 0x419   : > { %v1248_v28 = vpop.permute.xlu1 %1247 }
 0x41a   : > { %v1254_v29 = vsel %vm1253_vm4, %v1252_v27, %v1248_v28 }
 0x41b   : > { %1771 = vmatmul.mubr.msk.f32.vlgmr.msra.gmra.mxu0 %vm489_vm1, %v1254_v29 }
 0x41c   : > { %1800 = vmatprep.mubr.msk.f32.mxu0 %vm1856_vm0, %v1855_v1  ;;  %1785 = vmatpush3.msra.mxu0 %v1462_v44 }
 0x41d   : > { %1786 = vmatprep.subr.mxu0 %v1855_v1 }
 0x41e   : > { %1787 = vmatpush3.msra.mxu0 %v1461_v45 }
 0x41f   : > { %1788 = vmatprep.subr.mxu0 %v1855_v1 }
 0x420   : > { %1789 = vmatpush3.msra.mxu0 %v1460_v46 }
 0x421   : > { %1790 = vmatprep.subr.mxu0 %v1855_v1 }
 0x422   : > { %1791 = vmatpush3.msra.mxu0 %v1459_v47 }
 0x423   : > { %1792 = vmatprep.subr.mxu0 %v1855_v1 }
 0x424   : > { %1793 = vmatpush3.msra.mxu0 %v1458_v48 }
 0x425   : > { %1794 = vmatprep.subr.mxu0 %v1855_v1 }
 0x426   : > { %1795 = vmatpush3.msra.mxu0 %v1457_v58 }
 0x427   : > { %1796 = vmatprep.subr.mxu0 %v1855_v1 }
 0x428   : > { %1797 = vmatpush3.msra.mxu0 %v1456_v59 }
 0x429   : > { %1798 = vmatprep.subr.mxu0 %v1855_v1 }
 0x42a   : > { %1799 = vmatpush3.msra.mxu0 %v1455_v60 }
 0x4db   : > { %v1335_v31 = vpop.f32.mrf.mxu0 }
 0x4dc   : > { %v1336_v32 = vadd.f32 %v1659_v30, %v1335_v31 }
 0x4dd   : > { %v1772_v33 = vpop.f32.mrf.mxu0 }
 0x4de   : > { %v1339_v34 = vadd.f32 %v1336_v32, %v1982_v5  ;;  %v1371_v5 = vld [vmem:[%s2165_s8 + $0x8] sm:$0xff] }
 0x4df   : > { %1778 = vmatpush3.msra.mxu1 %v1371_v5 }
 0x4e0   : > { %v1342_v35 = vsel %vm489_vm1, %v1339_v34, 0.0  ;;  %1779 = vmatprep.subr.mxu1 %v1855_v1 }
 0x4e1   : > { %1343 = vadd.xlane.f32.xlu0 %v1342_v35  ;;  %1780 = vmatpush3.msra.mxu1 %v1370_v43 }
 0x56a   : > { %v1344_v36 = vpop.xlane.xlu0 %1343 }
 0x56b   : > { %v1346_v37 = vmul.f32 0.03125, %v1344_v36 }
 0x56d   : > { %v1347_v38 = vsub.f32 %v1339_v34, %v1346_v37 }
 0x56f   : > { %v1348_v39 = vmul.f32 %v1347_v38, %v1347_v38 }
 0x571   : > { %v1349_v40 = vsel %vm489_vm1, %v1348_v39, 0.0 }
 0x572   : > { %1350 = vadd.xlane.f32.xlu1 %v1349_v40 }
 0x5fb   : > { %v1351_v49 = vpop.xlane.xlu1 %1350 }
 0x5fc   : > { %v1352_v50 = vmul.f32 0.03125, %v1351_v49 }
 0x5fe   : > { %v1353_v51 = vadd.f32 1e-05, %v1352_v50 }
 0x600   : > { %1843 = vrsqrt.f32 %v1353_v51 }
 0x60d   : > { %v1844_v52 = vpop.eup %1843 }
 0x60e   : > { %v1355_v54 = vmul.f32 %v1844_v52, %v1347_v38 }
 0x610   : > { %v1362_v56 = vmul.f32 %v1661_v53, %v1355_v54 }
 0x612   : > { %v1369_v57 = vadd.f32 %v1662_v55, %v1362_v56 }
 0x614   : > { %1782 = vmatmul.mubr.msk.f32.vlgmr.msra.gmra.mxu1 %vm489_vm1, %v1369_v57 }
 0x6d4   : > { %v1450_v62 = vpop.f32.mrf.mxu1 }
 0x6d5   : > { %v1451_v63 = vadd.f32 %v1663_v61, %v1450_v62 }
 0x6d6   : > { %v1783_v0 = vpop.f32.mrf.mxu1 }
 0x6d7   : > { %v1454_v2 = vmax.f32 %v1451_v63, 0.0 }
 0x6d9   : > { %1801 = vmatmul.mubr.msk.f32.vlgmr.msra.gmra.mxu0 %vm1470_vm5, %v1454_v2 }
 0x799   : > { %v1540_v4 = vpop.f32.mrf.mxu0 }
 0x79a   : > { %v1541_v6 = vadd.f32 %v1665_v3, %v1540_v4 }
 0x79b   : > { %v1802_v7 = vpop.f32.mrf.mxu0 }
 0x79c   : > { %v1544_v8 = vadd.f32 %v1541_v6, %v1369_v57 }
 0x79e   : > { %v1547_v1 = vsel %vm489_vm1, %v1544_v8, 0.0 }
 0x79f   : > { %1548 = vadd.xlane.f32.xlu0 %v1547_v1 }
 0x828   : > { %v1549_v9 = vpop.xlane.xlu0 %1548 }
 0x829   : > { %v1550_v10 = vmul.f32 0.03125, %v1549_v9 }
 0x82b   : > { %v1551_v11 = vsub.f32 %v1544_v8, %v1550_v10 }
 0x82d   : > { %v1552_v12 = vmul.f32 %v1551_v11, %v1551_v11 }
 0x82f   : > { %v1553_v13 = vsel %vm489_vm1, %v1552_v12, 0.0 }
 0x830   : > { %1554 = vadd.xlane.f32.xlu0 %v1553_v13 }
 0x8b9   : > { %v1555_v14 = vpop.xlane.xlu0 %1554 }
 0x8ba   : > { %v1556_v15 = vmul.f32 0.03125, %v1555_v14 }
 0x8bc   : > { %v1557_v16 = vadd.f32 1e-05, %v1556_v15 }
 0x8be   : > { %1845 = vrsqrt.f32 %v1557_v16 }
 0x8cb   : > { %v1846_v17 = vpop.eup %1845 }
 0x8cc   : > { %v1559_v19 = vmul.f32 %v1846_v17, %v1551_v11 }
 0x8ce   : > { %v1566_v21 = vmul.f32 %v1667_v18, %v1559_v19 }
 0x8d0   : > { %v1573_v22 = vadd.f32 %v1668_v20, %v1566_v21 }
 0x8d2   : > { %1574 = vst.msk [vmem:[%s476_s15] sm:$0xff] %vm489_vm1, %v1573_v22 }
 0x8d3 PF: > { %s24_s29 = sadd.s32 1, %s1853_s29  }
 0x8d4   : > { %p21_p4 = scmp.ge.s32.totalorder %s24_s29, 4  }
 0x8d6   :  { %23 = sbr.rel (!%p21_p4) target bundleno = 1 (0x1), region = 109 }

// kernel: clusters_finder_forward.15
= control target key start
LH: loop header
LB: loop body
LE: loop exit
PB: predicated region body
PF: predicated region fallthrough
CT: control target
= control target key end

     0   :  { %vm24_vm0 = vcmask 261120   ;;  %vm160_vm1 = vcmask 130048   ;;  %s262_s0 = inlined_call_operand.vmem [shape: f32[16,32], index: 0, kind: input, shape index: {}]   ;;  %s263_s3 = inlined_call_operand.vmem [shape: f32[32,16], index: 3, kind: input, shape index: {}]   ;;  %s264_s1 = inlined_call_operand.vmem [shape: f32[1,32], index: 1, kind: input, shape index: {}]   ;;  %s265_s2 = inlined_call_operand.vmem [shape: f32[1,32], index: 2, kind: input, shape index: {}]   ;;  %s266_s4 = inlined_call_operand.vmem [shape: f32[1,16], index: 4, kind: input, shape index: {}]   ;;  %s267_s5 = inlined_call_operand.vmem [shape: f32[16,16], index: 5, kind: output, shape index: {}]  }
   0x1   :  { %v20_v0 = vld [vmem:[%s262_s0] sm:$0xff]  ;;  %v21_v1 = vld [vmem:[%s262_s0 + $0x8] sm:$0xff]  ;;  %v71_v14 = vld [vmem:[%s263_s3 + $0x18] sm:$0xff] }
   0x2   :  { %v25_v2 = vsel %vm24_vm0, %v20_v0, 0.0  ;;  %v28_v3 = vsel %vm24_vm0, %v21_v1, 0.0  ;;  %v70_v15 = vld [vmem:[%s263_s3 + $0x10] sm:$0xff]  ;;  %178 = vmatprep.subr.mxu0 %v71_v14  ;;  %v69_v16 = vld [vmem:[%s263_s3 + $0x8] sm:$0xff]  ;;  %v68_v17 = vld [vmem:[%s263_s3] sm:$0xff] }
   0x3   :  { %26 = vadd.xlane.f32.xlu0 %v25_v2  ;;  %179 = vmatpush3.msra.mxu0 %v71_v14  ;;  %v167_v25 = vld [vmem:[%s264_s1] ss:$0 sm:$0xff] }
   0x4   :  { %180 = vmatprep.subr.mxu0 %v70_v15  ;;  %v168_v27 = vld [vmem:[%s265_s2] ss:$0 sm:$0xff] }
   0x5   :  { %181 = vmatpush3.msra.mxu0 %v70_v15  ;;  %v169_v34 = vld [vmem:[%s266_s4] ss:$0 sm:$0xff] }
   0x6   :  { %182 = vmatprep.subr.mxu0 %v69_v16 }
   0x7   :  { %29 = vadd.xlane.f32.xlu0 %v28_v3  ;;  %183 = vmatpush3.msra.mxu0 %v69_v16 }
   0x8   :  { %184 = vmatprep.subr.mxu0 %v68_v17 }
   0x9   :  { %185 = vmatpush3.msra.mxu0 %v68_v17 }
  0x8c   :  { %v27_v4 = vpop.xlane.xlu0 %26 }
  0x8d   :  { %v32_v5 = vmul.f32 0.03125, %v27_v4 }
  0x8f   :  { %v34_v6 = vsub.f32 %v20_v0, %v32_v5 }
  0x90   :  { %v30_v7 = vpop.xlane.xlu0 %29 }
  0x91   :  { %v33_v8 = vmul.f32 0.03125, %v30_v7  ;;  %v36_v9 = vmul.f32 %v34_v6, %v34_v6 }
  0x93   :  { %v35_v10 = vsub.f32 %v21_v1, %v33_v8  ;;  %v38_v11 = vsel %vm24_vm0, %v36_v9, 0.0 }
  0x94   :  { %39 = vadd.xlane.f32.xlu1 %v38_v11 }
  0x95   :  { %v37_v12 = vmul.f32 %v35_v10, %v35_v10 }
  0x97   :  { %v41_v13 = vsel %vm24_vm0, %v37_v12, 0.0 }
  0x98   :  { %42 = vadd.xlane.f32.xlu1 %v41_v13 }
 0x11d   :  { %v40_v18 = vpop.xlane.xlu1 %39 }
 0x11e   :  { %v44_v19 = vmul.f32 0.03125, %v40_v18 }
 0x120   :  { %v46_v20 = vadd.f32 1e-05, %v44_v19 }
 0x121   :  { %v43_v21 = vpop.xlane.xlu1 %42 }
 0x122   :  { %189 = vrsqrt.f32 %v46_v20  ;;  %v45_v22 = vmul.f32 0.03125, %v43_v21 }
 0x124   :  { %v47_v23 = vadd.f32 1e-05, %v45_v22 }
 0x126   :  { %191 = vrsqrt.f32 %v47_v23 }
 0x12f   :  { %v190_v24 = vpop.eup %189 }
 0x130   :  { %v50_v26 = vmul.f32 %v190_v24, %v34_v6 }
 0x132   :  { %v58_v28 = vmul.f32 %v167_v25, %v50_v26 }
 0x133   :  { %v192_v29 = vpop.eup %191 }
 0x134   :  { %v51_v30 = vmul.f32 %v192_v29, %v35_v10  ;;  %v66_v31 = vadd.f32 %v168_v27, %v58_v28 }
 0x136   :  { %v59_v32 = vmul.f32 %v167_v25, %v51_v30  ;;  %186 = vmatprep.mubr.msk.f32.mxu0 %vm24_vm0, %v66_v31 }
 0x138   :  { %v67_v33 = vadd.f32 %v168_v27, %v59_v32 }
 0x13a   :  { %187 = vmatmul.mubr.msk.f32.vlgmr.msra.gmra.mxu0 %vm24_vm0, %v67_v33 }
 0x1fa   :  { %v188_v35 = vpop.f32.mrf.mxu0 }
 0x1fb   :  { %v157_v36 = vadd.f32 %v188_v35, %v169_v34 }
 0x1fc   :  { %v151_v37 = vpop.f32.mrf.mxu0 }
 0x1fd   :  { %162 = vst.msk [vmem:[%s267_s5 + $0x8] sm:$0xff] %vm160_vm1, %v157_v36  ;;  %v152_v38 = vadd.f32 %v169_v34, %v151_v37 }
 0x1ff   :  { %161 = vst.msk [vmem:[%s267_s5] sm:$0xff] %vm160_vm1, %v152_v38 }

// kernel: clusters_finder_forward.13
= control target key start
LH: loop header
LB: loop body
LE: loop exit
PB: predicated region body
PF: predicated region fallthrough
CT: control target
= control target key end

     0   :  { %s4142_s0 = inlined_call_operand.vmem [shape: f32[2,8,32], index: 0, kind: input, shape index: {}]   ;;  %s4143_s1 = inlined_call_operand.vmem [shape: f32[2,8,32], index: 1, kind: input, shape index: {}]   ;;  %s4144_s2 = inlined_call_operand.vmem [shape: f32[2,8,8], index: 2, kind: input, shape index: {}]   ;;  %s4145_s3 = inlined_call_operand.vmem [shape: f32[2,1,8], index: 3, kind: input, shape index: {}]   ;;  %s4146_s4 = inlined_call_operand.vmem [shape: f32[32,96], index: 4, kind: input, shape index: {}]   ;;  %s4147_s5 = inlined_call_operand.vmem [shape: f32[1,96], index: 5, kind: input, shape index: {}]   ;;  %s4148_s6 = inlined_call_operand.vmem [shape: f32[32,32], index: 6, kind: input, shape index: {}]   ;;  %s4149_s7 = inlined_call_operand.vmem [shape: f32[1,32], index: 7, kind: input, shape index: {}]   ;;  %s4150_s8 = inlined_call_operand.vmem [shape: f32[1,32], index: 8, kind: input, shape index: {}]   ;;  %s4151_s9 = inlined_call_operand.vmem [shape: f32[1,32], index: 9, kind: input, shape index: {}]   ;;  %s4152_s10 = inlined_call_operand.vmem [shape: f32[32,32], index: 10, kind: input, shape index: {}]   ;;  %s4153_s11 = inlined_call_operand.vmem [shape: f32[1,32], index: 11, kind: input, shape index: {}]   ;;  %s4154_s12 = inlined_call_operand.vmem [shape: f32[32,64], index: 12, kind: input, shape index: {}]   ;;  %s4155_s13 = inlined_call_operand.vmem [shape: f32[1,64], index: 13, kind: input, shape index: {}]   ;;  %s4156_s14 = inlined_call_operand.vmem [shape: f32[32,32], index: 14, kind: input, shape index: {}]   ;;  %s4157_s15 = inlined_call_operand.vmem [shape: f32[1,32], index: 15, kind: input, shape index: {}]   ;;  %s4158_s16 = inlined_call_operand.vmem [shape: f32[1,32], index: 16, kind: input, shape index: {}]   ;;  %s4159_s17 = inlined_call_operand.vmem [shape: f32[1,32], index: 17, kind: input, shape index: {}]   ;;  %s4160_s18 = inlined_call_operand.vmem [shape: f32[32,64], index: 18, kind: input, shape index: {}]   ;;  %s4161_s19 = inlined_call_operand.hbm [shape: f32[1,64], index: 19, kind: input, shape index: {}]   ;;  %s4162_s20 = inlined_call_operand.vmem [shape: f32[64,32], index: 20, kind: input, shape index: {}]   ;;  %s4163_s21 = inlined_call_operand.hbm [shape: f32[1,32], index: 21, kind: input, shape index: {}]   ;;  %s4164_s22 = inlined_call_operand.hbm [shape: f32[1,32], index: 22, kind: input, shape index: {}]   ;;  %s4165_s23 = inlined_call_operand.hbm [shape: f32[1,32], index: 23, kind: input, shape index: {}]   ;;  %s4166_s24 = inlined_call_operand.vmem [shape: f32[2,8,32], index: 24, kind: output, shape index: {}]  }
   0x1   :  { %4183 = sst [smem:[#allocation12_spill]] %s4142_s0 }
   0x2   :  { %4184 = sst [smem:[#allocation13_spill]] %s4143_s1 }
   0x3   :  { %4185 = sst [smem:[#allocation14_spill]] %s4144_s2 }
   0x4   :  { %4186 = sst [smem:[#allocation15_spill]] %s4145_s3 }
   0x5   :  { %4187 = sst [smem:[#allocation16_spill]] %s4146_s4 }
   0x6   :  { %4188 = sst [smem:[#allocation17_spill]] %s4147_s5 }
   0x7   :  { %4189 = sst [smem:[#allocation18_spill]] %s4148_s6 }
   0x8   :  { %4190 = sst [smem:[#allocation19_spill]] %s4149_s7 }
   0x9   :  { %4191 = sst [smem:[#allocation20_spill]] %s4150_s8 }
   0xa   :  { %29 = vsyncpa [#allocation3], 0 }
   0xb   :  { %30 = vsyncpa [#allocation5], 0 }
   0xc   :  { %31 = vsyncpa [#allocation8], 0  ;;  %s3694_s5 = smov 0  }
   0xd LB: > { %s3700_s26 = sadd.s32 4294967295, %s3547_s5   ;;  %p3024_p0 = scmp.ge.s32.totalorder %s3547_s5, 1  ;;  %s3547_s5 = sphi %s3694_s5, %s37_s5  }
   0xe   : > { %p592_p1 = scmp.lt.s32.totalorder %s3547_s5, 3  ;;  %p4169_p2 = scmp.eq.s32.totalorder %s3700_s26, 0 }
   0xf   : > { %s3549_s27 = smov [#allocation4]   ;;  %s3550_s2 = smov [#allocation2]  }
  0x10   : > { %s664_s28 = sshll.u32 %s3549_s27, 4  ;;  %p3705_p3 = pnand %p3024_p0, %p592_p1  ;;  %s665_s28 = int_to_ptr.vmem [resolvable:$true] %s664_s28 }
  0x11   : > { %s650_s29 = sshll.u32 %s3550_s2, 4  ;;  %s3551_s0 = smov [#allocation6]   ;;  %s651_s29 = int_to_ptr.vmem [resolvable:$true] %s650_s29 }
  0x12   : > { %p3338_p4 = pneg %p3705_p3  ;;  %s675_s7 = sshll.u32 %s3551_s0, 4  ;;  %s3717_s7 = int_to_ptr.vmem [resolvable:$true] %s675_s7 }
  0x13   : > { %s3552_s3 = smov [#allocation7]   ;;  %s3436_s8 = scalar_lea.vmem %s665_s28, 16 }
  0x14   : > { %p3713_p5 = pnand %p4169_p2, %p3338_p4  ;;  %s686_s25 = sshll.u32 %s3552_s3, 4  ;;  %s3719_s25 = int_to_ptr.vmem [resolvable:$true] %s686_s25 }
  0x15   : > { %p3437_p7 = scmp.ne.s32.totalorder %s665_s28, %s3436_s8  ;;  %s3443_s4 = scalar_lea.vmem %s665_s28, 32 }
  0x16   : > { %p3427_p6 = pneg %p3713_p5  ;;  %p3444_p10 = scmp.lt.s32.totalorder %s665_s28, %s665_s28 }
  0x17   : > { %p3445_p11 = scmp.lt.s32.totalorder %s3443_s4, %s3436_s8 }
  0x18   : > { %p3439_p8 = pnand %p3437_p7, %p3427_p6 }
  0x19   : > { %p3446_p12 = por %p3445_p11, %p3444_p10 }
  0x1a   : > { %p3440_p9 = pneg %p3439_p8 }
  0x1c   : > { %p3447_p13 = pnand %p3446_p12, %p3440_p9 }
  0x1e   : > { %3450 = shalt.err (!%p3447_p13)
}
  0x1f   : > { %3344 = dma.hbm_to_vmem [thread:$0]  (!%p3713_p5), %s4163_s21, 16, %s665_s28, [#allocation5]  }
  0x20   : > { %s3462_s2 = scalar_lea.vmem %s651_s29, 16  ;;  %s3469_s0 = scalar_lea.vmem %s651_s29, 32 }
  0x21   : > { %p3463_p0 = scmp.ne.s32.totalorder %s651_s29, %s3462_s2  ;;  %p3470_p7 = scmp.lt.s32.totalorder %s651_s29, %s651_s29 }
  0x22   : > { %p3471_p8 = scmp.lt.s32.totalorder %s3469_s0, %s3462_s2 }
  0x23   : > { %p3465_p1 = pnand %p3463_p0, %p3427_p6 }
  0x24   : > { %p3472_p2 = por %p3471_p8, %p3470_p7 }
  0x25   : > { %p3466_p4 = pneg %p3465_p1 }
  0x27   : > { %p3473_p10 = pnand %p3472_p2, %p3466_p4 }
  0x29   : > { %3476 = shalt.err (!%p3473_p10)
}
  0x2a   : > { %3341 = dma.hbm_to_vmem [thread:$0]  (!%p3713_p5), %s4161_s19, 16, %s651_s29, [#allocation3]  }
  0x2b   : > { %s3488_s28 = scalar_lea.vmem %s3717_s7, 16  ;;  %s3495_s4 = scalar_lea.vmem %s3717_s7, 32 }
  0x2c   : > { %p3489_p9 = scmp.ne.s32.totalorder %s3717_s7, %s3488_s28  ;;  %p3496_p2 = scmp.lt.s32.totalorder %s3717_s7, %s3717_s7 }
  0x2d   : > { %p3497_p13 = scmp.lt.s32.totalorder %s3495_s4, %s3488_s28 }
  0x2e   : > { %p3491_p11 = pnand %p3489_p9, %p3427_p6 }
  0x2f   : > { %p3498_p0 = por %p3497_p13, %p3496_p2 }
  0x30   : > { %p3492_p12 = pneg %p3491_p11 }
  0x32   : > { %p3499_p1 = pnand %p3498_p0, %p3492_p12 }
  0x34   : > { %3502 = shalt.err (!%p3499_p1)
}
  0x35   : > { %3347 = dma.hbm_to_vmem [thread:$0]  (!%p3713_p5), %s4164_s22, 16, %s3717_s7, [#allocation5]  }
  0x36   : > { %s3514_s29 = scalar_lea.vmem %s3719_s25, 16  ;;  %s3521_s2 = scalar_lea.vmem %s3719_s25, 32 }
  0x37   : > { %p3515_p4 = scmp.ne.s32.totalorder %s3719_s25, %s3514_s29  ;;  %p3522_p10 = scmp.lt.s32.totalorder %s3719_s25, %s3719_s25 }
  0x38   : > { %p3523_p9 = scmp.lt.s32.totalorder %s3521_s2, %s3514_s29 }
  0x39   : > { %p3517_p7 = pnand %p3515_p4, %p3427_p6 }
  0x3a   : > { %p3524_p11 = por %p3523_p9, %p3522_p10 }
  0x3b   : > { %p3518_p8 = pneg %p3517_p7 }
  0x3d   : > { %p3525_p12 = pnand %p3524_p11, %p3518_p8 }
  0x3f   : > { %3528 = shalt.err (!%p3525_p12)
}
  0x40   : > { %3350 = dma.hbm_to_vmem [thread:$0]  (!%p3713_p5), %s4165_s23, 16, %s3719_s25, [#allocation8]  }
  0x41   : > { %726 = sbr.rel (%p3705_p3) target bundleno = 3819 (0xeeb), region = 116  ;;  %p4194_p6 = scmp.eq.s32.totalorder (!%p3705_p3), %s3700_s26, 0 }
  0x46   : > { %3534 = dma.done.wait (%p4194_p6), [#allocation3], 16   ;;  %p4195_p2 = pmov %p4194_p6 }
  0x48   : > { %3536 = vsyncadd (%p4195_p2), [#allocation3], 4294967280  ;;  %p4196_p13 = pmov %p4195_p2 }
  0x49   : > { %p4197_p0 = pmov %p4195_p2 }
  0x4a   : > { %3538 = dma.done.wait (%p4196_p13), [#allocation5], 32  }
  0x4b   : > { %3540 = vsyncadd (%p4197_p0), [#allocation5], 4294967264  ;;  %p4198_p1 = pmov %p4197_p0 }
  0x4c   : > { %p4199_p5 = pmov %p4197_p0 }
  0x4d   : > { %3542 = dma.done.wait (%p4198_p1), [#allocation8], 16  }
  0x4e   : > { %3544 = vsyncadd (%p4199_p5), [#allocation8], 4294967280  ;;  %p813_p3 = scmp.lt.s32.totalorder %s3700_s26, 1  ;;  %v3553_v0 = vmov 0.0   ;;  %vm3554_vm0 = vmmov 0   ;;  %s4200_s25 = sld [smem:[#allocation16_spill]] }
  0x4f   : > { %3157 = vmatprep.subr.mxu1 %v3553_v0  ;;  %3165 = vmatprep.mubr.msk.f32.mxu1 %vm3554_vm0, %v3553_v0  ;;  %s4201_s2 = sld [smem:[#allocation12_spill]]  ;;  %vm845_vm1 = vcmask 261120   ;;  %s4181_s4 = smov 120   ;;  %vm923_vm2 = vcmask 64512   ;;  %vm1601_vm3 = vcmask 130048   ;;  %vm1603_vm4 = vcmask 195584  }
  0x50   : > { %s4220_s26 = smov (!%p813_p3, %s3700_s26), 1  ;;  %3178 = vmatprep.subr.mxu0 %v3553_v0  ;;  %3180 = vmatprep.mubr.msk.f32.mxu0 %vm3554_vm0, %v3553_v0  ;;  %s4202_s28 = sld [smem:[#allocation17_spill]]  ;;  %vm2790_vm5 = vcmask 523264  }
  0x51   : > { %s3792_s6 = sshll.u32 %s4220_s26, 3  ;;  %s4173_s1 = smov 96  }
  0x52   : > { %s4172_s27 = smov 80   ;;  %s4170_s29 = smov 88  }
  0x53   : > { %s4177_s3 = smov 104   ;;  %s4203_s8 = sld [smem:[#allocation14_spill]] }
  0x54   : > { %v837_v1 = vld [vmem:[%s4200_s25 + $0x18] sm:$0xff]  ;;  %v836_v2 = vld [vmem:[%s4200_s25 + $0x10] sm:$0xff]  ;;  %v835_v3 = vld [vmem:[%s4200_s25 + $0x8] sm:$0xff]  ;;  %s3562_s7 = smov 56   ;;  %s3563_s30 = smov 64  }
  0x55   : > { %3158 = vmatpush3.msra.mxu1 %v837_v1  ;;  %s816_s0 = scalar_lea.vmem %s4201_s2, %s3792_s6  ;;  %v834_v4 = vld [vmem:[%s4200_s25] sm:$0xff]  ;;  %s4171_s2 = smov 72  }
  0x56   : > { %3159 = vmatprep.subr.mxu1 %v3553_v0  ;;  %v3812_v5 = vld [vmem:[%s816_s0] sm:$0xff]  ;;  %s4179_s0 = smov 112  }
  0x57   : > { %3160 = vmatpush3.msra.mxu1 %v836_v2  ;;  %v3039_v6 = vld [vmem:[%s4202_s28] ss:$0 sm:$0xff] }
  0x58   : > { %3161 = vmatprep.subr.mxu1 %v3553_v0 }
  0x59   : > { %3162 = vmatpush3.msra.mxu1 %v835_v3  ;;  %s824_s28 = scalar_lea.vmem %s4203_s8, %s3792_s6  ;;  %s3564_s8 = smov 40  }
  0x5a   : > { %3163 = vmatprep.subr.mxu1 %v3553_v0  ;;  %v919_v18 = vld [vmem:[%s824_s28] sm:$0xff]  ;;  %s3565_s28 = smov 48  }
  0x5b   : > { %3164 = vmatpush3.msra.mxu1 %v834_v4 }
  0x5c   : > { %3166 = vmatmul.mubr.msk.f32.vlgmr.msra.gmra.mxu1 %vm845_vm1, %v3812_v5  ;;  %3168 = vmatprep.subr.mxu1 %v3553_v0 }
  0x5d   : > { %3170 = vmatprep.mubr.msk.f32.mxu1 %vm3554_vm0, %v3553_v0 }
 0x11c   : > { %v915_v7 = vpop.f32.mrf.mxu1 }
 0x11d   : > { %v3823_v8 = vadd.f32 %v3039_v6, %v915_v7 }
 0x11e   : > { %v3167_v9 = vpop.f32.mrf.mxu1 }
 0x11f   : > { %1087 = vrot.lane.b32.xlu1 %v3823_v8, %s4181_s4  ;;  %921 = vrot.lane.b32.xlu0 %v3823_v8, %s4173_s1  ;;  %s4174_s1 = smov 24  }
 0x123   : > { %1256 = vrot.lane.b32.xlu1 %v3823_v8, %s4172_s27  ;;  %1089 = vrot.lane.b32.xlu0 %v3823_v8, %s4170_s29  ;;  %s4175_s29 = smov 16  }
 0x127   : > { %1423 = vrot.lane.b32.xlu1 %v3823_v8, %s4171_s2  ;;  %1254 = vrot.lane.b32.xlu0 %v3823_v8, %s4179_s0  ;;  %s4205_s2 = sld [smem:[#allocation19_spill]] }
 0x128   : > { %s4206_s0 = sld [smem:[#allocation13_spill]] }
 0x12b   : > { %1421 = vrot.lane.b32.xlu0 %v3823_v8, %s4177_s3  ;;  %s4209_s3 = smov 112  }
 0x12e   : > { %s820_s4 = scalar_lea.vmem %s4206_s0, %s3792_s6 }
 0x191   : > { %v1088_v10 = vpop.permute.xlu1 %1087  ;;  %v922_v11 = vpop.permute.xlu0 %921 }
 0x192   : > { %3169 = vmatpush3.xpose.msk.msra.mxu1 %vm923_vm2, %v922_v11 }
 0x193   : > { %3173 = vmatprep.subr.mxu1 %v3553_v0 }
 0x195   : > { %3171 = vmatmul.mubr.msk.f32.vlgmr.msra.gmra.mxu1 %vm923_vm2, %v3823_v8  ;;  %v1090_v12 = vpop.permute.xlu0 %1089  ;;  %v1257_v13 = vpop.permute.xlu1 %1256 }
 0x196   : > { %3179 = vmatpush3.xpose.msk.msra.mxu0 %vm923_vm2, %v1090_v12  ;;  %3175 = vmatprep.mubr.msk.f32.mxu1 %vm3554_vm0, %v3553_v0 }
 0x197   : > { %3188 = vmatprep.subr.mxu0 %v3553_v0 }
 0x199   : > { %3181 = vmatmul.mubr.msk.f32.vlgmr.msra.gmra.mxu0 %vm923_vm2, %v1088_v10  ;;  %v1255_v14 = vpop.permute.xlu0 %1254  ;;  %v1424_v15 = vpop.permute.xlu1 %1423 }
 0x19a   : > { %3189 = vmatpush3.xpose.msk.msra.mxu0 %vm923_vm2, %v1257_v13  ;;  %3190 = vmatprep.mubr.msk.f32.mxu0 %vm3554_vm0, %v3553_v0 }
 0x19b   : > { %3198 = vmatprep.subr.mxu0 %v3553_v0 }
 0x19d   : > { %3191 = vmatmul.mubr.msk.f32.vlgmr.msra.gmra.mxu0 %vm923_vm2, %v1255_v14  ;;  %v1422_v16 = vpop.permute.xlu0 %1421 }
 0x19e   : > { %3199 = vmatpush3.xpose.msk.msra.mxu0 %vm923_vm2, %v1424_v15  ;;  %3200 = vmatprep.mubr.msk.f32.mxu0 %vm3554_vm0, %v3553_v0 }
 0x19f   : > { %3208 = vmatprep.subr.mxu0 %v3553_v0 }
 0x1a1   : > { %3201 = vmatmul.mubr.msk.f32.vlgmr.msra.gmra.mxu0 %vm923_vm2, %v1422_v16 }
 0x1a2   : > { %3216 = vmatprep.mubr.msk.f32.mxu0 %vm3554_vm0, %v3553_v0 }
 0x255   : > { %v994_v17 = vpop.f32.mrf.mxu1 }
 0x256   : > { %v998_v19 = vmul.f32 0.35355338, %v994_v17 }
 0x257   : > { %v3172_v20 = vpop.f32.mrf.mxu1 }
 0x258   : > { %v999_v21 = vadd.f32 %v998_v19, %v919_v18 }
 0x259   : > { %v1161_v22 = vpop.f32.mrf.mxu0 }
 0x25a   : > { %v1165_v23 = vmul.f32 0.35355338, %v1161_v22  ;;  %v1000_v24 = vsel %vm923_vm2, %v999_v21, -inf }
 0x25b   : > { %v3182_v25 = vpop.f32.mrf.mxu0  ;;  %1001 = vmax.xlane.f32.xlu1 %v1000_v24 }
 0x25c   : > { %v1166_v26 = vadd.f32 %v1165_v23, %v919_v18 }
 0x25d   : > { %v1328_v27 = vpop.f32.mrf.mxu0 }
 0x25e   : > { %v1332_v28 = vmul.f32 0.35355338, %v1328_v27  ;;  %v1167_v29 = vsel %vm923_vm2, %v1166_v26, -inf }
 0x25f   : > { %1168 = vmax.xlane.f32.xlu0 %v1167_v29  ;;  %v3192_v30 = vpop.f32.mrf.mxu0 }
 0x260   : > { %v1333_v31 = vadd.f32 %v1332_v28, %v919_v18  ;;  %v3053_v30 = vld [vmem:[%s4205_s2] ss:$0 sm:$0xff]  ;;  %s4210_s2 = smov 104  }
 0x261   : > { %v1495_v32 = vpop.f32.mrf.mxu0 }
 0x262   : > { %v1334_v33 = vsel %vm923_vm2, %v1333_v31, -inf  ;;  %v1499_v35 = vmul.f32 0.35355338, %v1495_v32 }
 0x263   : > { %1335 = vmax.xlane.f32.xlu0 %v1334_v33  ;;  %v3202_v34 = vpop.f32.mrf.mxu0 }
 0x264   : > { %v1500_v36 = vadd.f32 %v1499_v35, %v919_v18 }
 0x266   : > { %v1501_v37 = vsel %vm923_vm2, %v1500_v36, -inf }
 0x26c   : > { %1176 = vrot.lane.b32.xlu1 %v3823_v8, %s3562_s7  ;;  %s4176_s7 = smov 8  }
 0x279   : > { %1009 = vrot.lane.b32.xlu0 %v3823_v8, %s3563_s30 }
 0x27d   : > { %1510 = vrot.lane.b32.xlu0 %v3823_v8, %s3564_s8  ;;  %s4212_s8 = sld [smem:[#allocation15_spill]] }
 0x283   : > { %s827_s0 = scalar_lea.vmem %s4212_s8, %s4220_s26  ;;  %s4213_s26 = smov 80  }
 0x290   : > { %1502 = vmax.xlane.f32.xlu1 %v1501_v37 }
 0x2a1   : > { %1343 = vrot.lane.b32.xlu1 %v3823_v8, %s3565_s28  ;;  %s4204_s28 = sld [smem:[#allocation18_spill]] }
 0x2a7   : > { %v1608_v8 = vld [vmem:[%s4204_s28 + $0x18] sm:$0xff]  ;;  %v1607_v9 = vld [vmem:[%s4204_s28 + $0x10] sm:$0xff]  ;;  %v1606_v10 = vld [vmem:[%s4204_s28 + $0x8] sm:$0xff] }
 0x2a8   : > { %3209 = vmatpush3.msra.mxu0 %v1608_v8  ;;  %v1605_v16 = vld [vmem:[%s4204_s28] sm:$0xff] }
 0x2a9   : > { %3210 = vmatprep.subr.mxu0 %v3553_v0 }
 0x2aa   : > { %3211 = vmatpush3.msra.mxu0 %v1607_v9 }
 0x2ab   : > { %3212 = vmatprep.subr.mxu0 %v3553_v0 }
 0x2ac   : > { %3213 = vmatpush3.msra.mxu0 %v1606_v10 }
 0x2ad   : > { %3214 = vmatprep.subr.mxu0 %v3553_v0 }
 0x2ae   : > { %3215 = vmatpush3.msra.mxu0 %v1605_v16 }
 0x2af   : > { %3230 = vmatprep.subr.mxu0 %v3553_v0 }
 0x2e4   : > { %v1002_v38 = vpop.xlane.xlu1 %1001 }
 0x2e5   : > { %v1003_v39 = vsub.f32 %v999_v21, %v1002_v38 }
 0x2e7   : > { %v1004_v40 = vmul.f32 1.442695, %v1003_v39 }
 0x2e8   : > { %v1169_v41 = vpop.xlane.xlu0 %1168  ;;  %v1177_v49 = vpop.permute.xlu1 %1176 }
 0x2e9   : > { %3387 = vpow2.f32 %v1004_v40  ;;  %v1170_v42 = vsub.f32 %v1166_v26, %v1169_v41  ;;  %v1807_v41 = vld [vmem:[%s4154_s12 + $0x18] sm:$0xff] }
 0x2eb   : > { %v1171_v43 = vmul.f32 1.442695, %v1170_v42  ;;  %v1805_v42 = vld [vmem:[%s4154_s12 + $0x8] sm:$0xff] }
 0x2ec   : > { %v1336_v44 = vpop.xlane.xlu0 %1335 }
 0x2ed   : > { %3389 = vpow2.f32 %v1171_v43  ;;  %v1337_v45 = vsub.f32 %v1333_v31, %v1336_v44  ;;  %v1804_v43 = vld [vmem:[%s4154_s12] sm:$0xff] }
 0x2ee   : > { %v833_v44 = vld [vmem:[%s820_s4] sm:$0xff]  ;;  %s4208_s4 = smov 120  }
 0x2ef   : > { %v1338_v46 = vmul.f32 1.442695, %v1337_v45  ;;  %v1723_v45 = vld [vmem:[%s4152_s10 + $0x18] sm:$0xff] }
 0x2f0   : > { %v1010_v47 = vpop.permute.xlu0 %1009 }
 0x2f1   : > { %3391 = vpow2.f32 %v1338_v46  ;;  %3174 = vmatpush3.msra.mxu1 %v1010_v47  ;;  %v1722_v46 = vld [vmem:[%s4152_s10 + $0x10] sm:$0xff]  ;;  %v1721_v47 = vld [vmem:[%s4152_s10 + $0x8] sm:$0xff] }
 0x2f2   : > { %3183 = vmatprep.subr.mxu1 %v3553_v0 }
 0x2f4   : > { %v1511_v59 = vpop.permute.xlu0 %1510 }
 0x2f6   : > { %v3388_v48 = vpop.eup %3387 }
 0x2f7   : > { %3176 = vmatmul.mubr.msk.f32.vlgmr.msra.gmra.mxu1 %vm923_vm2, %v3388_v48  ;;  %v1006_v54 = vsel %vm923_vm2, %v3388_v48, 0.0  ;;  %v1720_v48 = vld [vmem:[%s4152_s10] sm:$0xff] }
 0x2f8   : > { %3184 = vmatpush3.msra.mxu1 %v1177_v49  ;;  %3185 = vmatprep.mubr.msk.f32.mxu1 %vm3554_vm0, %v3553_v0 }
 0x2f9   : > { %3193 = vmatprep.subr.mxu1 %v3553_v0 }
 0x2fa   : > { %v3390_v50 = vpop.eup %3389 }
 0x2fb   : > { %3186 = vmatmul.mubr.msk.f32.vlgmr.msra.gmra.mxu1 %vm923_vm2, %v3390_v50  ;;  %v1173_v51 = vsel %vm923_vm2, %v3390_v50, 0.0 }
 0x2fc   : > { %1174 = vadd.xlane.f32.xlu1 %v1173_v51  ;;  %3195 = vmatprep.mubr.msk.f32.mxu1 %vm3554_vm0, %v3553_v0 }
 0x2fe   : > { %v3392_v52 = vpop.eup %3391 }
 0x2ff   : > { %v1340_v53 = vsel %vm923_vm2, %v3392_v52, 0.0 }
 0x300   : > { %1341 = vadd.xlane.f32.xlu0 %v1340_v53  ;;  %1007 = vadd.xlane.f32.xlu1 %v1006_v54 }
 0x319   : > { %v1503_v55 = vpop.xlane.xlu1 %1502 }
 0x31a   : > { %v1504_v56 = vsub.f32 %v1500_v36, %v1503_v55  ;;  %v3056_v55 = vld [vmem:[%s4151_s9] ss:$0 sm:$0xff] }
 0x31c   : > { %v1505_v57 = vmul.f32 1.442695, %v1504_v56 }
 0x31d   : > { %v1344_v58 = vpop.permute.xlu1 %1343 }
 0x31e   : > { %3393 = vpow2.f32 %v1505_v57  ;;  %3194 = vmatpush3.msra.mxu1 %v1344_v58  ;;  %v3059_v58 = vld [vmem:[%s4155_s13] ss:$0 sm:$0xff] }
 0x31f   : > { %3196 = vmatmul.mubr.msk.f32.vlgmr.msra.gmra.mxu1 %vm923_vm2, %v3392_v52  ;;  %3203 = vmatprep.subr.mxu1 %v3553_v0 }
 0x320   : > { %3204 = vmatpush3.msra.mxu1 %v1511_v59  ;;  %3205 = vmatprep.mubr.msk.f32.mxu1 %vm3554_vm0, %v3553_v0 }
 0x321   : > { %3219 = vmatprep.subr.mxu1 %v3553_v0 }
 0x32b   : > { %v3394_v60 = vpop.eup %3393 }
 0x32c   : > { %3206 = vmatmul.mubr.msk.f32.vlgmr.msra.gmra.mxu1 %vm923_vm2, %v3394_v60  ;;  %v1507_v61 = vsel %vm923_vm2, %v3394_v60, 0.0 }
 0x32d   : > { %1508 = vadd.xlane.f32.xlu0 %v1507_v61  ;;  %3227 = vmatprep.mubr.msk.f32.mxu1 %vm3554_vm0, %v3553_v0 }
 0x32e   : > { %3220 = vmatpush3.msra.mxu1 %v1723_v45 }
 0x32f   : > { %3221 = vmatprep.subr.mxu1 %v3553_v0 }
 0x330   : > { %3222 = vmatpush3.msra.mxu1 %v1722_v46 }
 0x331   : > { %3223 = vmatprep.subr.mxu1 %v3553_v0 }
 0x332   : > { %3224 = vmatpush3.msra.mxu1 %v1721_v47 }
 0x333   : > { %3225 = vmatprep.subr.mxu1 %v3553_v0 }
 0x334   : > { %3226 = vmatpush3.msra.mxu1 %v1720_v48 }
 0x335   : > { %3241 = vmatprep.subr.mxu1 %v3553_v0 }
 0x385   : > { %v1175_v62 = vpop.xlane.xlu1 %1174 }
 0x386   : > { %3395 = vrcp.f32 %v1175_v62 }
 0x389   : > { %v1342_v7 = vpop.xlane.xlu0 %1341  ;;  %v1008_v21 = vpop.xlane.xlu1 %1007 }
 0x38a   : > { %3397 = vrcp.f32 %v1342_v7 }
 0x393   : > { %v3396_v2 = vpop.eup %3395 }
 0x397   : > { %v3398_v12 = vpop.eup %3397 }
 0x3b6   : > { %v1509_v11 = vpop.xlane.xlu0 %1508 }
 0x3b7   : > { %v1081_v63 = vpop.f32.mrf.mxu1  ;;  %3399 = vrcp.f32 %v1509_v11 }
 0x3b8   : > { %3401 = vrcp.f32 %v1008_v21 }
 0x3b9   : > { %v3177_v1 = vpop.f32.mrf.mxu1 }
 0x3bb   : > { %v1248_v3 = vpop.f32.mrf.mxu1 }
 0x3bc   : > { %v1253_v4 = vmul.f32 %v3396_v2, %v1248_v3 }
 0x3bd   : > { %v3187_v6 = vpop.f32.mrf.mxu1 }
 0x3be   : > { %1589 = vrot.lane.b32.xlu0 %v1253_v4, %s4176_s7 }
 0x3c4   : > { %v3400_v17 = vpop.eup %3399 }
 0x3c5   : > { %v3402_v22 = vpop.eup %3401 }
 0x3c6   : > { %v1086_v25 = vmul.f32 %v3402_v22, %v1081_v63  ;;  %v3057_v63 = vld [vmem:[%s4153_s11] ss:$0 sm:$0xff] }
 0x3df   : > { %v1415_v13 = vpop.f32.mrf.mxu1 }
 0x3e0   : > { %v1420_v14 = vmul.f32 %v3398_v12, %v1415_v13  ;;  %v3063_v12 = vld [vmem:[%s827_s0] ss:$0 sm:$0xff] }
 0x3e1   : > { %v3197_v15 = vpop.f32.mrf.mxu1 }
 0x3e2   : > { %1593 = vrot.lane.b32.xlu1 %v1420_v14, %s4175_s29  ;;  %s4207_s29 = sld [smem:[#allocation20_spill]] }
 0x3e8   : > { %v3055_v53 = vld [vmem:[%s4207_s29] ss:$0 sm:$0xff]  ;;  %s4211_s29 = smov 96  }
 0x3ec   : > { %v1582_v18 = vpop.f32.mrf.mxu1 }
 0x3ed   : > { %v1587_v19 = vmul.f32 %v3400_v17, %v1582_v18 }
 0x3ee   : > { %v3207_v20 = vpop.f32.mrf.mxu1 }
 0x3ef   : > { %1597 = vrot.lane.b32.xlu1 %v1587_v19, %s4174_s1 }
 0x430   : > { %v1590_v23 = vpop.permute.xlu0 %1589 }
 0x431   : > { %v1600_v26 = vsel %vm923_vm2, %v1086_v25, %v1590_v23 }
 0x454   : > { %v1594_v24 = vpop.permute.xlu1 %1593 }
 0x455   : > { %v1602_v27 = vsel %vm1601_vm3, %v1600_v26, %v1594_v24 }
 0x461   : > { %v1598_v28 = vpop.permute.xlu1 %1597 }
 0x462   : > { %v1604_v29 = vsel %vm1603_vm4, %v1602_v27, %v1598_v28 }
 0x463   : > { %3217 = vmatmul.mubr.msk.f32.vlgmr.msra.gmra.mxu0 %vm845_vm1, %v1604_v29 }
 0x464   : > { %3238 = vmatprep.mubr.msk.f32.mxu0 %vm3554_vm0, %v3553_v0  ;;  %3231 = vmatpush3.msra.mxu0 %v1807_v41 }
 0x465   : > { %3232 = vmatprep.subr.mxu0 %v3553_v0 }
 0x523   : > { %v1685_v31 = vpop.f32.mrf.mxu0 }
 0x524   : > { %v1686_v32 = vadd.f32 %v3053_v30, %v1685_v31 }
 0x525   : > { %v3218_v33 = vpop.f32.mrf.mxu0 }
 0x526   : > { %v1689_v34 = vadd.f32 %v1686_v32, %v3812_v5  ;;  %v1806_v5 = vld [vmem:[%s4154_s12 + $0x10] sm:$0xff] }
 0x527   : > { %3233 = vmatpush3.msra.mxu0 %v1806_v5 }
 0x528   : > { %v1692_v35 = vsel %vm845_vm1, %v1689_v34, 0.0  ;;  %3234 = vmatprep.subr.mxu0 %v3553_v0 }
 0x529   : > { %1693 = vadd.xlane.f32.xlu0 %v1692_v35  ;;  %3235 = vmatpush3.msra.mxu0 %v1805_v42 }
 0x52a   : > { %3236 = vmatprep.subr.mxu0 %v3553_v0 }
 0x52b   : > { %3237 = vmatpush3.msra.mxu0 %v1804_v43 }
 0x52c   : > { %3239 = vmatmul.mubr.msk.f32.vlgmr.msra.gmra.mxu0 %vm845_vm1, %v833_v44  ;;  %3251 = vmatprep.subr.mxu0 %v3553_v0 }
 0x52d   : > { %3253 = vmatprep.mubr.msk.f32.mxu0 %vm3554_vm0, %v3553_v0 }
 0x5b2   : > { %v1694_v36 = vpop.xlane.xlu0 %1693 }
 0x5b3   : > { %v1696_v37 = vmul.f32 0.03125, %v1694_v36 }
 0x5b5   : > { %v1697_v38 = vsub.f32 %v1689_v34, %v1696_v37 }
 0x5b7   : > { %v1698_v39 = vmul.f32 %v1697_v38, %v1697_v38 }
 0x5b9   : > { %v1699_v40 = vsel %vm845_vm1, %v1698_v39, 0.0 }
 0x5ba   : > { %1700 = vadd.xlane.f32.xlu1 %v1699_v40 }
 0x5ec   : > { %v1884_v59 = vpop.f32.mrf.mxu0 }
 0x5ed   : > { %v3977_v60 = vadd.f32 %v3059_v58, %v1884_v59  ;;  %v2579_v59 = vld [vmem:[%s4156_s14 + $0x18] sm:$0xff] }
 0x5ee   : > { %v3240_v61 = vpop.f32.mrf.mxu0 }
 0x5ef   : > { %2062 = vrot.lane.b32.xlu0 %v3977_v60, %s4208_s4  ;;  %v2578_v61 = vld [vmem:[%s4156_s14 + $0x10] sm:$0xff] }
 0x5f3   : > { %2229 = vrot.lane.b32.xlu0 %v3977_v60, %s4209_s3 }
 0x5f7   : > { %2396 = vrot.lane.b32.xlu0 %v3977_v60, %s4210_s2 }
 0x643   : > { %v1701_v49 = vpop.xlane.xlu1 %1700 }
 0x644   : > { %v1702_v50 = vmul.f32 0.03125, %v1701_v49 }
 0x646   : > { %v1703_v51 = vadd.f32 1e-05, %v1702_v50 }
 0x648   : > { %3403 = vrsqrt.f32 %v1703_v51 }
 0x655   : > { %v3404_v52 = vpop.eup %3403 }
 0x656   : > { %v1705_v54 = vmul.f32 %v3404_v52, %v1697_v38 }
 0x658   : > { %v1712_v56 = vmul.f32 %v3055_v53, %v1705_v54 }
 0x65a   : > { %v3968_v57 = vadd.f32 %v3056_v55, %v1712_v56 }
 0x65c   : > { %3228 = vmatmul.mubr.msk.f32.vlgmr.msra.gmra.mxu1 %vm845_vm1, %v3968_v57 }
 0x65d   : > { %3243 = vmatprep.mubr.msk.f32.mxu1 %vm3554_vm0, %v3553_v0  ;;  %3242 = vmatpush3.xpose.msk.msra.mxu1 %vm923_vm2, %v3977_v60 }
 0x65e   : > { %3246 = vmatprep.subr.mxu1 %v3553_v0 }
 0x661   : > { %v2063_v62 = vpop.permute.xlu0 %2062 }
 0x662   : > { %3252 = vmatpush3.xpose.msk.msra.mxu0 %vm923_vm2, %v2063_v62  ;;  %v2577_v62 = vld [vmem:[%s4156_s14 + $0x8] sm:$0xff] }
 0x663   : > { %3261 = vmatprep.subr.mxu0 %v3553_v0 }
 0x665   : > { %v2230_v4 = vpop.permute.xlu0 %2229 }
 0x669   : > { %v2397_v8 = vpop.permute.xlu0 %2396 }
 0x71c   : > { %v1800_v1 = vpop.f32.mrf.mxu1 }
 0x71d   : > { %v1801_v2 = vadd.f32 %v3057_v63, %v1800_v1  ;;  %v2576_v63 = vld [vmem:[%s4156_s14] sm:$0xff] }
 0x71e   : > { %v3229_v3 = vpop.f32.mrf.mxu1 }
 0x71f   : > { %2060 = vrot.lane.b32.xlu1 %v1801_v2, %s4208_s4  ;;  %3244 = vmatmul.mubr.msk.f32.vlgmr.msra.gmra.mxu1 %vm923_vm2, %v1801_v2  ;;  %s4214_s4 = smov 72  }
 0x720   : > { %3248 = vmatprep.mubr.msk.f32.mxu1 %vm3554_vm0, %v3553_v0 }
 0x723   : > { %2227 = vrot.lane.b32.xlu1 %v1801_v2, %s4209_s3  ;;  %s4215_s3 = smov 88  }
 0x727   : > { %2394 = vrot.lane.b32.xlu1 %v1801_v2, %s4210_s2 }
 0x72b   : > { %1982 = vrot.lane.b32.xlu1 %v3977_v60, %s4211_s29 }
 0x791   : > { %v2061_v6 = vpop.permute.xlu1 %2060 }
 0x792   : > { %3254 = vmatmul.mubr.msk.f32.vlgmr.msra.gmra.mxu0 %vm923_vm2, %v2061_v6 }
 0x793   : > { %3262 = vmatpush3.xpose.msk.msra.mxu0 %vm923_vm2, %v2230_v4  ;;  %3263 = vmatprep.mubr.msk.f32.mxu0 %vm3554_vm0, %v3553_v0 }
 0x794   : > { %3271 = vmatprep.subr.mxu0 %v3553_v0 }
 0x795   : > { %v2228_v7 = vpop.permute.xlu1 %2227 }
 0x796   : > { %3264 = vmatmul.mubr.msk.f32.vlgmr.msra.gmra.mxu0 %vm923_vm2, %v2228_v7 }
 0x797   : > { %3272 = vmatpush3.xpose.msk.msra.mxu0 %vm923_vm2, %v2397_v8  ;;  %3273 = vmatprep.mubr.msk.f32.mxu0 %vm3554_vm0, %v3553_v0 }
 0x798   : > { %3281 = vmatprep.subr.mxu0 %v3553_v0 }
 0x799   : > { %v2395_v9 = vpop.permute.xlu1 %2394 }
 0x79a   : > { %3274 = vmatmul.mubr.msk.f32.vlgmr.msra.gmra.mxu0 %vm923_vm2, %v2395_v9 }
 0x79b   : > { %3289 = vmatprep.mubr.msk.f32.mxu0 %vm3554_vm0, %v3553_v0  ;;  %3282 = vmatpush3.msra.mxu0 %v2579_v59  ;;  %v3080_v59 = vld [vmem:[#allocation4] ss:$0 sm:$0xff] }
 0x79c   : > { %3283 = vmatprep.subr.mxu0 %v3553_v0 }
 0x79d   : > { %v1983_v10 = vpop.permute.xlu1 %1982  ;;  %3284 = vmatpush3.msra.mxu0 %v2578_v61 }
 0x79e   : > { %3247 = vmatpush3.msra.mxu1 %v1983_v10  ;;  %3285 = vmatprep.subr.mxu0 %v3553_v0 }
 0x79f   : > { %3256 = vmatprep.subr.mxu1 %v3553_v0  ;;  %3286 = vmatpush3.msra.mxu0 %v2577_v62 }
 0x7a0   : > { %3287 = vmatprep.subr.mxu0 %v3553_v0 }
 0x7a1   : > { %3288 = vmatpush3.msra.mxu0 %v2576_v63 }
 0x7a2   : > { %3303 = vmatprep.subr.mxu0 %v3553_v0 }
 0x7df   : > { %v1961_v11 = vpop.f32.mrf.mxu1 }
 0x7e0   : > { %v1965_v13 = vmul.f32 0.35355338, %v1961_v11 }
 0x7e1   : > { %v3245_v14 = vpop.f32.mrf.mxu1 }
 0x7e2   : > { %v1972_v15 = vadd.f32 %v3063_v12, %v1965_v13 }
 0x7e4   : > { %v1973_v16 = vsel %vm923_vm2, %v1972_v15, -inf }
 0x7e5   : > { %1974 = vmax.xlane.f32.xlu0 %v1973_v16 }
 0x852   : > { %v2134_v17 = vpop.f32.mrf.mxu0 }
 0x853   : > { %v2138_v18 = vmul.f32 0.35355338, %v2134_v17 }
 0x854   : > { %v3255_v19 = vpop.f32.mrf.mxu0 }
 0x855   : > { %v2139_v20 = vadd.f32 %v3063_v12, %v2138_v18 }
 0x856   : > { %v2301_v21 = vpop.f32.mrf.mxu0 }
 0x857   : > { %v2305_v22 = vmul.f32 0.35355338, %v2301_v21  ;;  %v2140_v23 = vsel %vm923_vm2, %v2139_v20, -inf }
 0x858   : > { %2141 = vmax.xlane.f32.xlu1 %v2140_v23  ;;  %v3265_v24 = vpop.f32.mrf.mxu0  ;;  %v3074_v23 = vld [vmem:[%s4157_s15] ss:$0 sm:$0xff] }
 0x859   : > { %v2306_v25 = vadd.f32 %v3063_v12, %v2305_v22 }
 0x85a   : > { %v2468_v26 = vpop.f32.mrf.mxu0 }
 0x85b   : > { %v2472_v27 = vmul.f32 0.35355338, %v2468_v26  ;;  %v2307_v28 = vsel %vm923_vm2, %v2306_v25, -inf }
 0x85c   : > { %v3275_v29 = vpop.f32.mrf.mxu0  ;;  %2308 = vmax.xlane.f32.xlu0 %v2307_v28 }
 0x85d   : > { %v2473_v30 = vadd.f32 %v3063_v12, %v2472_v27 }
 0x85f   : > { %v2474_v31 = vsel %vm923_vm2, %v2473_v30, -inf }
 0x860   : > { %2475 = vmax.xlane.f32.xlu0 %v2474_v31 }
 0x869   : > { %2316 = vrot.lane.b32.xlu1 %v3977_v60, %s4213_s26  ;;  %s4216_s26 = smov 8  }
 0x86d   : > { %2483 = vrot.lane.b32.xlu1 %v3977_v60, %s4214_s4  ;;  %s4217_s4 = smov 16  }
 0x86e   : > { %v1975_v32 = vpop.xlane.xlu0 %1974 }
 0x86f   : > { %v1976_v33 = vsub.f32 %v1972_v15, %v1975_v32 }
 0x871   : > { %v1977_v34 = vmul.f32 1.442695, %v1976_v33 }
 0x873   : > { %3405 = vpow2.f32 %v1977_v34  ;;  %v2693_v34 = vld [vmem:[%s4160_s18 + $0x18] sm:$0xff] }
 0x876   : > { %2149 = vrot.lane.b32.xlu0 %v3977_v60, %s4215_s3  ;;  %s4218_s3 = smov 24  }
 0x880   : > { %v3406_v35 = vpop.eup %3405 }
 0x881   : > { %3249 = vmatmul.mubr.msk.f32.vlgmr.msra.gmra.mxu1 %vm923_vm2, %v3406_v35  ;;  %v1979_v53 = vsel %vm923_vm2, %v3406_v35, 0.0  ;;  %v2692_v35 = vld [vmem:[%s4160_s18 + $0x10] sm:$0xff] }
 0x882   : > { %3258 = vmatprep.mubr.msk.f32.mxu1 %vm3554_vm0, %v3553_v0 }
 0x8e1   : > { %v2142_v36 = vpop.xlane.xlu1 %2141 }
 0x8e2   : > { %v2143_v37 = vsub.f32 %v2139_v20, %v2142_v36  ;;  %v2690_v36 = vld [vmem:[%s4160_s18] sm:$0xff] }
 0x8e4   : > { %v2144_v38 = vmul.f32 1.442695, %v2143_v37  ;;  %v2782_v37 = vld [vmem:[%s4162_s20 + $0x38] sm:$0xff] }
 0x8e5   : > { %v2309_v39 = vpop.xlane.xlu0 %2308  ;;  %v2317_v45 = vpop.permute.xlu1 %2316 }
 0x8e6   : > { %3407 = vpow2.f32 %v2144_v38  ;;  %v2310_v40 = vsub.f32 %v2306_v25, %v2309_v39  ;;  %v2781_v38 = vld [vmem:[%s4162_s20 + $0x30] sm:$0xff]  ;;  %v2780_v39 = vld [vmem:[%s4162_s20 + $0x28] sm:$0xff] }
 0x8e8   : > { %v2311_v41 = vmul.f32 1.442695, %v2310_v40  ;;  %v2779_v40 = vld [vmem:[%s4162_s20 + $0x20] sm:$0xff] }
 0x8e9   : > { %v2476_v5 = vpop.xlane.xlu0 %2475  ;;  %v2484_v49 = vpop.permute.xlu1 %2483 }
 0x8ea   : > { %3409 = vpow2.f32 %v2311_v41  ;;  %v2477_v42 = vsub.f32 %v2473_v30, %v2476_v5  ;;  %v2778_v41 = vld [vmem:[%s4162_s20 + $0x18] sm:$0xff] }
 0x8ec   : > { %v2478_v43 = vmul.f32 1.442695, %v2477_v42 }
 0x8ed   : > { %v2150_v44 = vpop.permute.xlu0 %2149 }
 0x8ee   : > { %3411 = vpow2.f32 %v2478_v43  ;;  %3257 = vmatpush3.msra.mxu1 %v2150_v44 }
 0x8ef   : > { %3266 = vmatprep.subr.mxu1 %v3553_v0 }
 0x8f3   : > { %v3408_v46 = vpop.eup %3407 }
 0x8f4   : > { %3259 = vmatmul.mubr.msk.f32.vlgmr.msra.gmra.mxu1 %vm923_vm2, %v3408_v46  ;;  %v2146_v47 = vsel %vm923_vm2, %v3408_v46, 0.0 }
 0x8f5   : > { %3267 = vmatpush3.msra.mxu1 %v2317_v45  ;;  %2147 = vadd.xlane.f32.xlu0 %v2146_v47  ;;  %v3076_v45 = vld [vmem:[%s4158_s16] ss:$0 sm:$0xff] }
 0x8f6   : > { %3268 = vmatprep.mubr.msk.f32.mxu1 %vm3554_vm0, %v3553_v0  ;;  %3276 = vmatprep.subr.mxu1 %v3553_v0  ;;  %v3077_v47 = vld [vmem:[%s4159_s17] ss:$0 sm:$0xff] }
 0x8f7   : > { %v3410_v48 = vpop.eup %3409 }
 0x8f8   : > { %3269 = vmatmul.mubr.msk.f32.vlgmr.msra.gmra.mxu1 %vm923_vm2, %v3410_v48  ;;  %v2313_v50 = vsel %vm923_vm2, %v3410_v48, 0.0 }
 0x8f9   : > { %3277 = vmatpush3.msra.mxu1 %v2484_v49  ;;  %2314 = vadd.xlane.f32.xlu1 %v2313_v50  ;;  %v2777_v50 = vld [vmem:[%s4162_s20 + $0x10] sm:$0xff] }
 0x8fa   : > { %3278 = vmatprep.mubr.msk.f32.mxu1 %vm3554_vm0, %v3553_v0  ;;  %3292 = vmatprep.subr.mxu1 %v3553_v0 }
 0x8fb   : > { %v3412_v51 = vpop.eup %3411 }
 0x8fc   : > { %3279 = vmatmul.mubr.msk.f32.vlgmr.msra.gmra.mxu1 %vm923_vm2, %v3412_v51  ;;  %v2480_v52 = vsel %vm923_vm2, %v3412_v51, 0.0  ;;  %v2776_v51 = vld [vmem:[%s4162_s20 + $0x8] sm:$0xff] }
 0x8fd   : > { %2481 = vadd.xlane.f32.xlu0 %v2480_v52  ;;  %3300 = vmatprep.mubr.msk.f32.mxu1 %vm3554_vm0, %v3553_v0  ;;  %v2775_v52 = vld [vmem:[%s4162_s20] sm:$0xff] }
 0x8fe   : > { %3293 = vmatpush3.msra.mxu1 %v2693_v34 }
 0x8ff   : > { %3294 = vmatprep.subr.mxu1 %v3553_v0 }
 0x900   : > { %3295 = vmatpush3.msra.mxu1 %v2692_v35 }
 0x901   : > { %1980 = vadd.xlane.f32.xlu0 %v1979_v53  ;;  %3296 = vmatprep.subr.mxu1 %v3553_v0  ;;  %v3078_v53 = vld [vmem:[#allocation2] ss:$0 sm:$0xff] }
 0x941   : > { %v2054_v54 = vpop.f32.mrf.mxu1 }
 0x943   : > { %v3250_v55 = vpop.f32.mrf.mxu1 }
 0x97e   : > { %v2148_v56 = vpop.xlane.xlu0 %2147 }
 0x97f   : > { %3413 = vrcp.f32 %v2148_v56 }
 0x982   : > { %v2315_v58 = vpop.xlane.xlu1 %2314 }
 0x983   : > { %3415 = vrcp.f32 %v2315_v58 }
 0x986   : > { %v2482_v60 = vpop.xlane.xlu0 %2481 }
 0x987   : > { %3417 = vrcp.f32 %v2482_v60 }
 0x98a   : > { %v1981_v14 = vpop.xlane.xlu0 %1980 }
 0x98b   : > { %3419 = vrcp.f32 %v1981_v14 }
 0x98c   : > { %v3414_v1 = vpop.eup %3413 }
 0x990   : > { %v3416_v6 = vpop.eup %3415 }
 0x994   : > { %v3418_v10 = vpop.eup %3417 }
 0x998   : > { %v3420_v15 = vpop.eup %3419 }
 0x999   : > { %v2059_v17 = vmul.f32 %v3420_v15, %v2054_v54 }
 0x9b4   : > { %v2221_v2 = vpop.f32.mrf.mxu1 }
 0x9b5   : > { %v2226_v3 = vmul.f32 %v3414_v1, %v2221_v2 }
 0x9b6   : > { %v3260_v4 = vpop.f32.mrf.mxu1 }
 0x9b7   : > { %2562 = vrot.lane.b32.xlu1 %v2226_v3, %s4216_s26 }
 0x9b8   : > { %v2388_v7 = vpop.f32.mrf.mxu1 }
 0x9b9   : > { %v2393_v8 = vmul.f32 %v3416_v6, %v2388_v7 }
 0x9ba   : > { %v3270_v9 = vpop.f32.mrf.mxu1 }
 0x9bb   : > { %2566 = vrot.lane.b32.xlu0 %v2393_v8, %s4217_s4 }
 0x9bc   : > { %v2555_v11 = vpop.f32.mrf.mxu1 }
 0x9bd   : > { %v2560_v12 = vmul.f32 %v3418_v10, %v2555_v11  ;;  %v3082_v11 = vld [vmem:[#allocation6] ss:$0 sm:$0xff] }
 0x9be   : > { %v3280_v13 = vpop.f32.mrf.mxu1 }
 0x9bf   : > { %2570 = vrot.lane.b32.xlu1 %v2560_v12, %s4218_s3  ;;  %v3083_v13 = vld [vmem:[#allocation7] ss:$0 sm:$0xff]  ;;  %s831_s3 = scalar_lea.vmem %s4166_s24, %s3792_s6 }
 0xa29   : > { %v2563_v16 = vpop.permute.xlu1 %2562 }
 0xa2a   : > { %v2573_v19 = vsel %vm923_vm2, %v2059_v17, %v2563_v16 }
 0xa2d   : > { %v2567_v18 = vpop.permute.xlu0 %2566 }
 0xa2e   : > { %v2574_v20 = vsel %vm1601_vm3, %v2573_v19, %v2567_v18 }
 0xa31   : > { %v2571_v21 = vpop.permute.xlu1 %2570 }
 0xa32   : > { %v2575_v22 = vsel %vm1603_vm4, %v2574_v20, %v2571_v21 }
 0xa33   : > { %3290 = vmatmul.mubr.msk.f32.vlgmr.msra.gmra.mxu0 %vm845_vm1, %v2575_v22 }
 0xa34   : > { %3319 = vmatprep.mubr.msk.f32.mxu0 %vm3554_vm0, %v3553_v0  ;;  %3304 = vmatpush3.msra.mxu0 %v2782_v37 }
 0xa35   : > { %3305 = vmatprep.subr.mxu0 %v3553_v0 }
 0xa36   : > { %3306 = vmatpush3.msra.mxu0 %v2781_v38 }
 0xa37   : > { %3307 = vmatprep.subr.mxu0 %v3553_v0 }
 0xa38   : > { %3308 = vmatpush3.msra.mxu0 %v2780_v39 }
 0xa39   : > { %3309 = vmatprep.subr.mxu0 %v3553_v0 }
 0xa3a   : > { %3310 = vmatpush3.msra.mxu0 %v2779_v40 }
 0xa3b   : > { %3311 = vmatprep.subr.mxu0 %v3553_v0 }
 0xa3c   : > { %3312 = vmatpush3.msra.mxu0 %v2778_v41 }
 0xa3d   : > { %3313 = vmatprep.subr.mxu0 %v3553_v0 }
 0xa3e   : > { %3314 = vmatpush3.msra.mxu0 %v2777_v50 }
 0xa3f   : > { %3315 = vmatprep.subr.mxu0 %v3553_v0 }
 0xa40   : > { %3316 = vmatpush3.msra.mxu0 %v2776_v51 }
 0xa41   : > { %3317 = vmatprep.subr.mxu0 %v3553_v0 }
 0xa42   : > { %3318 = vmatpush3.msra.mxu0 %v2775_v52 }
 0xaf3   : > { %v2656_v24 = vpop.f32.mrf.mxu0 }
 0xaf4   : > { %v2657_v25 = vadd.f32 %v3074_v23, %v2656_v24 }
 0xaf5   : > { %v3291_v26 = vpop.f32.mrf.mxu0 }
 0xaf6   : > { %v2660_v27 = vadd.f32 %v2657_v25, %v3968_v57  ;;  %v2691_v57 = vld [vmem:[%s4160_s18 + $0x8] sm:$0xff] }
 0xaf7   : > { %3297 = vmatpush3.msra.mxu1 %v2691_v57 }
 0xaf8   : > { %v2663_v28 = vsel %vm845_vm1, %v2660_v27, 0.0  ;;  %3298 = vmatprep.subr.mxu1 %v3553_v0 }
 0xaf9   : > { %2664 = vadd.xlane.f32.xlu1 %v2663_v28  ;;  %3299 = vmatpush3.msra.mxu1 %v2690_v36 }
 0xb82   : > { %v2665_v29 = vpop.xlane.xlu1 %2664 }
 0xb83   : > { %v2666_v30 = vmul.f32 0.03125, %v2665_v29 }
 0xb85   : > { %v2667_v31 = vsub.f32 %v2660_v27, %v2666_v30 }
 0xb87   : > { %v2668_v32 = vmul.f32 %v2667_v31, %v2667_v31 }
 0xb89   : > { %v2669_v33 = vsel %vm845_vm1, %v2668_v32, 0.0 }
 0xb8a   : > { %2670 = vadd.xlane.f32.xlu0 %v2669_v33 }
 0xc13   : > { %v2671_v5 = vpop.xlane.xlu0 %2670 }
 0xc14   : > { %v2672_v42 = vmul.f32 0.03125, %v2671_v5 }
 0xc16   : > { %v2673_v43 = vadd.f32 1e-05, %v2672_v42 }
 0xc18   : > { %3421 = vrsqrt.f32 %v2673_v43 }
 0xc25   : > { %v3422_v44 = vpop.eup %3421 }
 0xc26   : > { %v2675_v46 = vmul.f32 %v3422_v44, %v2667_v31 }
 0xc28   : > { %v2682_v48 = vmul.f32 %v3076_v45, %v2675_v46 }
 0xc2a   : > { %v2689_v49 = vadd.f32 %v3077_v47, %v2682_v48 }
 0xc2c   : > { %3301 = vmatmul.mubr.msk.f32.vlgmr.msra.gmra.mxu1 %vm845_vm1, %v2689_v49 }
 0xcec   : > { %v2770_v54 = vpop.f32.mrf.mxu1 }
 0xced   : > { %v2771_v55 = vadd.f32 %v3078_v53, %v2770_v54 }
 0xcee   : > { %v3302_v56 = vpop.f32.mrf.mxu1 }
 0xcef   : > { %v2774_v58 = vmax.f32 %v2771_v55, 0.0 }
 0xcf1   : > { %3320 = vmatmul.mubr.msk.f32.vlgmr.msra.gmra.mxu0 %vm2790_vm5, %v2774_v58 }
 0xdb1   : > { %v2860_v60 = vpop.f32.mrf.mxu0 }
 0xdb2   : > { %v2861_v61 = vadd.f32 %v3080_v59, %v2860_v60 }
 0xdb3   : > { %v3321_v62 = vpop.f32.mrf.mxu0 }
 0xdb4   : > { %v2864_v63 = vadd.f32 %v2861_v61, %v2689_v49 }
 0xdb6   : > { %v2867_v1 = vsel %vm845_vm1, %v2864_v63, 0.0 }
 0xdb7   : > { %2868 = vadd.xlane.f32.xlu0 %v2867_v1 }
 0xe40   : > { %v2869_v2 = vpop.xlane.xlu0 %2868 }
 0xe41   : > { %v2870_v3 = vmul.f32 0.03125, %v2869_v2 }
 0xe43   : > { %v2871_v0 = vsub.f32 %v2864_v63, %v2870_v3 }
 0xe45   : > { %v2872_v4 = vmul.f32 %v2871_v0, %v2871_v0 }
 0xe47   : > { %v2873_v6 = vsel %vm845_vm1, %v2872_v4, 0.0 }
 0xe48   : > { %2874 = vadd.xlane.f32.xlu1 %v2873_v6 }
 0xed1   : > { %v2875_v7 = vpop.xlane.xlu1 %2874 }
 0xed2   : > { %v2876_v8 = vmul.f32 0.03125, %v2875_v7 }
 0xed4   : > { %v2877_v9 = vadd.f32 1e-05, %v2876_v8 }
 0xed6   : > { %3423 = vrsqrt.f32 %v2877_v9 }
 0xee3   : > { %v3424_v10 = vpop.eup %3423 }
 0xee4   : > { %v2879_v12 = vmul.f32 %v3424_v10, %v2871_v0 }
 0xee6   : > { %v2886_v14 = vmul.f32 %v3082_v11, %v2879_v12 }
 0xee8   : > { %v2893_v15 = vadd.f32 %v3083_v13, %v2886_v14 }
 0xeea   : > { %2894 = vst.msk [vmem:[%s831_s3] sm:$0xff] %vm845_vm1, %v2893_v15 }
 0xeeb PF: > { %s37_s5 = sadd.s32 1, %s3547_s5  }
 0xeec   : > { %p34_p4 = scmp.ge.s32.totalorder %s37_s5, 4  }
 0xeee   :  { %36 = sbr.rel (!%p34_p4) target bundleno = 13 (0xd), region = 172 }
 0xef3   :  { %2914 = vsyncpa [#allocation3], 1 }
 0xef4   :  { %2916 = vsyncpa [#allocation3 + $0x1], 1 }
 0xef5   :  { %2917 = vsyncpa [#allocation5], 1 }
 0xef6   :  { %2918 = vsyncpa [#allocation8], 1 }

// kernel: clusters_finder_forward.14
= control target key start
LH: loop header
LB: loop body
LE: loop exit
PB: predicated region body
PF: predicated region fallthrough
CT: control target
= control target key end

     0   :  { %s3812_s0 = inlined_call_operand.vmem [shape: f32[2,8,32], index: 0, kind: input, shape index: {}]   ;;  %s3813_s1 = inlined_call_operand.vmem [shape: f32[2,8,32], index: 1, kind: input, shape index: {}]   ;;  %s3814_s2 = inlined_call_operand.vmem [shape: f32[2,8,8], index: 2, kind: input, shape index: {}]   ;;  %s3815_s3 = inlined_call_operand.vmem [shape: f32[2,1,8], index: 3, kind: input, shape index: {}]   ;;  %s3816_s4 = inlined_call_operand.vmem [shape: f32[32,96], index: 4, kind: input, shape index: {}]   ;;  %s3817_s5 = inlined_call_operand.vmem [shape: f32[1,96], index: 5, kind: input, shape index: {}]   ;;  %s3818_s6 = inlined_call_operand.vmem [shape: f32[32,32], index: 6, kind: input, shape index: {}]   ;;  %s3819_s7 = inlined_call_operand.vmem [shape: f32[1,32], index: 7, kind: input, shape index: {}]   ;;  %s3820_s8 = inlined_call_operand.vmem [shape: f32[1,32], index: 8, kind: input, shape index: {}]   ;;  %s3821_s9 = inlined_call_operand.vmem [shape: f32[1,32], index: 9, kind: input, shape index: {}]   ;;  %s3822_s10 = inlined_call_operand.vmem [shape: f32[32,32], index: 10, kind: input, shape index: {}]   ;;  %s3823_s11 = inlined_call_operand.vmem [shape: f32[1,32], index: 11, kind: input, shape index: {}]   ;;  %s3824_s12 = inlined_call_operand.vmem [shape: f32[32,64], index: 12, kind: input, shape index: {}]   ;;  %s3825_s13 = inlined_call_operand.vmem [shape: f32[1,64], index: 13, kind: input, shape index: {}]   ;;  %s3826_s14 = inlined_call_operand.vmem [shape: f32[32,32], index: 14, kind: input, shape index: {}]   ;;  %s3827_s15 = inlined_call_operand.vmem [shape: f32[1,32], index: 15, kind: input, shape index: {}]   ;;  %s3828_s16 = inlined_call_operand.vmem [shape: f32[1,32], index: 16, kind: input, shape index: {}]   ;;  %s3829_s17 = inlined_call_operand.vmem [shape: f32[1,32], index: 17, kind: input, shape index: {}]   ;;  %s3830_s18 = inlined_call_operand.vmem [shape: f32[32,64], index: 18, kind: input, shape index: {}]   ;;  %s3831_s19 = inlined_call_operand.vmem [shape: f32[1,64], index: 19, kind: input, shape index: {}]   ;;  %s3832_s20 = inlined_call_operand.vmem [shape: f32[64,32], index: 20, kind: input, shape index: {}]   ;;  %s3833_s21 = inlined_call_operand.vmem [shape: f32[1,32], index: 21, kind: input, shape index: {}]   ;;  %s3834_s22 = inlined_call_operand.vmem [shape: f32[1,32], index: 22, kind: input, shape index: {}]   ;;  %s3835_s23 = inlined_call_operand.vmem [shape: f32[1,32], index: 23, kind: input, shape index: {}]   ;;  %s3836_s24 = inlined_call_operand.vmem [shape: f32[2,8,32], index: 24, kind: output, shape index: {}]  }
   0x1   :  { %3852 = sst [smem:[#allocation2_spill]] %s3812_s0 }
   0x2   :  { %3853 = sst [smem:[#allocation3_spill]] %s3813_s1 }
   0x3   :  { %3854 = sst [smem:[#allocation4_spill]] %s3814_s2 }
   0x4   :  { %3855 = sst [smem:[#allocation5_spill]] %s3815_s3 }
   0x5   :  { %3856 = sst [smem:[#allocation6_spill]] %s3816_s4 }
   0x6   :  { %3857 = sst [smem:[#allocation7_spill]] %s3817_s5  ;;  %s3433_s5 = smov 0  }
   0x7   :  { %3858 = sst [smem:[#allocation8_spill]] %s3818_s6 }
   0x8   :  { %3859 = sst [smem:[#allocation9_spill]] %s3819_s7 }
   0x9   :  { %3860 = sst [smem:[#allocation10_spill]] %s3820_s8 }
   0xa LB: > { %s2930_s26 = sadd.s32 4294967295, %s3290_s5   ;;  %p2934_p0 = scmp.ge.s32.totalorder %s3290_s5, 1  ;;  %s3290_s5 = sphi %s3433_s5, %s34_s5  }
   0xb   : > { %p687_p1 = scmp.lt.s32.totalorder %s3290_s5, 3 }
   0xd   : > { %p688_p2 = pnand %p2934_p0, %p687_p1 }
   0xe   : > { %s3861_s6 = sld [smem:[#allocation6_spill]] (!%p688_p2)  ;;  %p762_p3 = scmp.lt.s32.totalorder (!%p688_p2), %s2930_s26, 1 }
   0xf   : > { %691 = sbr.rel (%p688_p2) target bundleno = 3756 (0xeac), region = 116  ;;  %s3862_s1 = sld [smem:[#allocation2_spill]] (!%p688_p2) }
  0x10   : > { %s3863_s29 = sld [smem:[#allocation7_spill]] (!%p688_p2)  ;;  %s3850_s0 = smov (!%p688_p2), 120  }
  0x11   : > { %s3842_s7 = smov (!%p688_p2), 96   ;;  %s3841_s3 = smov (!%p688_p2), 80  }
  0x12   : > { %s3839_s25 = smov (!%p688_p2), 88   ;;  %s3840_s8 = smov (!%p688_p2), 72  }
  0x13   : > { %s3848_s4 = smov (!%p688_p2), 112   ;;  %s3864_s2 = sld [smem:[#allocation4_spill]] (!%p688_p2) }
  0x14   : > { %v786_v0 = vld [vmem:[%s3861_s6 + $0x18] sm:$0xff]  ;;  %v3292_v1 = vmov 0.0   ;;  %v785_v2 = vld [vmem:[%s3861_s6 + $0x10] sm:$0xff]  ;;  %vm3293_vm0 = vmmov 0   ;;  %s3881_s26 = smov (!%p762_p3, %s2930_s26), 1  ;;  %v784_v3 = vld [vmem:[%s3861_s6 + $0x8] sm:$0xff] }
  0x15   : > { %3057 = vmatprep.subr.mxu1 %v3292_v1  ;;  %3065 = vmatprep.mubr.msk.f32.mxu1 %vm3293_vm0, %v3292_v1  ;;  %s3460_s30 = sshll.u32 %s3881_s26, 3  ;;  %v783_v4 = vld [vmem:[%s3861_s6] sm:$0xff]  ;;  %vm794_vm1 = vcmask 261120   ;;  %vm872_vm2 = vcmask 64512   ;;  %s3302_s28 = smov 64   ;;  %vm1550_vm3 = vcmask 130048  }
  0x16   : > { %3058 = vmatpush3.msra.mxu1 %v786_v0  ;;  %3078 = vmatprep.subr.mxu0 %v3292_v1  ;;  %s765_s27 = scalar_lea.vmem %s3862_s1, %s3460_s30  ;;  %v2939_v6 = vld [vmem:[%s3863_s29] ss:$0 sm:$0xff]  ;;  %s3846_s1 = smov 104   ;;  %vm1552_vm4 = vcmask 195584   ;;  %vm2739_vm5 = vcmask 523264  }
  0x17   : > { %3059 = vmatprep.subr.mxu1 %v3292_v1  ;;  %3080 = vmatprep.mubr.msk.f32.mxu0 %vm3293_vm0, %v3292_v1  ;;  %v3470_v5 = vld [vmem:[%s765_s27] sm:$0xff]  ;;  %s3301_s27 = smov 56  }
  0x18   : > { %3060 = vmatpush3.msra.mxu1 %v785_v2 }
  0x19   : > { %3061 = vmatprep.subr.mxu1 %v3292_v1  ;;  %s773_s29 = scalar_lea.vmem %s3864_s2, %s3460_s30  ;;  %s3303_s2 = smov 40  }
  0x1a   : > { %3062 = vmatpush3.msra.mxu1 %v784_v3  ;;  %v868_v18 = vld [vmem:[%s773_s29] sm:$0xff]  ;;  %s3304_s29 = smov 48  }
  0x1b   : > { %3063 = vmatprep.subr.mxu1 %v3292_v1 }
  0x1c   : > { %3064 = vmatpush3.msra.mxu1 %v783_v4 }
  0x1d   : > { %3066 = vmatmul.mubr.msk.f32.vlgmr.msra.gmra.mxu1 %vm794_vm1, %v3470_v5  ;;  %3068 = vmatprep.subr.mxu1 %v3292_v1 }
  0x1e   : > { %3070 = vmatprep.mubr.msk.f32.mxu1 %vm3293_vm0, %v3292_v1 }
  0xdd   : > { %v864_v7 = vpop.f32.mrf.mxu1 }
  0xde   : > { %v3481_v8 = vadd.f32 %v2939_v6, %v864_v7 }
  0xdf   : > { %v3067_v9 = vpop.f32.mrf.mxu1 }
  0xe0   : > { %1036 = vrot.lane.b32.xlu1 %v3481_v8, %s3850_s0  ;;  %870 = vrot.lane.b32.xlu0 %v3481_v8, %s3842_s7  ;;  %s3843_s7 = smov 24  }
  0xe4   : > { %1205 = vrot.lane.b32.xlu1 %v3481_v8, %s3841_s3  ;;  %1038 = vrot.lane.b32.xlu0 %v3481_v8, %s3839_s25  ;;  %s3844_s25 = smov 16  }
  0xe8   : > { %1372 = vrot.lane.b32.xlu1 %v3481_v8, %s3840_s8  ;;  %1203 = vrot.lane.b32.xlu0 %v3481_v8, %s3848_s4  ;;  %s3866_s8 = sld [smem:[#allocation9_spill]] }
  0xe9   : > { %s3867_s4 = sld [smem:[#allocation3_spill]] }
  0xec   : > { %1370 = vrot.lane.b32.xlu0 %v3481_v8, %s3846_s1  ;;  %s3870_s1 = smov 112  }
  0xef   : > { %s769_s0 = scalar_lea.vmem %s3867_s4, %s3460_s30 }
 0x152   : > { %v1037_v10 = vpop.permute.xlu1 %1036  ;;  %v871_v11 = vpop.permute.xlu0 %870 }
 0x153   : > { %3069 = vmatpush3.xpose.msk.msra.mxu1 %vm872_vm2, %v871_v11 }
 0x154   : > { %3073 = vmatprep.subr.mxu1 %v3292_v1 }
 0x156   : > { %3071 = vmatmul.mubr.msk.f32.vlgmr.msra.gmra.mxu1 %vm872_vm2, %v3481_v8  ;;  %v1039_v12 = vpop.permute.xlu0 %1038  ;;  %v1206_v13 = vpop.permute.xlu1 %1205 }
 0x157   : > { %3079 = vmatpush3.xpose.msk.msra.mxu0 %vm872_vm2, %v1039_v12  ;;  %3075 = vmatprep.mubr.msk.f32.mxu1 %vm3293_vm0, %v3292_v1 }
 0x158   : > { %3088 = vmatprep.subr.mxu0 %v3292_v1 }
 0x15a   : > { %3081 = vmatmul.mubr.msk.f32.vlgmr.msra.gmra.mxu0 %vm872_vm2, %v1037_v10  ;;  %v1204_v14 = vpop.permute.xlu0 %1203  ;;  %v1373_v15 = vpop.permute.xlu1 %1372 }
 0x15b   : > { %3089 = vmatpush3.xpose.msk.msra.mxu0 %vm872_vm2, %v1206_v13  ;;  %3090 = vmatprep.mubr.msk.f32.mxu0 %vm3293_vm0, %v3292_v1 }
 0x15c   : > { %3098 = vmatprep.subr.mxu0 %v3292_v1 }
 0x15e   : > { %3091 = vmatmul.mubr.msk.f32.vlgmr.msra.gmra.mxu0 %vm872_vm2, %v1204_v14  ;;  %v1371_v16 = vpop.permute.xlu0 %1370 }
 0x15f   : > { %3099 = vmatpush3.xpose.msk.msra.mxu0 %vm872_vm2, %v1373_v15  ;;  %3100 = vmatprep.mubr.msk.f32.mxu0 %vm3293_vm0, %v3292_v1 }
 0x160   : > { %3108 = vmatprep.subr.mxu0 %v3292_v1 }
 0x162   : > { %3101 = vmatmul.mubr.msk.f32.vlgmr.msra.gmra.mxu0 %vm872_vm2, %v1371_v16 }
 0x163   : > { %3116 = vmatprep.mubr.msk.f32.mxu0 %vm3293_vm0, %v3292_v1 }
 0x216   : > { %v943_v17 = vpop.f32.mrf.mxu1 }
 0x217   : > { %v947_v19 = vmul.f32 0.35355338, %v943_v17 }
 0x218   : > { %v3072_v20 = vpop.f32.mrf.mxu1 }
 0x219   : > { %v948_v21 = vadd.f32 %v947_v19, %v868_v18 }
 0x21a   : > { %v1110_v22 = vpop.f32.mrf.mxu0 }
 0x21b   : > { %v1114_v23 = vmul.f32 0.35355338, %v1110_v22  ;;  %v949_v24 = vsel %vm872_vm2, %v948_v21, -inf }
 0x21c   : > { %v3082_v25 = vpop.f32.mrf.mxu0  ;;  %950 = vmax.xlane.f32.xlu1 %v949_v24 }
 0x21d   : > { %v1115_v26 = vadd.f32 %v1114_v23, %v868_v18 }
 0x21e   : > { %v1277_v27 = vpop.f32.mrf.mxu0 }
 0x21f   : > { %v1281_v28 = vmul.f32 0.35355338, %v1277_v27  ;;  %v1116_v29 = vsel %vm872_vm2, %v1115_v26, -inf }
 0x220   : > { %1117 = vmax.xlane.f32.xlu0 %v1116_v29  ;;  %v3092_v30 = vpop.f32.mrf.mxu0 }
 0x221   : > { %v1282_v31 = vadd.f32 %v1281_v28, %v868_v18  ;;  %v2953_v30 = vld [vmem:[%s3866_s8] ss:$0 sm:$0xff]  ;;  %s3871_s8 = smov 104  }
 0x222   : > { %v1444_v32 = vpop.f32.mrf.mxu0 }
 0x223   : > { %v1283_v33 = vsel %vm872_vm2, %v1282_v31, -inf  ;;  %v1448_v35 = vmul.f32 0.35355338, %v1444_v32 }
 0x224   : > { %1284 = vmax.xlane.f32.xlu0 %v1283_v33  ;;  %v3102_v34 = vpop.f32.mrf.mxu0 }
 0x225   : > { %v1449_v36 = vadd.f32 %v1448_v35, %v868_v18 }
 0x227   : > { %v1450_v37 = vsel %vm872_vm2, %v1449_v36, -inf }
 0x22d   : > { %1125 = vrot.lane.b32.xlu1 %v3481_v8, %s3301_s27  ;;  %s3845_s27 = smov 8  }
 0x23a   : > { %958 = vrot.lane.b32.xlu0 %v3481_v8, %s3302_s28 }
 0x23e   : > { %1459 = vrot.lane.b32.xlu0 %v3481_v8, %s3303_s2  ;;  %s3873_s2 = sld [smem:[#allocation5_spill]] }
 0x244   : > { %s776_s4 = scalar_lea.vmem %s3873_s2, %s3881_s26  ;;  %s3874_s26 = smov 80  }
 0x251   : > { %1451 = vmax.xlane.f32.xlu1 %v1450_v37 }
 0x262   : > { %1292 = vrot.lane.b32.xlu1 %v3481_v8, %s3304_s29  ;;  %s3865_s29 = sld [smem:[#allocation8_spill]] }
 0x268   : > { %v1557_v8 = vld [vmem:[%s3865_s29 + $0x18] sm:$0xff]  ;;  %v1556_v9 = vld [vmem:[%s3865_s29 + $0x10] sm:$0xff]  ;;  %v1555_v10 = vld [vmem:[%s3865_s29 + $0x8] sm:$0xff] }
 0x269   : > { %3109 = vmatpush3.msra.mxu0 %v1557_v8  ;;  %v1554_v16 = vld [vmem:[%s3865_s29] sm:$0xff] }
 0x26a   : > { %3110 = vmatprep.subr.mxu0 %v3292_v1 }
 0x26b   : > { %3111 = vmatpush3.msra.mxu0 %v1556_v9 }
 0x26c   : > { %3112 = vmatprep.subr.mxu0 %v3292_v1 }
 0x26d   : > { %3113 = vmatpush3.msra.mxu0 %v1555_v10 }
 0x26e   : > { %3114 = vmatprep.subr.mxu0 %v3292_v1 }
 0x26f   : > { %3115 = vmatpush3.msra.mxu0 %v1554_v16 }
 0x270   : > { %3130 = vmatprep.subr.mxu0 %v3292_v1 }
 0x2a5   : > { %v951_v38 = vpop.xlane.xlu1 %950 }
 0x2a6   : > { %v952_v39 = vsub.f32 %v948_v21, %v951_v38 }
 0x2a8   : > { %v953_v40 = vmul.f32 1.442695, %v952_v39 }
 0x2a9   : > { %v1118_v41 = vpop.xlane.xlu0 %1117  ;;  %v1126_v49 = vpop.permute.xlu1 %1125 }
 0x2aa   : > { %3246 = vpow2.f32 %v953_v40  ;;  %v1119_v42 = vsub.f32 %v1115_v26, %v1118_v41  ;;  %v1756_v41 = vld [vmem:[%s3824_s12 + $0x18] sm:$0xff] }
 0x2ac   : > { %v1120_v43 = vmul.f32 1.442695, %v1119_v42  ;;  %v1754_v42 = vld [vmem:[%s3824_s12 + $0x8] sm:$0xff] }
 0x2ad   : > { %v1285_v44 = vpop.xlane.xlu0 %1284 }
 0x2ae   : > { %3248 = vpow2.f32 %v1120_v43  ;;  %v1286_v45 = vsub.f32 %v1282_v31, %v1285_v44  ;;  %v1753_v43 = vld [vmem:[%s3824_s12] sm:$0xff] }
 0x2af   : > { %v782_v44 = vld [vmem:[%s769_s0] sm:$0xff]  ;;  %s3869_s0 = smov 120  }
 0x2b0   : > { %v1287_v46 = vmul.f32 1.442695, %v1286_v45  ;;  %v1672_v45 = vld [vmem:[%s3822_s10 + $0x18] sm:$0xff] }
 0x2b1   : > { %v959_v47 = vpop.permute.xlu0 %958 }
 0x2b2   : > { %3250 = vpow2.f32 %v1287_v46  ;;  %3074 = vmatpush3.msra.mxu1 %v959_v47  ;;  %v1671_v46 = vld [vmem:[%s3822_s10 + $0x10] sm:$0xff]  ;;  %v1670_v47 = vld [vmem:[%s3822_s10 + $0x8] sm:$0xff] }
 0x2b3   : > { %3083 = vmatprep.subr.mxu1 %v3292_v1 }
 0x2b5   : > { %v1460_v59 = vpop.permute.xlu0 %1459 }
 0x2b7   : > { %v3247_v48 = vpop.eup %3246 }
 0x2b8   : > { %3076 = vmatmul.mubr.msk.f32.vlgmr.msra.gmra.mxu1 %vm872_vm2, %v3247_v48  ;;  %v955_v54 = vsel %vm872_vm2, %v3247_v48, 0.0  ;;  %v1669_v48 = vld [vmem:[%s3822_s10] sm:$0xff] }
 0x2b9   : > { %3084 = vmatpush3.msra.mxu1 %v1126_v49  ;;  %3085 = vmatprep.mubr.msk.f32.mxu1 %vm3293_vm0, %v3292_v1 }
 0x2ba   : > { %3093 = vmatprep.subr.mxu1 %v3292_v1 }
 0x2bb   : > { %v3249_v50 = vpop.eup %3248 }
 0x2bc   : > { %3086 = vmatmul.mubr.msk.f32.vlgmr.msra.gmra.mxu1 %vm872_vm2, %v3249_v50  ;;  %v1122_v51 = vsel %vm872_vm2, %v3249_v50, 0.0 }
 0x2bd   : > { %1123 = vadd.xlane.f32.xlu1 %v1122_v51  ;;  %3095 = vmatprep.mubr.msk.f32.mxu1 %vm3293_vm0, %v3292_v1 }
 0x2bf   : > { %v3251_v52 = vpop.eup %3250 }
 0x2c0   : > { %v1289_v53 = vsel %vm872_vm2, %v3251_v52, 0.0 }
 0x2c1   : > { %1290 = vadd.xlane.f32.xlu0 %v1289_v53  ;;  %956 = vadd.xlane.f32.xlu1 %v955_v54 }
 0x2da   : > { %v1452_v55 = vpop.xlane.xlu1 %1451 }
 0x2db   : > { %v1453_v56 = vsub.f32 %v1449_v36, %v1452_v55  ;;  %v2956_v55 = vld [vmem:[%s3821_s9] ss:$0 sm:$0xff] }
 0x2dd   : > { %v1454_v57 = vmul.f32 1.442695, %v1453_v56 }
 0x2de   : > { %v1293_v58 = vpop.permute.xlu1 %1292 }
 0x2df   : > { %3252 = vpow2.f32 %v1454_v57  ;;  %3094 = vmatpush3.msra.mxu1 %v1293_v58  ;;  %v2959_v58 = vld [vmem:[%s3825_s13] ss:$0 sm:$0xff] }
 0x2e0   : > { %3096 = vmatmul.mubr.msk.f32.vlgmr.msra.gmra.mxu1 %vm872_vm2, %v3251_v52  ;;  %3103 = vmatprep.subr.mxu1 %v3292_v1 }
 0x2e1   : > { %3104 = vmatpush3.msra.mxu1 %v1460_v59  ;;  %3105 = vmatprep.mubr.msk.f32.mxu1 %vm3293_vm0, %v3292_v1 }
 0x2e2   : > { %3119 = vmatprep.subr.mxu1 %v3292_v1 }
 0x2ec   : > { %v3253_v60 = vpop.eup %3252 }
 0x2ed   : > { %3106 = vmatmul.mubr.msk.f32.vlgmr.msra.gmra.mxu1 %vm872_vm2, %v3253_v60  ;;  %v1456_v61 = vsel %vm872_vm2, %v3253_v60, 0.0 }
 0x2ee   : > { %1457 = vadd.xlane.f32.xlu0 %v1456_v61  ;;  %3127 = vmatprep.mubr.msk.f32.mxu1 %vm3293_vm0, %v3292_v1 }
 0x2ef   : > { %3120 = vmatpush3.msra.mxu1 %v1672_v45 }
 0x2f0   : > { %3121 = vmatprep.subr.mxu1 %v3292_v1 }
 0x2f1   : > { %3122 = vmatpush3.msra.mxu1 %v1671_v46 }
 0x2f2   : > { %3123 = vmatprep.subr.mxu1 %v3292_v1 }
 0x2f3   : > { %3124 = vmatpush3.msra.mxu1 %v1670_v47 }
 0x2f4   : > { %3125 = vmatprep.subr.mxu1 %v3292_v1 }
 0x2f5   : > { %3126 = vmatpush3.msra.mxu1 %v1669_v48 }
 0x2f6   : > { %3141 = vmatprep.subr.mxu1 %v3292_v1 }
 0x346   : > { %v1124_v62 = vpop.xlane.xlu1 %1123 }
 0x347   : > { %3254 = vrcp.f32 %v1124_v62 }
 0x34a   : > { %v1291_v7 = vpop.xlane.xlu0 %1290  ;;  %v957_v21 = vpop.xlane.xlu1 %956 }
 0x34b   : > { %3256 = vrcp.f32 %v1291_v7 }
 0x354   : > { %v3255_v2 = vpop.eup %3254 }
 0x358   : > { %v3257_v12 = vpop.eup %3256 }
 0x377   : > { %v1458_v11 = vpop.xlane.xlu0 %1457 }
 0x378   : > { %v1030_v63 = vpop.f32.mrf.mxu1  ;;  %3258 = vrcp.f32 %v1458_v11 }
 0x379   : > { %3260 = vrcp.f32 %v957_v21 }
 0x37a   : > { %v3077_v0 = vpop.f32.mrf.mxu1 }
 0x37c   : > { %v1197_v3 = vpop.f32.mrf.mxu1 }
 0x37d   : > { %v1202_v4 = vmul.f32 %v3255_v2, %v1197_v3 }
 0x37e   : > { %v3087_v6 = vpop.f32.mrf.mxu1 }
 0x37f   : > { %1538 = vrot.lane.b32.xlu0 %v1202_v4, %s3845_s27 }
 0x385   : > { %v3259_v17 = vpop.eup %3258 }
 0x386   : > { %v3261_v22 = vpop.eup %3260 }
 0x387   : > { %v1035_v25 = vmul.f32 %v3261_v22, %v1030_v63  ;;  %v2957_v63 = vld [vmem:[%s3823_s11] ss:$0 sm:$0xff] }
 0x3a0   : > { %v1364_v13 = vpop.f32.mrf.mxu1 }
 0x3a1   : > { %v1369_v14 = vmul.f32 %v3257_v12, %v1364_v13  ;;  %v2963_v12 = vld [vmem:[%s776_s4] ss:$0 sm:$0xff]  ;;  %s780_s4 = scalar_lea.vmem %s3836_s24, %s3460_s30 }
 0x3a2   : > { %v3097_v15 = vpop.f32.mrf.mxu1 }
 0x3a3   : > { %1542 = vrot.lane.b32.xlu1 %v1369_v14, %s3844_s25  ;;  %s3868_s25 = sld [smem:[#allocation10_spill]] }
 0x3a9   : > { %v2955_v53 = vld [vmem:[%s3868_s25] ss:$0 sm:$0xff]  ;;  %s3872_s25 = smov 96  }
 0x3ad   : > { %v1531_v18 = vpop.f32.mrf.mxu1 }
 0x3ae   : > { %v1536_v19 = vmul.f32 %v3259_v17, %v1531_v18 }
 0x3af   : > { %v3107_v20 = vpop.f32.mrf.mxu1 }
 0x3b0   : > { %1546 = vrot.lane.b32.xlu1 %v1536_v19, %s3843_s7 }
 0x3f1   : > { %v1539_v23 = vpop.permute.xlu0 %1538 }
 0x3f2   : > { %v1549_v26 = vsel %vm872_vm2, %v1035_v25, %v1539_v23 }
 0x415   : > { %v1543_v24 = vpop.permute.xlu1 %1542 }
 0x416   : > { %v1551_v27 = vsel %vm1550_vm3, %v1549_v26, %v1543_v24 }
 0x422   : > { %v1547_v28 = vpop.permute.xlu1 %1546 }
 0x423   : > { %v1553_v29 = vsel %vm1552_vm4, %v1551_v27, %v1547_v28 }
 0x424   : > { %3117 = vmatmul.mubr.msk.f32.vlgmr.msra.gmra.mxu0 %vm794_vm1, %v1553_v29 }
 0x425   : > { %3138 = vmatprep.mubr.msk.f32.mxu0 %vm3293_vm0, %v3292_v1  ;;  %3131 = vmatpush3.msra.mxu0 %v1756_v41 }
 0x426   : > { %3132 = vmatprep.subr.mxu0 %v3292_v1 }
 0x4e4   : > { %v1634_v31 = vpop.f32.mrf.mxu0 }
 0x4e5   : > { %v1635_v32 = vadd.f32 %v2953_v30, %v1634_v31 }
 0x4e6   : > { %v3118_v33 = vpop.f32.mrf.mxu0 }
 0x4e7   : > { %v1638_v34 = vadd.f32 %v1635_v32, %v3470_v5  ;;  %v1755_v5 = vld [vmem:[%s3824_s12 + $0x10] sm:$0xff] }
 0x4e8   : > { %3133 = vmatpush3.msra.mxu0 %v1755_v5 }
 0x4e9   : > { %v1641_v35 = vsel %vm794_vm1, %v1638_v34, 0.0  ;;  %3134 = vmatprep.subr.mxu0 %v3292_v1 }
 0x4ea   : > { %1642 = vadd.xlane.f32.xlu0 %v1641_v35  ;;  %3135 = vmatpush3.msra.mxu0 %v1754_v42 }
 0x4eb   : > { %3136 = vmatprep.subr.mxu0 %v3292_v1 }
 0x4ec   : > { %3137 = vmatpush3.msra.mxu0 %v1753_v43 }
 0x4ed   : > { %3139 = vmatmul.mubr.msk.f32.vlgmr.msra.gmra.mxu0 %vm794_vm1, %v782_v44  ;;  %3151 = vmatprep.subr.mxu0 %v3292_v1 }
 0x4ee   : > { %3153 = vmatprep.mubr.msk.f32.mxu0 %vm3293_vm0, %v3292_v1 }
 0x573   : > { %v1643_v36 = vpop.xlane.xlu0 %1642 }
 0x574   : > { %v1645_v37 = vmul.f32 0.03125, %v1643_v36 }
 0x576   : > { %v1646_v38 = vsub.f32 %v1638_v34, %v1645_v37 }
 0x578   : > { %v1647_v39 = vmul.f32 %v1646_v38, %v1646_v38 }
 0x57a   : > { %v1648_v40 = vsel %vm794_vm1, %v1647_v39, 0.0 }
 0x57b   : > { %1649 = vadd.xlane.f32.xlu1 %v1648_v40 }
 0x5ad   : > { %v1833_v59 = vpop.f32.mrf.mxu0 }
 0x5ae   : > { %v3635_v60 = vadd.f32 %v2959_v58, %v1833_v59  ;;  %v2528_v59 = vld [vmem:[%s3826_s14 + $0x18] sm:$0xff] }
 0x5af   : > { %v3140_v61 = vpop.f32.mrf.mxu0 }
 0x5b0   : > { %2011 = vrot.lane.b32.xlu0 %v3635_v60, %s3869_s0  ;;  %v2527_v61 = vld [vmem:[%s3826_s14 + $0x10] sm:$0xff] }
 0x5b4   : > { %2178 = vrot.lane.b32.xlu0 %v3635_v60, %s3870_s1 }
 0x5b8   : > { %2345 = vrot.lane.b32.xlu0 %v3635_v60, %s3871_s8 }
 0x604   : > { %v1650_v49 = vpop.xlane.xlu1 %1649 }
 0x605   : > { %v1651_v50 = vmul.f32 0.03125, %v1650_v49 }
 0x607   : > { %v1652_v51 = vadd.f32 1e-05, %v1651_v50 }
 0x609   : > { %3262 = vrsqrt.f32 %v1652_v51 }
 0x616   : > { %v3263_v52 = vpop.eup %3262 }
 0x617   : > { %v1654_v54 = vmul.f32 %v3263_v52, %v1646_v38 }
 0x619   : > { %v1661_v56 = vmul.f32 %v2955_v53, %v1654_v54 }
 0x61b   : > { %v3626_v57 = vadd.f32 %v2956_v55, %v1661_v56 }
 0x61d   : > { %3128 = vmatmul.mubr.msk.f32.vlgmr.msra.gmra.mxu1 %vm794_vm1, %v3626_v57 }
 0x61e   : > { %3143 = vmatprep.mubr.msk.f32.mxu1 %vm3293_vm0, %v3292_v1  ;;  %3142 = vmatpush3.xpose.msk.msra.mxu1 %vm872_vm2, %v3635_v60 }
 0x61f   : > { %3146 = vmatprep.subr.mxu1 %v3292_v1 }
 0x622   : > { %v2012_v62 = vpop.permute.xlu0 %2011 }
 0x623   : > { %3152 = vmatpush3.xpose.msk.msra.mxu0 %vm872_vm2, %v2012_v62  ;;  %v2526_v62 = vld [vmem:[%s3826_s14 + $0x8] sm:$0xff] }
 0x624   : > { %3161 = vmatprep.subr.mxu0 %v3292_v1 }
 0x626   : > { %v2179_v4 = vpop.permute.xlu0 %2178 }
 0x62a   : > { %v2346_v8 = vpop.permute.xlu0 %2345 }
 0x6dd   : > { %v1749_v0 = vpop.f32.mrf.mxu1 }
 0x6de   : > { %v1750_v2 = vadd.f32 %v2957_v63, %v1749_v0  ;;  %v2525_v63 = vld [vmem:[%s3826_s14] sm:$0xff] }
 0x6df   : > { %v3129_v3 = vpop.f32.mrf.mxu1 }
 0x6e0   : > { %2009 = vrot.lane.b32.xlu1 %v1750_v2, %s3869_s0  ;;  %3144 = vmatmul.mubr.msk.f32.vlgmr.msra.gmra.mxu1 %vm872_vm2, %v1750_v2  ;;  %s3875_s0 = smov 72  }
 0x6e1   : > { %3148 = vmatprep.mubr.msk.f32.mxu1 %vm3293_vm0, %v3292_v1 }
 0x6e4   : > { %2176 = vrot.lane.b32.xlu1 %v1750_v2, %s3870_s1  ;;  %s3876_s1 = smov 88  }
 0x6e8   : > { %2343 = vrot.lane.b32.xlu1 %v1750_v2, %s3871_s8 }
 0x6ec   : > { %1931 = vrot.lane.b32.xlu1 %v3635_v60, %s3872_s25 }
 0x752   : > { %v2010_v6 = vpop.permute.xlu1 %2009 }
 0x753   : > { %3154 = vmatmul.mubr.msk.f32.vlgmr.msra.gmra.mxu0 %vm872_vm2, %v2010_v6 }
 0x754   : > { %3162 = vmatpush3.xpose.msk.msra.mxu0 %vm872_vm2, %v2179_v4  ;;  %3163 = vmatprep.mubr.msk.f32.mxu0 %vm3293_vm0, %v3292_v1 }
 0x755   : > { %3171 = vmatprep.subr.mxu0 %v3292_v1 }
 0x756   : > { %v2177_v7 = vpop.permute.xlu1 %2176 }
 0x757   : > { %3164 = vmatmul.mubr.msk.f32.vlgmr.msra.gmra.mxu0 %vm872_vm2, %v2177_v7 }
 0x758   : > { %3172 = vmatpush3.xpose.msk.msra.mxu0 %vm872_vm2, %v2346_v8  ;;  %3173 = vmatprep.mubr.msk.f32.mxu0 %vm3293_vm0, %v3292_v1 }
 0x759   : > { %3181 = vmatprep.subr.mxu0 %v3292_v1 }
 0x75a   : > { %v2344_v9 = vpop.permute.xlu1 %2343 }
 0x75b   : > { %3174 = vmatmul.mubr.msk.f32.vlgmr.msra.gmra.mxu0 %vm872_vm2, %v2344_v9 }
 0x75c   : > { %3189 = vmatprep.mubr.msk.f32.mxu0 %vm3293_vm0, %v3292_v1  ;;  %3182 = vmatpush3.msra.mxu0 %v2528_v59  ;;  %v2980_v59 = vld [vmem:[%s3833_s21] ss:$0 sm:$0xff] }
 0x75d   : > { %3183 = vmatprep.subr.mxu0 %v3292_v1 }
 0x75e   : > { %v1932_v10 = vpop.permute.xlu1 %1931  ;;  %3184 = vmatpush3.msra.mxu0 %v2527_v61 }
 0x75f   : > { %3147 = vmatpush3.msra.mxu1 %v1932_v10  ;;  %3185 = vmatprep.subr.mxu0 %v3292_v1 }
 0x760   : > { %3156 = vmatprep.subr.mxu1 %v3292_v1  ;;  %3186 = vmatpush3.msra.mxu0 %v2526_v62 }
 0x761   : > { %3187 = vmatprep.subr.mxu0 %v3292_v1 }
 0x762   : > { %3188 = vmatpush3.msra.mxu0 %v2525_v63 }
 0x763   : > { %3203 = vmatprep.subr.mxu0 %v3292_v1 }
 0x7a0   : > { %v1910_v11 = vpop.f32.mrf.mxu1 }
 0x7a1   : > { %v1914_v13 = vmul.f32 0.35355338, %v1910_v11 }
 0x7a2   : > { %v3145_v14 = vpop.f32.mrf.mxu1 }
 0x7a3   : > { %v1921_v15 = vadd.f32 %v2963_v12, %v1914_v13 }
 0x7a5   : > { %v1922_v16 = vsel %vm872_vm2, %v1921_v15, -inf }
 0x7a6   : > { %1923 = vmax.xlane.f32.xlu0 %v1922_v16 }
 0x813   : > { %v2083_v17 = vpop.f32.mrf.mxu0 }
 0x814   : > { %v2087_v18 = vmul.f32 0.35355338, %v2083_v17 }
 0x815   : > { %v3155_v19 = vpop.f32.mrf.mxu0 }
 0x816   : > { %v2088_v20 = vadd.f32 %v2963_v12, %v2087_v18 }
 0x817   : > { %v2250_v21 = vpop.f32.mrf.mxu0 }
 0x818   : > { %v2254_v22 = vmul.f32 0.35355338, %v2250_v21  ;;  %v2089_v23 = vsel %vm872_vm2, %v2088_v20, -inf }
 0x819   : > { %2090 = vmax.xlane.f32.xlu1 %v2089_v23  ;;  %v3165_v24 = vpop.f32.mrf.mxu0  ;;  %v2974_v23 = vld [vmem:[%s3827_s15] ss:$0 sm:$0xff] }
 0x81a   : > { %v2255_v25 = vadd.f32 %v2963_v12, %v2254_v22 }
 0x81b   : > { %v2417_v26 = vpop.f32.mrf.mxu0 }
 0x81c   : > { %v2421_v27 = vmul.f32 0.35355338, %v2417_v26  ;;  %v2256_v28 = vsel %vm872_vm2, %v2255_v25, -inf }
 0x81d   : > { %v3175_v29 = vpop.f32.mrf.mxu0  ;;  %2257 = vmax.xlane.f32.xlu0 %v2256_v28 }
 0x81e   : > { %v2422_v30 = vadd.f32 %v2963_v12, %v2421_v27 }
 0x820   : > { %v2423_v31 = vsel %vm872_vm2, %v2422_v30, -inf }
 0x821   : > { %2424 = vmax.xlane.f32.xlu0 %v2423_v31 }
 0x82a   : > { %2265 = vrot.lane.b32.xlu1 %v3635_v60, %s3874_s26  ;;  %s3877_s26 = smov 8  }
 0x82e   : > { %2432 = vrot.lane.b32.xlu1 %v3635_v60, %s3875_s0  ;;  %s3878_s0 = smov 16  }
 0x82f   : > { %v1924_v32 = vpop.xlane.xlu0 %1923 }
 0x830   : > { %v1925_v33 = vsub.f32 %v1921_v15, %v1924_v32 }
 0x832   : > { %v1926_v34 = vmul.f32 1.442695, %v1925_v33 }
 0x834   : > { %3264 = vpow2.f32 %v1926_v34  ;;  %v2642_v34 = vld [vmem:[%s3830_s18 + $0x18] sm:$0xff] }
 0x837   : > { %2098 = vrot.lane.b32.xlu0 %v3635_v60, %s3876_s1  ;;  %s3879_s1 = smov 24  }
 0x841   : > { %v3265_v35 = vpop.eup %3264 }
 0x842   : > { %3149 = vmatmul.mubr.msk.f32.vlgmr.msra.gmra.mxu1 %vm872_vm2, %v3265_v35  ;;  %v1928_v53 = vsel %vm872_vm2, %v3265_v35, 0.0  ;;  %v2641_v35 = vld [vmem:[%s3830_s18 + $0x10] sm:$0xff] }
 0x843   : > { %3158 = vmatprep.mubr.msk.f32.mxu1 %vm3293_vm0, %v3292_v1 }
 0x8a2   : > { %v2091_v36 = vpop.xlane.xlu1 %2090 }
 0x8a3   : > { %v2092_v37 = vsub.f32 %v2088_v20, %v2091_v36  ;;  %v2639_v36 = vld [vmem:[%s3830_s18] sm:$0xff] }
 0x8a5   : > { %v2093_v38 = vmul.f32 1.442695, %v2092_v37  ;;  %v2731_v37 = vld [vmem:[%s3832_s20 + $0x38] sm:$0xff] }
 0x8a6   : > { %v2258_v39 = vpop.xlane.xlu0 %2257  ;;  %v2266_v45 = vpop.permute.xlu1 %2265 }
 0x8a7   : > { %3266 = vpow2.f32 %v2093_v38  ;;  %v2259_v40 = vsub.f32 %v2255_v25, %v2258_v39  ;;  %v2730_v38 = vld [vmem:[%s3832_s20 + $0x30] sm:$0xff]  ;;  %v2729_v39 = vld [vmem:[%s3832_s20 + $0x28] sm:$0xff] }
 0x8a9   : > { %v2260_v41 = vmul.f32 1.442695, %v2259_v40  ;;  %v2728_v40 = vld [vmem:[%s3832_s20 + $0x20] sm:$0xff] }
 0x8aa   : > { %v2425_v5 = vpop.xlane.xlu0 %2424  ;;  %v2433_v49 = vpop.permute.xlu1 %2432 }
 0x8ab   : > { %3268 = vpow2.f32 %v2260_v41  ;;  %v2426_v42 = vsub.f32 %v2422_v30, %v2425_v5  ;;  %v2727_v41 = vld [vmem:[%s3832_s20 + $0x18] sm:$0xff] }
 0x8ad   : > { %v2427_v43 = vmul.f32 1.442695, %v2426_v42 }
 0x8ae   : > { %v2099_v44 = vpop.permute.xlu0 %2098 }
 0x8af   : > { %3270 = vpow2.f32 %v2427_v43  ;;  %3157 = vmatpush3.msra.mxu1 %v2099_v44 }
 0x8b0   : > { %3166 = vmatprep.subr.mxu1 %v3292_v1 }
 0x8b4   : > { %v3267_v46 = vpop.eup %3266 }
 0x8b5   : > { %3159 = vmatmul.mubr.msk.f32.vlgmr.msra.gmra.mxu1 %vm872_vm2, %v3267_v46  ;;  %v2095_v47 = vsel %vm872_vm2, %v3267_v46, 0.0 }
 0x8b6   : > { %3167 = vmatpush3.msra.mxu1 %v2266_v45  ;;  %2096 = vadd.xlane.f32.xlu0 %v2095_v47  ;;  %v2976_v45 = vld [vmem:[%s3828_s16] ss:$0 sm:$0xff] }
 0x8b7   : > { %3168 = vmatprep.mubr.msk.f32.mxu1 %vm3293_vm0, %v3292_v1  ;;  %3176 = vmatprep.subr.mxu1 %v3292_v1  ;;  %v2977_v47 = vld [vmem:[%s3829_s17] ss:$0 sm:$0xff] }
 0x8b8   : > { %v3269_v48 = vpop.eup %3268 }
 0x8b9   : > { %3169 = vmatmul.mubr.msk.f32.vlgmr.msra.gmra.mxu1 %vm872_vm2, %v3269_v48  ;;  %v2262_v50 = vsel %vm872_vm2, %v3269_v48, 0.0 }
 0x8ba   : > { %3177 = vmatpush3.msra.mxu1 %v2433_v49  ;;  %2263 = vadd.xlane.f32.xlu1 %v2262_v50  ;;  %v2726_v50 = vld [vmem:[%s3832_s20 + $0x10] sm:$0xff] }
 0x8bb   : > { %3178 = vmatprep.mubr.msk.f32.mxu1 %vm3293_vm0, %v3292_v1  ;;  %3192 = vmatprep.subr.mxu1 %v3292_v1 }
 0x8bc   : > { %v3271_v51 = vpop.eup %3270 }
 0x8bd   : > { %3179 = vmatmul.mubr.msk.f32.vlgmr.msra.gmra.mxu1 %vm872_vm2, %v3271_v51  ;;  %v2429_v52 = vsel %vm872_vm2, %v3271_v51, 0.0  ;;  %v2725_v51 = vld [vmem:[%s3832_s20 + $0x8] sm:$0xff] }
 0x8be   : > { %2430 = vadd.xlane.f32.xlu0 %v2429_v52  ;;  %3200 = vmatprep.mubr.msk.f32.mxu1 %vm3293_vm0, %v3292_v1  ;;  %v2724_v52 = vld [vmem:[%s3832_s20] sm:$0xff] }
 0x8bf   : > { %3193 = vmatpush3.msra.mxu1 %v2642_v34 }
 0x8c0   : > { %3194 = vmatprep.subr.mxu1 %v3292_v1 }
 0x8c1   : > { %3195 = vmatpush3.msra.mxu1 %v2641_v35 }
 0x8c2   : > { %1929 = vadd.xlane.f32.xlu0 %v1928_v53  ;;  %3196 = vmatprep.subr.mxu1 %v3292_v1  ;;  %v2978_v53 = vld [vmem:[%s3831_s19] ss:$0 sm:$0xff] }
 0x902   : > { %v2003_v54 = vpop.f32.mrf.mxu1 }
 0x904   : > { %v3150_v55 = vpop.f32.mrf.mxu1 }
 0x93f   : > { %v2097_v56 = vpop.xlane.xlu0 %2096 }
 0x940   : > { %3272 = vrcp.f32 %v2097_v56 }
 0x943   : > { %v2264_v58 = vpop.xlane.xlu1 %2263 }
 0x944   : > { %3274 = vrcp.f32 %v2264_v58 }
 0x947   : > { %v2431_v60 = vpop.xlane.xlu0 %2430 }
 0x948   : > { %3276 = vrcp.f32 %v2431_v60 }
 0x94b   : > { %v1930_v14 = vpop.xlane.xlu0 %1929 }
 0x94c   : > { %3278 = vrcp.f32 %v1930_v14 }
 0x94d   : > { %v3273_v0 = vpop.eup %3272 }
 0x951   : > { %v3275_v6 = vpop.eup %3274 }
 0x955   : > { %v3277_v10 = vpop.eup %3276 }
 0x959   : > { %v3279_v15 = vpop.eup %3278 }
 0x95a   : > { %v2008_v17 = vmul.f32 %v3279_v15, %v2003_v54 }
 0x975   : > { %v2170_v2 = vpop.f32.mrf.mxu1 }
 0x976   : > { %v2175_v3 = vmul.f32 %v3273_v0, %v2170_v2 }
 0x977   : > { %v3160_v4 = vpop.f32.mrf.mxu1 }
 0x978   : > { %2511 = vrot.lane.b32.xlu1 %v2175_v3, %s3877_s26 }
 0x979   : > { %v2337_v7 = vpop.f32.mrf.mxu1 }
 0x97a   : > { %v2342_v8 = vmul.f32 %v3275_v6, %v2337_v7 }
 0x97b   : > { %v3170_v9 = vpop.f32.mrf.mxu1 }
 0x97c   : > { %2515 = vrot.lane.b32.xlu0 %v2342_v8, %s3878_s0 }
 0x97d   : > { %v2504_v11 = vpop.f32.mrf.mxu1 }
 0x97e   : > { %v2509_v12 = vmul.f32 %v3277_v10, %v2504_v11  ;;  %v2982_v11 = vld [vmem:[%s3834_s22] ss:$0 sm:$0xff] }
 0x97f   : > { %v3180_v13 = vpop.f32.mrf.mxu1 }
 0x980   : > { %2519 = vrot.lane.b32.xlu1 %v2509_v12, %s3879_s1  ;;  %v2983_v13 = vld [vmem:[%s3835_s23] ss:$0 sm:$0xff] }
 0x9ea   : > { %v2512_v16 = vpop.permute.xlu1 %2511 }
 0x9eb   : > { %v2522_v19 = vsel %vm872_vm2, %v2008_v17, %v2512_v16 }
 0x9ee   : > { %v2516_v18 = vpop.permute.xlu0 %2515 }
 0x9ef   : > { %v2523_v20 = vsel %vm1550_vm3, %v2522_v19, %v2516_v18 }
 0x9f2   : > { %v2520_v21 = vpop.permute.xlu1 %2519 }
 0x9f3   : > { %v2524_v22 = vsel %vm1552_vm4, %v2523_v20, %v2520_v21 }
 0x9f4   : > { %3190 = vmatmul.mubr.msk.f32.vlgmr.msra.gmra.mxu0 %vm794_vm1, %v2524_v22 }
 0x9f5   : > { %3219 = vmatprep.mubr.msk.f32.mxu0 %vm3293_vm0, %v3292_v1  ;;  %3204 = vmatpush3.msra.mxu0 %v2731_v37 }
 0x9f6   : > { %3205 = vmatprep.subr.mxu0 %v3292_v1 }
 0x9f7   : > { %3206 = vmatpush3.msra.mxu0 %v2730_v38 }
 0x9f8   : > { %3207 = vmatprep.subr.mxu0 %v3292_v1 }
 0x9f9   : > { %3208 = vmatpush3.msra.mxu0 %v2729_v39 }
 0x9fa   : > { %3209 = vmatprep.subr.mxu0 %v3292_v1 }
 0x9fb   : > { %3210 = vmatpush3.msra.mxu0 %v2728_v40 }
 0x9fc   : > { %3211 = vmatprep.subr.mxu0 %v3292_v1 }
 0x9fd   : > { %3212 = vmatpush3.msra.mxu0 %v2727_v41 }
 0x9fe   : > { %3213 = vmatprep.subr.mxu0 %v3292_v1 }
 0x9ff   : > { %3214 = vmatpush3.msra.mxu0 %v2726_v50 }
 0xa00   : > { %3215 = vmatprep.subr.mxu0 %v3292_v1 }
 0xa01   : > { %3216 = vmatpush3.msra.mxu0 %v2725_v51 }
 0xa02   : > { %3217 = vmatprep.subr.mxu0 %v3292_v1 }
 0xa03   : > { %3218 = vmatpush3.msra.mxu0 %v2724_v52 }
 0xab4   : > { %v2605_v24 = vpop.f32.mrf.mxu0 }
 0xab5   : > { %v2606_v25 = vadd.f32 %v2974_v23, %v2605_v24 }
 0xab6   : > { %v3191_v26 = vpop.f32.mrf.mxu0 }
 0xab7   : > { %v2609_v27 = vadd.f32 %v2606_v25, %v3626_v57  ;;  %v2640_v57 = vld [vmem:[%s3830_s18 + $0x8] sm:$0xff] }
 0xab8   : > { %3197 = vmatpush3.msra.mxu1 %v2640_v57 }
 0xab9   : > { %v2612_v28 = vsel %vm794_vm1, %v2609_v27, 0.0  ;;  %3198 = vmatprep.subr.mxu1 %v3292_v1 }
 0xaba   : > { %2613 = vadd.xlane.f32.xlu1 %v2612_v28  ;;  %3199 = vmatpush3.msra.mxu1 %v2639_v36 }
 0xb43   : > { %v2614_v29 = vpop.xlane.xlu1 %2613 }
 0xb44   : > { %v2615_v30 = vmul.f32 0.03125, %v2614_v29 }
 0xb46   : > { %v2616_v31 = vsub.f32 %v2609_v27, %v2615_v30 }
 0xb48   : > { %v2617_v32 = vmul.f32 %v2616_v31, %v2616_v31 }
 0xb4a   : > { %v2618_v33 = vsel %vm794_vm1, %v2617_v32, 0.0 }
 0xb4b   : > { %2619 = vadd.xlane.f32.xlu0 %v2618_v33 }
 0xbd4   : > { %v2620_v5 = vpop.xlane.xlu0 %2619 }
 0xbd5   : > { %v2621_v42 = vmul.f32 0.03125, %v2620_v5 }
 0xbd7   : > { %v2622_v43 = vadd.f32 1e-05, %v2621_v42 }
 0xbd9   : > { %3280 = vrsqrt.f32 %v2622_v43 }
 0xbe6   : > { %v3281_v44 = vpop.eup %3280 }
 0xbe7   : > { %v2624_v46 = vmul.f32 %v3281_v44, %v2616_v31 }
 0xbe9   : > { %v2631_v48 = vmul.f32 %v2976_v45, %v2624_v46 }
 0xbeb   : > { %v2638_v49 = vadd.f32 %v2977_v47, %v2631_v48 }
 0xbed   : > { %3201 = vmatmul.mubr.msk.f32.vlgmr.msra.gmra.mxu1 %vm794_vm1, %v2638_v49 }
 0xcad   : > { %v2719_v54 = vpop.f32.mrf.mxu1 }
 0xcae   : > { %v2720_v55 = vadd.f32 %v2978_v53, %v2719_v54 }
 0xcaf   : > { %v3202_v56 = vpop.f32.mrf.mxu1 }
 0xcb0   : > { %v2723_v58 = vmax.f32 %v2720_v55, 0.0 }
 0xcb2   : > { %3220 = vmatmul.mubr.msk.f32.vlgmr.msra.gmra.mxu0 %vm2739_vm5, %v2723_v58 }
 0xd72   : > { %v2809_v60 = vpop.f32.mrf.mxu0 }
 0xd73   : > { %v2810_v61 = vadd.f32 %v2980_v59, %v2809_v60 }
 0xd74   : > { %v3221_v62 = vpop.f32.mrf.mxu0 }
 0xd75   : > { %v2813_v63 = vadd.f32 %v2810_v61, %v2638_v49 }
 0xd77   : > { %v2816_v1 = vsel %vm794_vm1, %v2813_v63, 0.0 }
 0xd78   : > { %2817 = vadd.xlane.f32.xlu0 %v2816_v1 }
 0xe01   : > { %v2818_v0 = vpop.xlane.xlu0 %2817 }
 0xe02   : > { %v2819_v2 = vmul.f32 0.03125, %v2818_v0 }
 0xe04   : > { %v2820_v3 = vsub.f32 %v2813_v63, %v2819_v2 }
 0xe06   : > { %v2821_v4 = vmul.f32 %v2820_v3, %v2820_v3 }
 0xe08   : > { %v2822_v6 = vsel %vm794_vm1, %v2821_v4, 0.0 }
 0xe09   : > { %2823 = vadd.xlane.f32.xlu1 %v2822_v6 }
 0xe92   : > { %v2824_v7 = vpop.xlane.xlu1 %2823 }
 0xe93   : > { %v2825_v8 = vmul.f32 0.03125, %v2824_v7 }
 0xe95   : > { %v2826_v9 = vadd.f32 1e-05, %v2825_v8 }
 0xe97   : > { %3282 = vrsqrt.f32 %v2826_v9 }
 0xea4   : > { %v3283_v10 = vpop.eup %3282 }
 0xea5   : > { %v2828_v12 = vmul.f32 %v3283_v10, %v2820_v3 }
 0xea7   : > { %v2835_v14 = vmul.f32 %v2982_v11, %v2828_v12 }
 0xea9   : > { %v2842_v15 = vadd.f32 %v2983_v13, %v2835_v14 }
 0xeab   : > { %2843 = vst.msk [vmem:[%s780_s4] sm:$0xff] %vm794_vm1, %v2842_v15 }
 0xeac PF: > { %s34_s5 = sadd.s32 1, %s3290_s5  }
 0xead   : > { %p31_p4 = scmp.ge.s32.totalorder %s34_s5, 4  }
 0xeaf   :  { %33 = sbr.rel (!%p31_p4) target bundleno = 10 (0xa), region = 155 }

</bundles_post_ra>
